<compile_context>
chip_gen: v7x
topology: tpu7x:2x2x1
jax: 0.10.0
libtpu: 0.0.40
codegen_flags: <defaults>
</compile_context>

<pallas_src>
import math

import jax
import jax.numpy as jnp
import numpy as np
from jax.experimental import pallas as pl
from jax.experimental.pallas import tpu as pltpu

_SQRT2 = math.sqrt(2.0)
_LN_EPS = 1e-5


def _gelu_exact(x):
    # PyTorch nn.GELU() default (erf-based, approximate='none').
    return 0.5 * x * (1.0 + jax.lax.erf(x / _SQRT2))


def _layernorm_onepass(x, gamma, beta):
    # Single pass over x: mu and E[x^2] together, var = E[x^2] - mu^2.
    mu = jnp.mean(x, axis=-1, keepdims=True)
    ex2 = jnp.mean(x * x, axis=-1, keepdims=True)
    var = jnp.maximum(ex2 - mu * mu, 0.0)
    return (x - mu) * jax.lax.rsqrt(var + _LN_EPS) * gamma + beta


def _ffn_kernel(f_ref, w1_ref, w2_ref, g_ref, b_ref, o_ref):
    f_in = f_ref[...]                                    # keep input dtype for the MXU
    dff = w2_ref.shape[0]

    # GLU: one fused matmul against [D, 2*Dff]; f32 accumulation on the MXU.
    y = jnp.dot(f_in, w1_ref[...], preferred_element_type=jnp.float32)   # [TN, 2*Dff]
    value = y[:, :dff]                                   # lane-aligned slice (Dff % 128 == 0)
    gate = y[:, dff:]
    h = _gelu_exact(gate) * value                        # f32 elementwise    [TN, Dff]

    # ff2: Linear(d_ff -> d_model, bias=False); cast h to weight dtype for MXU.
    upd = jnp.dot(h.astype(w2_ref.dtype), w2_ref[...],
                  preferred_element_type=jnp.float32)    # [TN, D]

    # residual + LayerNorm in f32.
    x = f_in.astype(jnp.float32) + upd
    out = _layernorm_onepass(x, g_ref[...].astype(jnp.float32),
                             b_ref[...].astype(jnp.float32))
    o_ref[...] = out.astype(o_ref.dtype)


def _round_up(x, m):
    return ((x + m - 1) // m) * m


def _vmem_capacity_bytes():
    try:
        return int(pltpu.get_tpu_info().vmem_capacity_bytes)
    except Exception:
        return 64 * 1024 * 1024   # conservative (v7x per-TC VMEM)


def _choose_tile_rows(N, D, Dff, in_isz, w_isz, requested, row_align, vmem_budget):
    # Fixed VMEM: weights (+ gamma/beta); assume up to 2 buffers to stay safe
    # even if the single-buffer fallback path is taken.
    fixed = 2 * ((2 * D * Dff + Dff * D) * w_isz + 2 * D * 4)
    # Per-row VMEM: double-buffered in/out row tiles + f32 intermediates
    # (y[2*Dff] + value/gate views [2*Dff] + h[Dff] + residual/x [2*D]).
    per_row = 4 * D * in_isz + 4 * (5 * Dff + 2 * D)
    avail = max(vmem_budget - fixed, per_row * row_align)
    t = min(requested, avail // per_row)
    # Never exceed the (aligned) row count, and keep >= 2 grid steps so
    # "parallel" can shard across v7x's two TensorCores.
    t = min(t, _round_up(N, row_align), _round_up(-(-N // 2), row_align))
    t = max(row_align, (t // row_align) * row_align)
    return int(t)


def positionwise_ff(f, params, *, tile_rows=1024):
    """f: [N, D]; params: w1 [D, 2*Dff], w2 [Dff, D], gamma/beta [D]. Eval-mode forward."""
    N, D = f.shape
    w1, w2 = params["w1"], params["w2"]
    Dff = w2.shape[0]
    gamma = params["gamma"].reshape(1, D).astype(jnp.float32)
    beta = params["beta"].reshape(1, D).astype(jnp.float32)

    in_isz = jnp.dtype(f.dtype).itemsize
    w_isz = jnp.dtype(w1.dtype).itemsize
    row_align = {4: 8, 2: 16, 1: 32}.get(in_isz, 8)

    vmem_budget = (_vmem_capacity_bytes() * 7) // 8      # ~56 MiB v7x, ~112 MiB v5e/v6e
    tn = _choose_tile_rows(N, D, Dff, in_isz, w_isz, tile_rows, row_align, vmem_budget)

    cost = pl.CostEstimate(
        flops=6 * N * D * Dff,                           # two GLU dots + ff2 dot
        transcendentals=N * Dff + N,                     # erf over the gate + per-row rsqrt
        bytes_accessed=2 * N * D * in_isz + 3 * D * Dff * w_isz + 2 * D * 4,
    )

    def build(single_buffer_consts):
        const_kw = {"pipeline_mode": pl.Buffered(1)} if single_buffer_consts else {}

        def const(shape):
            return pl.BlockSpec(shape, lambda i: (0, 0), **const_kw)

        row_spec = pl.BlockSpec((tn, D), lambda i: (i, 0))
        return pl.pallas_call(
            _ffn_kernel,
            out_shape=jax.ShapeDtypeStruct((N, D), f.dtype),
            grid_spec=pltpu.PrefetchScalarGridSpec(
                num_scalar_prefetch=0,
                grid=(pl.cdiv(N, tn),),
                in_specs=[
                    row_spec,                  # f row tile (boundary-masked last tile)
                    const((D, 2 * Dff)),       # fused GLU weight (value | gate)
                    const((Dff, D)),           # ff2 weight
                    const((1, D)),             # LayerNorm gamma
                    const((1, D)),             # LayerNorm beta
                ],
                out_specs=row_spec,
            ),
            compiler_params=pltpu.CompilerParams(
                dimension_semantics=("parallel",),
                vmem_limit_bytes=int(vmem_budget),
            ),
            cost_estimate=cost,
        )

    try:
        out = build(True)(f, w1, w2, gamma, beta)
        return jax.block_until_ready(out)
    except Exception:
        # Fallback for jax versions that reject pl.Buffered(1) on grid-invariant inputs.
        out = build(False)(f, w1, w2, gamma, beta)
        return jax.block_until_ready(out)


def reference(f, params):
    """Pure-JAX reference of the PyTorch forward (eval mode)."""
    w1, w2 = params["w1"], params["w2"]
    Dff = w2.shape[0]
    y = f @ w1
    value, gate = y[:, :Dff], y[:, Dff:]
    h = _gelu_exact(gate) * value
    x = f + h @ w2
    mu = jnp.mean(x, axis=-1, keepdims=True)
    var = jnp.mean((x - mu) ** 2, axis=-1, keepdims=True)
    return ((x - mu) * jax.lax.rsqrt(var + _LN_EPS)
            * params["gamma"].reshape(1, -1) + params["beta"].reshape(1, -1))


if __name__ == "__main__":
    # Small deterministic problem: d_model=128, d_ff defaults to 2*d_model.
    # Ragged N exercises the boundary-masked last row tile (no host pad/slice).
    N, D = 520, 128
    Dff = 2 * D
    key = jax.random.PRNGKey(0)
    k0, k1, k2, k3, k4 = jax.random.split(key, 5)

    f = jax.random.normal(k0, (N, D), jnp.float32)
    params = {
        # [in, out] layout (== torch Linear weight transposed)
        "w1": jax.random.normal(k1, (D, 2 * Dff), jnp.float32) * (1.0 / math.sqrt(D)),
        "w2": jax.random.normal(k2, (Dff, D), jnp.float32) * (1.0 / math.sqrt(Dff)),
        "gamma": 1.0 + 0.1 * jax.random.normal(k3, (D,), jnp.float32),
        "beta": 0.05 * jax.random.normal(k4, (D,), jnp.float32),
    }

    # f32 path: must match the f32 reference tightly.
    out = positionwise_ff(f, params)
    ref = jax.block_until_ready(reference(f, params))
    np.testing.assert_allclose(np.asarray(out), np.asarray(ref), rtol=2e-4, atol=2e-4)

    # bf16 path (bf16 MXU rate on v6e/v7x, f32 accumulation + f32 LayerNorm):
    # smoke-check shape/finiteness only (looser numerics by construction).
    params_bf16 = dict(params, w1=params["w1"].astype(jnp.bfloat16),
                       w2=params["w2"].astype(jnp.bfloat16))
    out_bf16 = positionwise_ff(f.astype(jnp.bfloat16), params_bf16)
    assert out_bf16.shape == (N, D)
    assert bool(jnp.all(jnp.isfinite(out_bf16.astype(jnp.float32))))

    print("KERNEL_OK")
</pallas_src>

<mosaic_0001>
module attributes {stable_mosaic.version = 11 : i64} {
  func.func @_ffn_kernel(%arg0: i32, %arg1: memref<264x128xf32, #tpu.memory_space<vmem>>, %arg2: memref<128x512xf32, #tpu.memory_space<vmem>>, %arg3: memref<256x128xf32, #tpu.memory_space<vmem>>, %arg4: memref<1x128xf32, #tpu.memory_space<vmem>>, %arg5: memref<1x128xf32, #tpu.memory_space<vmem>>, %arg6: memref<264x128xf32, #tpu.memory_space<vmem>>) attributes {dimension_semantics = [#tpu.dimension_semantics<parallel>], iteration_bounds = array<i64: 2>, scalar_prefetch = 0 : i64, scratch_operands = 0 : i64, tpu.core_type = #tpu.core_type<tc>, window_params = [{transform_indices = @transform_0, window_bounds = array<i64: 264, 128>}, {pipeline_mode = #tpu.pipeline_mode<synchronous>, transform_indices = @transform_1, window_bounds = array<i64: 128, 512>}, {pipeline_mode = #tpu.pipeline_mode<synchronous>, transform_indices = @transform_2, window_bounds = array<i64: 256, 128>}, {pipeline_mode = #tpu.pipeline_mode<synchronous>, transform_indices = @transform_3, window_bounds = array<i64: 1, 128>}, {pipeline_mode = #tpu.pipeline_mode<synchronous>, transform_indices = @transform_4, window_bounds = array<i64: 1, 128>}, {transform_indices = @transform_5, window_bounds = array<i64: 264, 128>}]} {
    %c0 = arith.constant 0 : index
    %c0_0 = arith.constant 0 : index
    %0 = vector.load %arg1[%c0, %c0_0] : memref<264x128xf32, #tpu.memory_space<vmem>>, vector<264x128xf32>
    %c0_1 = arith.constant 0 : index
    %c0_2 = arith.constant 0 : index
    %1 = vector.load %arg2[%c0_1, %c0_2] : memref<128x512xf32, #tpu.memory_space<vmem>>, vector<128x512xf32>
    %cst = arith.constant dense<0.000000e+00> : vector<264x512xf32>
    %2 = tpu.matmul %0, %1, %cst {dimension_numbers = #tpu.dot_dimension_numbers<[1], [0], [0], [1], [0, 0, 1, 1], [], []>} : vector<264x128xf32>, vector<128x512xf32>, vector<264x512xf32> -> vector<264x512xf32>
    %3 = vector.extract_strided_slice %2 {offsets = [0, 0], sizes = [264, 256], strides = [1, 1]} : vector<264x512xf32> to vector<264x256xf32>
    %4 = vector.extract_strided_slice %2 {offsets = [0, 256], sizes = [264, 256], strides = [1, 1]} : vector<264x512xf32> to vector<264x256xf32>
    %cst_3 = arith.constant 5.000000e-01 : f32
    %5 = vector.broadcast %cst_3 : f32 to vector<264x256xf32>
    %6 = arith.mulf %5, %4 : vector<264x256xf32>
    %cst_4 = arith.constant 1.41421354 : f32
    %7 = vector.broadcast %cst_4 : f32 to vector<264x256xf32>
    %8 = arith.divf %4, %7 : vector<264x256xf32>
    %9 = math.erf %8 : vector<264x256xf32>
    %cst_5 = arith.constant 1.000000e+00 : f32
    %10 = vector.broadcast %cst_5 : f32 to vector<264x256xf32>
    %11 = arith.addf %10, %9 : vector<264x256xf32>
    %12 = arith.mulf %6, %11 : vector<264x256xf32>
    %13 = arith.mulf %12, %3 : vector<264x256xf32>
    %c0_6 = arith.constant 0 : index
    %c0_7 = arith.constant 0 : index
    %14 = vector.load %arg3[%c0_6, %c0_7] : memref<256x128xf32, #tpu.memory_space<vmem>>, vector<256x128xf32>
    %cst_8 = arith.constant dense<0.000000e+00> : vector<264x128xf32>
    %15 = tpu.matmul %13, %14, %cst_8 {dimension_numbers = #tpu.dot_dimension_numbers<[1], [0], [0], [1], [0, 0, 1, 1], [], []>} : vector<264x256xf32>, vector<256x128xf32>, vector<264x128xf32> -> vector<264x128xf32>
    %16 = arith.addf %0, %15 : vector<264x128xf32>
    %c0_9 = arith.constant 0 : index
    %c0_10 = arith.constant 0 : index
    %17 = vector.load %arg4[%c0_9, %c0_10] : memref<1x128xf32, #tpu.memory_space<vmem>>, vector<1x128xf32>
    %c0_11 = arith.constant 0 : index
    %c0_12 = arith.constant 0 : index
    %18 = vector.load %arg5[%c0_11, %c0_12] : memref<1x128xf32, #tpu.memory_space<vmem>>, vector<1x128xf32>
    %cst_13 = arith.constant dense<0.000000e+00> : vector<264xf32>
    %19 = vector.multi_reduction <add>, %16, %cst_13 [1] : vector<264x128xf32> to vector<264xf32>
    %20 = vector.shape_cast %19 : vector<264xf32> to vector<264x1xf32>
    %cst_14 = arith.constant 1.280000e+02 : f32
    %21 = vector.broadcast %cst_14 : f32 to vector<264x1xf32>
    %22 = arith.divf %20, %21 : vector<264x1xf32>
    %23 = arith.mulf %16, %16 : vector<264x128xf32>
    %cst_15 = arith.constant dense<0.000000e+00> : vector<264xf32>
    %24 = vector.multi_reduction <add>, %23, %cst_15 [1] : vector<264x128xf32> to vector<264xf32>
    %25 = vector.shape_cast %24 : vector<264xf32> to vector<264x1xf32>
    %cst_16 = arith.constant 1.280000e+02 : f32
    %26 = vector.broadcast %cst_16 : f32 to vector<264x1xf32>
    %27 = arith.divf %25, %26 : vector<264x1xf32>
    %28 = arith.mulf %22, %22 : vector<264x1xf32>
    %29 = arith.subf %27, %28 : vector<264x1xf32>
    %cst_17 = arith.constant 0.000000e+00 : f32
    %30 = vector.broadcast %cst_17 : f32 to vector<264x1xf32>
    %31 = arith.maximumf %29, %30 : vector<264x1xf32>
    %32 = vector.broadcast %22 : vector<264x1xf32> to vector<264x128xf32>
    %33 = arith.subf %16, %32 : vector<264x128xf32>
    %cst_18 = arith.constant 9.99999974E-6 : f32
    %34 = vector.broadcast %cst_18 : f32 to vector<264x1xf32>
    %35 = arith.addf %31, %34 : vector<264x1xf32>
    %36 = math.rsqrt %35 : vector<264x1xf32>
    %37 = vector.broadcast %36 : vector<264x1xf32> to vector<264x128xf32>
    %38 = arith.mulf %33, %37 : vector<264x128xf32>
    %39 = vector.broadcast %17 : vector<1x128xf32> to vector<264x128xf32>
    %40 = arith.mulf %38, %39 : vector<264x128xf32>
    %41 = vector.broadcast %18 : vector<1x128xf32> to vector<264x128xf32>
    %42 = arith.addf %40, %41 : vector<264x128xf32>
    %c0_19 = arith.constant 0 : index
    %c0_20 = arith.constant 0 : index
    %43 = vector.load %arg6[%c0_19, %c0_20] : memref<264x128xf32, #tpu.memory_space<vmem>>, vector<264x128xf32>
    tpu.vector_store %arg6[%c0_19, %c0_20], %42 {strides = array<i32>} : memref<264x128xf32, #tpu.memory_space<vmem>>, vector<264x128xf32>,
    return
  }
  func.func @transform_0(%arg0: i32) -> (i32, i32) {
    %c0_i32 = arith.constant 0 : i32
    %c0_i32_0 = arith.constant 0 : i32
    return %arg0, %c0_i32 : i32, i32
  }
  func.func @transform_1(%arg0: i32) -> (i32, i32) {
    %c0_i32 = arith.constant 0 : i32
    %c0_i32_0 = arith.constant 0 : i32
    %c0_i32_1 = arith.constant 0 : i32
    return %c0_i32, %c0_i32_0 : i32, i32
  }
  func.func @transform_2(%arg0: i32) -> (i32, i32) {
    %c0_i32 = arith.constant 0 : i32
    %c0_i32_0 = arith.constant 0 : i32
    %c0_i32_1 = arith.constant 0 : i32
    return %c0_i32, %c0_i32_0 : i32, i32
  }
  func.func @transform_3(%arg0: i32) -> (i32, i32) {
    %c0_i32 = arith.constant 0 : i32
    %c0_i32_0 = arith.constant 0 : i32
    %c0_i32_1 = arith.constant 0 : i32
    return %c0_i32, %c0_i32_0 : i32, i32
  }
  func.func @transform_4(%arg0: i32) -> (i32, i32) {
    %c0_i32 = arith.constant 0 : i32
    %c0_i32_0 = arith.constant 0 : i32
    %c0_i32_1 = arith.constant 0 : i32
    return %c0_i32, %c0_i32_0 : i32, i32
  }
  func.func @transform_5(%arg0: i32) -> (i32, i32) {
    %c0_i32 = arith.constant 0 : i32
    %c0_i32_0 = arith.constant 0 : i32
    return %arg0, %c0_i32 : i32, i32
  }
}

module attributes {stable_mosaic.version = 11 : i64} {
  func.func @_ffn_kernel(%arg0: i32, %arg1: memref<264x128xf32, #tpu.memory_space<vmem>>, %arg2: memref<128x512xf32, #tpu.memory_space<vmem>>, %arg3: memref<256x128xf32, #tpu.memory_space<vmem>>, %arg4: memref<1x128xf32, #tpu.memory_space<vmem>>, %arg5: memref<1x128xf32, #tpu.memory_space<vmem>>, %arg6: memref<264x128xf32, #tpu.memory_space<vmem>>) attributes {dimension_semantics = [#tpu.dimension_semantics<parallel>], iteration_bounds = array<i64: 2>, scalar_prefetch = 0 : i64, scratch_operands = 0 : i64, tpu.core_type = #tpu.core_type<tc>, window_params = [{transform_indices = @transform_0, window_bounds = array<i64: 264, 128>}, {pipeline_mode = #tpu.pipeline_mode<synchronous>, transform_indices = @transform_1, window_bounds = array<i64: 128, 512>}, {pipeline_mode = #tpu.pipeline_mode<synchronous>, transform_indices = @transform_2, window_bounds = array<i64: 256, 128>}, {pipeline_mode = #tpu.pipeline_mode<synchronous>, transform_indices = @transform_3, window_bounds = array<i64: 1, 128>}, {pipeline_mode = #tpu.pipeline_mode<synchronous>, transform_indices = @transform_4, window_bounds = array<i64: 1, 128>}, {transform_indices = @transform_5, window_bounds = array<i64: 264, 128>}]} {
    %c0 = arith.constant 0 : index
    %c0_0 = arith.constant 0 : index
    %0 = vector.load %arg1[%c0, %c0_0] : memref<264x128xf32, #tpu.memory_space<vmem>>, vector<264x128xf32>
    %c0_1 = arith.constant 0 : index
    %c0_2 = arith.constant 0 : index
    %1 = vector.load %arg2[%c0_1, %c0_2] : memref<128x512xf32, #tpu.memory_space<vmem>>, vector<128x512xf32>
    %cst = arith.constant dense<0.000000e+00> : vector<264x512xf32>
    %2 = tpu.matmul %0, %1, %cst {dimension_numbers = #tpu.dot_dimension_numbers<[1], [0], [0], [1], [0, 0, 1, 1], [], []>} : vector<264x128xf32>, vector<128x512xf32>, vector<264x512xf32> -> vector<264x512xf32>
    %3 = vector.extract_strided_slice %2 {offsets = [0, 0], sizes = [264, 256], strides = [1, 1]} : vector<264x512xf32> to vector<264x256xf32>
    %4 = vector.extract_strided_slice %2 {offsets = [0, 256], sizes = [264, 256], strides = [1, 1]} : vector<264x512xf32> to vector<264x256xf32>
    %cst_3 = arith.constant 5.000000e-01 : f32
    %5 = vector.broadcast %cst_3 : f32 to vector<264x256xf32>
    %6 = arith.mulf %5, %4 : vector<264x256xf32>
    %cst_4 = arith.constant 1.41421354 : f32
    %7 = vector.broadcast %cst_4 : f32 to vector<264x256xf32>
    %8 = arith.divf %4, %7 : vector<264x256xf32>
    %9 = math.erf %8 : vector<264x256xf32>
    %cst_5 = arith.constant 1.000000e+00 : f32
    %10 = vector.broadcast %cst_5 : f32 to vector<264x256xf32>
    %11 = arith.addf %10, %9 : vector<264x256xf32>
    %12 = arith.mulf %6, %11 : vector<264x256xf32>
    %13 = arith.mulf %12, %3 : vector<264x256xf32>
    %c0_6 = arith.constant 0 : index
    %c0_7 = arith.constant 0 : index
    %14 = vector.load %arg3[%c0_6, %c0_7] : memref<256x128xf32, #tpu.memory_space<vmem>>, vector<256x128xf32>
    %cst_8 = arith.constant dense<0.000000e+00> : vector<264x128xf32>
    %15 = tpu.matmul %13, %14, %cst_8 {dimension_numbers = #tpu.dot_dimension_numbers<[1], [0], [0], [1], [0, 0, 1, 1], [], []>} : vector<264x256xf32>, vector<256x128xf32>, vector<264x128xf32> -> vector<264x128xf32>
    %16 = arith.addf %0, %15 : vector<264x128xf32>
    %c0_9 = arith.constant 0 : index
    %c0_10 = arith.constant 0 : index
    %17 = vector.load %arg4[%c0_9, %c0_10] : memref<1x128xf32, #tpu.memory_space<vmem>>, vector<1x128xf32>
    %c0_11 = arith.constant 0 : index
    %c0_12 = arith.constant 0 : index
    %18 = vector.load %arg5[%c0_11, %c0_12] : memref<1x128xf32, #tpu.memory_space<vmem>>, vector<1x128xf32>
    %cst_13 = arith.constant dense<0.000000e+00> : vector<264xf32>
    %19 = vector.multi_reduction <add>, %16, %cst_13 [1] : vector<264x128xf32> to vector<264xf32>
    %20 = vector.shape_cast %19 : vector<264xf32> to vector<264x1xf32>
    %cst_14 = arith.constant 1.280000e+02 : f32
    %21 = vector.broadcast %cst_14 : f32 to vector<264x1xf32>
    %22 = arith.divf %20, %21 : vector<264x1xf32>
    %23 = arith.mulf %16, %16 : vector<264x128xf32>
    %cst_15 = arith.constant dense<0.000000e+00> : vector<264xf32>
    %24 = vector.multi_reduction <add>, %23, %cst_15 [1] : vector<264x128xf32> to vector<264xf32>
    %25 = vector.shape_cast %24 : vector<264xf32> to vector<264x1xf32>
    %cst_16 = arith.constant 1.280000e+02 : f32
    %26 = vector.broadcast %cst_16 : f32 to vector<264x1xf32>
    %27 = arith.divf %25, %26 : vector<264x1xf32>
    %28 = arith.mulf %22, %22 : vector<264x1xf32>
    %29 = arith.subf %27, %28 : vector<264x1xf32>
    %cst_17 = arith.constant 0.000000e+00 : f32
    %30 = vector.broadcast %cst_17 : f32 to vector<264x1xf32>
    %31 = arith.maximumf %29, %30 : vector<264x1xf32>
    %32 = vector.broadcast %22 : vector<264x1xf32> to vector<264x128xf32>
    %33 = arith.subf %16, %32 : vector<264x128xf32>
    %cst_18 = arith.constant 9.99999974E-6 : f32
    %34 = vector.broadcast %cst_18 : f32 to vector<264x1xf32>
    %35 = arith.addf %31, %34 : vector<264x1xf32>
    %36 = math.rsqrt %35 : vector<264x1xf32>
    %37 = vector.broadcast %36 : vector<264x1xf32> to vector<264x128xf32>
    %38 = arith.mulf %33, %37 : vector<264x128xf32>
    %39 = vector.broadcast %17 : vector<1x128xf32> to vector<264x128xf32>
    %40 = arith.mulf %38, %39 : vector<264x128xf32>
    %41 = vector.broadcast %18 : vector<1x128xf32> to vector<264x128xf32>
    %42 = arith.addf %40, %41 : vector<264x128xf32>
    %c0_19 = arith.constant 0 : index
    %c0_20 = arith.constant 0 : index
    %43 = vector.load %arg6[%c0_19, %c0_20] : memref<264x128xf32, #tpu.memory_space<vmem>>, vector<264x128xf32>
    tpu.vector_store %arg6[%c0_19, %c0_20], %42 {strides = array<i32>} : memref<264x128xf32, #tpu.memory_space<vmem>>, vector<264x128xf32>,
    return
  }
  func.func @transform_0(%arg0: i32) -> (i32, i32) {
    %c0_i32 = arith.constant 0 : i32
    %c0_i32_0 = arith.constant 0 : i32
    return %arg0, %c0_i32 : i32, i32
  }
  func.func @transform_1(%arg0: i32) -> (i32, i32) {
    %c0_i32 = arith.constant 0 : i32
    %c0_i32_0 = arith.constant 0 : i32
    %c0_i32_1 = arith.constant 0 : i32
    return %c0_i32, %c0_i32_0 : i32, i32
  }
  func.func @transform_2(%arg0: i32) -> (i32, i32) {
    %c0_i32 = arith.constant 0 : i32
    %c0_i32_0 = arith.constant 0 : i32
    %c0_i32_1 = arith.constant 0 : i32
    return %c0_i32, %c0_i32_0 : i32, i32
  }
  func.func @transform_3(%arg0: i32) -> (i32, i32) {
    %c0_i32 = arith.constant 0 : i32
    %c0_i32_0 = arith.constant 0 : i32
    %c0_i32_1 = arith.constant 0 : i32
    return %c0_i32, %c0_i32_0 : i32, i32
  }
  func.func @transform_4(%arg0: i32) -> (i32, i32) {
    %c0_i32 = arith.constant 0 : i32
    %c0_i32_0 = arith.constant 0 : i32
    %c0_i32_1 = arith.constant 0 : i32
    return %c0_i32, %c0_i32_0 : i32, i32
  }
  func.func @transform_5(%arg0: i32) -> (i32, i32) {
    %c0_i32 = arith.constant 0 : i32
    %c0_i32_0 = arith.constant 0 : i32
    return %arg0, %c0_i32 : i32, i32
  }
}

</mosaic_0001>

<bundles_post_ra>
// kernel: tpu_custom_call.1
= control target key start
LH: loop header
LB: loop body
LE: loop exit
PB: predicated region body
PF: predicated region fallthrough
CT: control target
= control target key end

     0   :  { %10 = vsyncpa [#allocation3], 0  ;;  %s4121_s0 = inlined_call_operand.hbm [shape: f32[520,128], index: 0, kind: input, shape index: {}]   ;;  %s4122_s1 = inlined_call_operand.hbm [shape: f32[128,512], index: 1, kind: input, shape index: {}]   ;;  %s4123_s2 = inlined_call_operand.hbm [shape: f32[256,128], index: 2, kind: input, shape index: {}]   ;;  %s4124_s3 = inlined_call_operand.vmem [shape: f32[1,128], index: 3, kind: input, shape index: {}]   ;;  %s4125_s4 = inlined_call_operand.vmem [shape: f32[1,128], index: 4, kind: input, shape index: {}]   ;;  %s4126_s5 = inlined_call_operand.hbm [shape: f32[520,128], index: 5, kind: output, shape index: {}]  }
   0x1   :  { %12 = vsyncpa [#allocation3 + $0x1], 0 }
   0x2   :  { %13 = vsyncpa [#allocation6], 0 }
   0x3   :  { %14 = vsyncpa [#allocation4], 0 }
   0x4   :  { %16 = vsyncpa [#allocation4 + $0x1], 0  ;;  %s2946_s18 = smov 0   ;;  %s2948_s19 = smov 0  }
   0x5   :  { %s2950_s20 = smov 0   ;;  %s2952_s21 = smov 0  }
   0x6 LB: > { %s2967_s22 = sadd.s32 4294967295, %s2900_s21   ;;  %s2291_s23 = sadd.s32 4294967294, %s2900_s21   ;;  %s2900_s21 = sphi %s2952_s21, %s4208_s21   ;;  %s2896_s20 = sphi %s2950_s20, %s4207_s20   ;;  %s2892_s19 = sphi %s2948_s19, %s4206_s19   ;;  %s2888_s18 = sphi %s2946_s18, %s4205_s18  }
   0x7   : > { %s2971_s24 = sadd.s32 1, %s2900_s21   ;;  %s29_s25 = sadd.s32 1, %s2896_s20 }
   0x8   : > { %s26_s26 = ssub.s32 %s2900_s21, %s2971_s24  ;;  %p36_p0 = scmp.ne.s32.totalorder %s2896_s20, %s2892_s19 }
   0x9   : > { %p27_p1 = scmp.eq.s32.totalorder %s26_s26, 0  ;;  %p37_p2 = scmp.eq.s32.totalorder %s2900_s21, 0 }
   0xa   : > { %p42_p3 = scmp.ne.s32.totalorder %s2892_s19, %s2888_s18  ;;  %p4127_p4 = scmp.eq.s32.totalorder %s2967_s22, 0 }
   0xb   : > { %s2983_s27 = scalar_select %p27_p1, %s2896_s20, %s29_s25  }
   0xc   : > { %p2985_p5 = por %p37_p2, %p36_p0  ;;  %p2991_p6 = por %p4127_p4, %p42_p3 }
   0xd   : > { %4130 = sst [smem:[#allocation12_spill]] %s2983_s27  ;;  %p150_p7 = scmp.eq.s32.totalorder %s2967_s22, 1 }
   0xe   : > { %s4131_s28 = scalar_select %p2985_p5, 1, 0 }
   0xf   : > { %s4132_s29 = scalar_select %p2991_p6, 1, 0 }
  0x10   : > { %p156_p8 = scmp.eq.s32.totalorder %s2291_s23, 1  ;;  %p2292_p9 = scmp.ge.s32.totalorder %s2900_s21, 1 }
  0x11   : > { %p163_p10 = scmp.lt.s32.totalorder %s2900_s21, 3  ;;  %p2998_p11 = por %p150_p7, %p36_p0 }
  0x12   : > { %p3002_p12 = por %p156_p8, %p42_p3  ;;  %s2902_s8 = smov [#allocation5]  }
  0x13   : > { %s4133_s30 = scalar_select %p2998_p11, 1, 0 }
  0x14   : > { %s4134_s6 = scalar_select %p3002_p12, 1, 0 }
  0x15   : > { %p3006_p13 = pnand %p2292_p9, %p163_p10  ;;  %s175_s9 = sshll.u32 %s2902_s8, 4  ;;  %s176_s9 = int_to_ptr.vmem [resolvable:$true] %s175_s9 }
  0x16   : > { %s2903_s11 = smov [#allocation7]   ;;  %s2746_s15 = scalar_lea.hbm %s4122_s1, 8192 }
  0x17   : > { %s4135_s7 = scalar_select %p3006_p13, 1, 0 }
  0x18   : > { %p2455_p1 = pneg %p3006_p13  ;;  %s188_s12 = sshll.u32 %s2903_s11, 4  ;;  %s3018_s12 = int_to_ptr.vmem [resolvable:$true] %s188_s12 }
  0x19   : > { %p2747_p0 = scmp.ne.s32.totalorder %s4122_s1, %s2746_s15  ;;  %p2753_p9 = scmp.lt.u32.totalorder %s2746_s15, %s4122_s1 }
  0x1a   : > { %p3014_p2 = pnand %p2455_p1, %p4127_p4 }
  0x1c   : > { %p2748_p3 = pneg %p3014_p2 }
  0x1e   : > { %p2749_p7 = pnand %p2748_p3, %p2747_p0 }
  0x20   : > { %p2750_p8 = pneg %p2749_p7 }
  0x22   : > { %p2755_p10 = pnand %p2753_p9, %p2750_p8 }
  0x24   : > { %2758 = shalt.err (!%p2755_p10)
}
  0x25   : > { %s2759_s26 = scalar_lea.vmem %s176_s9, 8192  ;;  %p2767_p11 = scmp.lt.s32.totalorder %s176_s9, %s176_s9 }
  0x26   : > { %p2760_p1 = scmp.ne.s32.totalorder %s176_s9, %s2759_s26  ;;  %p2768_p6 = scmp.lt.s32.totalorder %s2759_s26, %s2759_s26 }
  0x28   : > { %p2762_p4 = pnand %p2760_p1, %p2748_p3  ;;  %p2769_p13 = por %p2768_p6, %p2767_p11 }
  0x2a   : > { %p2763_p12 = pneg %p2762_p4 }
  0x2c   : > { %p2770_p5 = pnand %p2769_p13, %p2763_p12 }
  0x2e   : > { %2773 = shalt.err (!%p2770_p5)
}
  0x2f   : > { %s2904_s8 = smov 512   ;;  %s2905_s11 = smov 32  }
  0x30   : > { %2458 = dma.hbm_to_vmem [thread:$0]  (!%p3014_p2), %s4122_s1, 8192, %s176_s9, [#allocation6], %s2904_s8, %s2904_s8, %s2905_s11  }
  0x31   : > { %s2774_s17 = scalar_lea.hbm %s4123_s2, 4096 }
  0x32   : > { %p2775_p4 = scmp.ne.s32.totalorder %s4123_s2, %s2774_s17  ;;  %p2781_p11 = scmp.lt.u32.totalorder %s2774_s17, %s4123_s2 }
  0x34   : > { %p2777_p5 = pnand %p2775_p4, %p2748_p3 }
  0x36   : > { %p2778_p6 = pneg %p2777_p5 }
  0x38   : > { %p2783_p12 = pnand %p2781_p11, %p2778_p6 }
  0x3a   : > { %2786 = shalt.err (!%p2783_p12)
}
  0x3b   : > { %s2787_s9 = scalar_lea.vmem %s3018_s12, 4096  ;;  %p2795_p8 = scmp.lt.s32.totalorder %s3018_s12, %s3018_s12 }
  0x3c   : > { %p2788_p13 = scmp.ne.s32.totalorder %s3018_s12, %s2787_s9  ;;  %p2796_p9 = scmp.lt.s32.totalorder %s2787_s9, %s2787_s9 }
  0x3e   : > { %p2790_p0 = pnand %p2788_p13, %p2748_p3  ;;  %p2797_p10 = por %p2796_p9, %p2795_p8 }
  0x40   : > { %p2791_p7 = pneg %p2790_p0 }
  0x42   : > { %p2798_p1 = pnand %p2797_p10, %p2791_p7 }
  0x44   : > { %2801 = shalt.err (!%p2798_p1)
}
  0x45   : > { %s2906_s27 = smov 128   ;;  %s2907_s8 = smov 8  }
  0x46   : > { %2461 = dma.hbm_to_vmem [thread:$0]  (!%p3014_p2), %s4123_s2, 4096, %s3018_s12, [#allocation6], %s2906_s27, %s2906_s27, %s2907_s8  }
  0x47   : > { %p2295_p4 = scmp.ge.s32.totalorder %s2900_s21, 2 }
  0x48   : > { %p4137_p3 = scmp.ne.s32.totalorder (!%p2295_p4), %s4131_s28, 0 }
  0x49   : > { %204 = sbr.rel (%p2295_p4) target bundleno = 115 (0x73), region = 32 }
  0x50   : > { %207 = sbr.rel (!%p4137_p3) target bundleno = 115 (0x73), region = 36  ;;  %s208_s14 = sand.u32 (%p4137_p3), 1, %s2896_s20  }
  0x51   : > { %s213_s15 = smul.u32 (%p4137_p3), 33, %s2900_s21  ;;  %s3077_s23 = scalar_lea.sflag (%p4137_p3), [#allocation3], %s208_s14 }
  0x52   : > { %s2443_s16 = smul.u32 (%p4137_p3), 264, %s208_s14 }
  0x53   : > { %s214_s17 = ssub.s32 (%p4137_p3), 65, %s213_s15 }
  0x54   : > { %p215_p5 = scmp.lt.s32.totalorder (%p4137_p3), %s214_s17, 33  ;;  %s212_s25 = scalar_lea.vmem (%p4137_p3), [#allocation2], %s2443_s16 }
  0x57   : > { %s4210_s17 = smov (!%p215_p5, %s214_s17), 33 }
  0x58   : > { %s3074_s10 = sshll.u32 %s4210_s17, 7 }
  0x59   : > { %s219_s12 = ssub.s32 4224, %s3074_s10 }
  0x5a   : > { %220 = vsyncadd %s3077_s23, %s219_s12  ;;  %p2297_p2 = scmp.ne.s32.totalorder %s3074_s10, 0  ;;  %s2313_s28 = smul.u32 4224, %s2900_s21 }
  0x5b   : > { %s225_s26 = sshll.u32 %s212_s25, 4  ;;  %s2806_s15 = scalar_lea.hbm %s4121_s0, 8320  ;;  %s3087_s26 = int_to_ptr.vmem [resolvable:$true] %s225_s26 }
  0x5c   : > { %s3085_s8 = scalar_lea.hbm %s4121_s0, %s2313_s28 }
  0x5d   : > { %s2802_s11 = scalar_lea.hbm %s3085_s8, %s3074_s10  ;;  %p2807_p13 = scmp.lt.u32.totalorder %s3085_s8, %s4121_s0 }
  0x5e   : > { %p2803_p6 = scmp.ne.s32.totalorder %s3085_s8, %s2802_s11  ;;  %p2808_p0 = scmp.lt.u32.totalorder %s2806_s15, %s2802_s11 }
  0x5f   : > { %p2810_p8 = scmp.lt.u32.totalorder %s2802_s11, %s3085_s8 }
  0x60   : > { %p2804_p11 = pnand %p2803_p6, %p2297_p2  ;;  %p2809_p7 = por %p2808_p0, %p2807_p13 }
  0x62   : > { %p2805_p12 = pneg %p2804_p11  ;;  %p2811_p9 = por %p2810_p8, %p2809_p7 }
  0x64   : > { %p2812_p10 = pnand %p2811_p9, %p2805_p12 }
  0x66   : > { %2815 = shalt.err (!%p2812_p10)
}
  0x67   : > { %s2816_s12 = scalar_lea.vmem %s3087_s26, %s3074_s10  ;;  %s2908_s25 = smov [#allocation2]  }
  0x68   : > { %p2817_p1 = scmp.ne.s32.totalorder %s3087_s26, %s2816_s12  ;;  %s2820_s28 = sshll.u32 %s2908_s25, 4  ;;  %s2821_s28 = int_to_ptr.vmem [resolvable:$false] %s2820_s28 }
  0x69   : > { %s2822_s9 = scalar_lea.vmem %s2821_s28, 8448  ;;  %p2823_p6 = scmp.lt.s32.totalorder %s3087_s26, %s2821_s28 }
  0x6a   : > { %p2818_p3 = pnand %p2817_p1, %p2297_p2  ;;  %p2824_p11 = scmp.lt.s32.totalorder %s2822_s9, %s2816_s12 }
  0x6c   : > { %p2819_p5 = pneg %p2818_p3  ;;  %p2825_p13 = por %p2824_p11, %p2823_p6 }
  0x6e   : > { %p2826_p0 = pnand %p2825_p13, %p2819_p5 }
  0x70   : > { %2829 = shalt.err (!%p2826_p0)
}
  0x71   : > { %s2909_s27 = smov 128   ;;  %s2910_s11 = smov 8  }
  0x72   : > { %231 = dma.hbm_to_vmem [thread:$0]  (%p2297_p2), %s3085_s8, %s3074_s10, %s3087_s26, %s3077_s23, %s2909_s27, %s2909_s27, %s2910_s11  }
  0x73 PF: > { %p4138_p12 = scmp.ne.s32.totalorder %s4135_s7, 0 }
  0x75   : > { %237 = sbr.rel (%p4138_p12) target bundleno = 1012 (0x3f4), region = 40 }
  0x7c   : > { %s3117_s13 = sand.u32 1, %s2892_s19   ;;  %p4139_p7 = scmp.ne.s32.totalorder %s4132_s29, 0 }
  0x7d   : > { %s2444_s14 = smul.u32 264, %s3117_s13  ;;  %s240_s15 = scalar_lea.sflag [#allocation3], %s3117_s13 }
  0x7f   : > { %s3123_s16 = scalar_lea.vmem [#allocation2], %s2444_s14 }
  0x80   : > { %2875 = dma.done.wait (%p4139_p7), %s240_s15, 4224  }
  0x81   : > { %2877 = vsyncadd (%p4139_p7), %s240_s15, 4294963072  ;;  %p4140_p2 = scmp.eq.s32.totalorder %s2967_s22, 0 }
  0x83   : > { %2879 = dma.done.wait (%p4140_p2), [#allocation6], 12288   ;;  %p4141_p8 = pmov %p4140_p2 }
  0x84   : > { %v2911_v0 = vmov 0.0   ;;  %v322_v1 = vld [vmem:[#allocation5 + $0x8] sm:$0xff]  ;;  %v321_v3 = vld [vmem:[#allocation5] sm:$0xff]  ;;  %v324_v48 = vld [vmem:[#allocation5 + $0x18] sm:$0xff]  ;;  %s3802_s26 = scalar_lea.vmem [#allocation8], %s2444_s14  ;;  %s2180_s8 = scalar_lea.sflag [#allocation4], %s3117_s13 }
  0x85   : > { %2881 = vsyncadd (%p4141_p8), [#allocation6], 4294955008  ;;  %545 = vmatprep.mubr.f32.mxu1 %v2911_v0  ;;  %449 = vmatprep.mubr.f32.mxu0 %v2911_v0  ;;  %v326_v2 = vld [vmem:[#allocation5 + $0x28] sm:$0xff]  ;;  %v325_v5 = vld [vmem:[#allocation5 + $0x20] sm:$0xff]  ;;  %p4202_p9 = scmp.ne.s32.totalorder %s4133_s30, 0 }
  0x86   : > { %v2315_v4 = vpack.c.bf16 %v326_v2, %v322_v1  ;;  %v330_v6 = vld [vmem:[#allocation5 + $0x48] sm:$0xff]  ;;  %v2317_v8 = vpack.c.bf16 %v325_v5, %v321_v3  ;;  %v329_v10 = vld [vmem:[#allocation5 + $0x40] sm:$0xff]  ;;  %v328_v49 = vld [vmem:[#allocation5 + $0x38] sm:$0xff]  ;;  %s2187_s17 = smul.u32 (%p4202_p9), 33, %s2967_s22 }
  0x87   : > { %v334_v7 = vld [vmem:[#allocation5 + $0x68] sm:$0xff]  ;;  %v333_v11 = vld [vmem:[#allocation5 + $0x60] sm:$0xff]  ;;  %v2347_v51 = vpack.c.bf16 %v328_v49, %v324_v48  ;;  %v323_v52 = vld [vmem:[#allocation5 + $0x10] sm:$0xff] }
  0x88   : > { %v2319_v9 = vpack.c.bf16 %v334_v7, %v330_v6  ;;  %v338_v12 = vld [vmem:[#allocation5 + $0x88] sm:$0xff]  ;;  %2427 = vmatprep.subr.bf16.mxu1 %v2315_v4  ;;  %2316 = vmatprep.subr.bf16.mxu0 %v2315_v4  ;;  %v2321_v14 = vpack.c.bf16 %v333_v11, %v329_v10  ;;  %v337_v16 = vld [vmem:[#allocation5 + $0x80] sm:$0xff]  ;;  %v327_v53 = vld [vmem:[#allocation5 + $0x30] sm:$0xff]  ;;  %s2188_s12 = ssub.s32 (%p4202_p9), 65, %s2187_s17 }
  0x89   : > { %v342_v13 = vld [vmem:[#allocation5 + $0xa8] sm:$0xff]  ;;  %2435 = vmatpush1.bf16.msra.mxu1 %v2317_v8  ;;  %2318 = vmatpush1.bf16.msra.mxu0 %v2317_v8  ;;  %v341_v17 = vld [vmem:[#allocation5 + $0xa0] sm:$0xff]  ;;  %v332_v54 = vld [vmem:[#allocation5 + $0x58] sm:$0xff]  ;;  %v2349_v57 = vpack.c.bf16 %v327_v53, %v323_v52  ;;  %p2189_p10 = scmp.lt.s32.totalorder (%p4202_p9), %s2188_s12, 33 }
  0x8a   : > { %2428 = vmatprep.subr.bf16.mxu1 %v2319_v9  ;;  %v2323_v15 = vpack.c.bf16 %v342_v13, %v338_v12  ;;  %2320 = vmatprep.subr.bf16.mxu0 %v2319_v9  ;;  %v346_v18 = vld [vmem:[#allocation5 + $0xc8] sm:$0xff]  ;;  %v2325_v20 = vpack.c.bf16 %v341_v17, %v337_v16  ;;  %v345_v22 = vld [vmem:[#allocation5 + $0xc0] sm:$0xff]  ;;  %v336_v55 = vld [vmem:[#allocation5 + $0x78] sm:$0xff] }
  0x8b   : > { %v350_v19 = vld [vmem:[#allocation5 + $0xe8] sm:$0xff]  ;;  %v349_v23 = vld [vmem:[#allocation5 + $0xe0] sm:$0xff]  ;;  %v3136_v56 = vld [vmem:[%s3123_s16 + $0x80] sm:$0xff]  ;;  %v2351_v58 = vpack.c.bf16 %v336_v55, %v332_v54 }
  0x8c   : > { %v2327_v21 = vpack.c.bf16 %v350_v19, %v346_v18  ;;  %v354_v24 = vld [vmem:[#allocation5 + $0x108] sm:$0xff]  ;;  %v2329_v26 = vpack.c.bf16 %v349_v23, %v345_v22  ;;  %v353_v28 = vld [vmem:[#allocation5 + $0x100] sm:$0xff]  ;;  %v331_v59 = vld [vmem:[#allocation5 + $0x50] sm:$0xff] }
  0x8d   : > { %2436 = vmatpush1.bf16.msra.mxu1 %v2321_v14  ;;  %2322 = vmatpush1.bf16.msra.mxu0 %v2321_v14  ;;  %v358_v25 = vld [vmem:[#allocation5 + $0x128] sm:$0xff]  ;;  %v357_v29 = vld [vmem:[#allocation5 + $0x120] sm:$0xff]  ;;  %v335_v60 = vld [vmem:[#allocation5 + $0x70] sm:$0xff] }
  0x8e   : > { %2429 = vmatprep.subr.bf16.mxu1 %v2323_v15  ;;  %2324 = vmatprep.subr.bf16.mxu0 %v2323_v15  ;;  %v2331_v27 = vpack.c.bf16 %v358_v25, %v354_v24  ;;  %v362_v30 = vld [vmem:[#allocation5 + $0x148] sm:$0xff]  ;;  %v2333_v32 = vpack.c.bf16 %v357_v29, %v353_v28  ;;  %v361_v34 = vld [vmem:[#allocation5 + $0x140] sm:$0xff]  ;;  %v340_v61 = vld [vmem:[#allocation5 + $0x98] sm:$0xff]  ;;  %v2353_v2 = vpack.c.bf16 %v335_v60, %v331_v59 }
  0x8f   : > { %v366_v31 = vld [vmem:[#allocation5 + $0x168] sm:$0xff]  ;;  %v365_v35 = vld [vmem:[#allocation5 + $0x160] sm:$0xff]  ;;  %v344_v62 = vld [vmem:[#allocation5 + $0xb8] sm:$0xff] }
  0x90   : > { %v2335_v33 = vpack.c.bf16 %v366_v31, %v362_v30  ;;  %v370_v36 = vld [vmem:[#allocation5 + $0x188] sm:$0xff]  ;;  %v2337_v38 = vpack.c.bf16 %v365_v35, %v361_v34  ;;  %v369_v40 = vld [vmem:[#allocation5 + $0x180] sm:$0xff]  ;;  %v3139_v63 = vld [vmem:[%s3123_s16] sm:$0xff]  ;;  %v2355_v3 = vpack.c.bf16 %v344_v62, %v340_v61 }
  0x91   : > { %2437 = vmatpush1.bf16.msra.mxu1 %v2325_v20  ;;  %2326 = vmatpush1.bf16.msra.mxu0 %v2325_v20  ;;  %v374_v37 = vld [vmem:[#allocation5 + $0x1a8] sm:$0xff]  ;;  %v373_v41 = vld [vmem:[#allocation5 + $0x1a0] sm:$0xff]  ;;  %v339_v4 = vld [vmem:[#allocation5 + $0x90] sm:$0xff] }
  0x92   : > { %2430 = vmatprep.subr.bf16.mxu1 %v2327_v21  ;;  %2328 = vmatprep.subr.bf16.mxu0 %v2327_v21  ;;  %v2339_v39 = vpack.c.bf16 %v374_v37, %v370_v36  ;;  %v378_v42 = vld [vmem:[#allocation5 + $0x1c8] sm:$0xff]  ;;  %v2341_v44 = vpack.c.bf16 %v373_v41, %v369_v40  ;;  %v377_v46 = vld [vmem:[#allocation5 + $0x1c0] sm:$0xff]  ;;  %v343_v5 = vld [vmem:[#allocation5 + $0xb0] sm:$0xff] }
  0x93   : > { %v382_v43 = vld [vmem:[#allocation5 + $0x1e8] sm:$0xff]  ;;  %v381_v47 = vld [vmem:[#allocation5 + $0x1e0] sm:$0xff]  ;;  %v348_v6 = vld [vmem:[#allocation5 + $0xd8] sm:$0xff]  ;;  %v2357_v10 = vpack.c.bf16 %v343_v5, %v339_v4 }
  0x94   : > { %v2343_v45 = vpack.c.bf16 %v382_v43, %v378_v42  ;;  %v2345_v50 = vpack.c.bf16 %v381_v47, %v377_v46  ;;  %v3145_v1 = vld [vmem:[%s3123_s16 + $0x88] sm:$0xff]  ;;  %v3155_v9 = vld [vmem:[%s3123_s16 + $0x90] sm:$0xff]  ;;  %v347_v12 = vld [vmem:[#allocation5 + $0xd0] sm:$0xff] }
  0x95   : > { %2438 = vmatpush1.bf16.msra.mxu1 %v2329_v26  ;;  %2330 = vmatpush1.bf16.msra.mxu0 %v2329_v26  ;;  %v352_v7 = vld [vmem:[#allocation5 + $0xf8] sm:$0xff]  ;;  %v351_v13 = vld [vmem:[#allocation5 + $0xf0] sm:$0xff]  ;;  %v3159_v16 = vld [vmem:[%s3123_s16 + $0x10] sm:$0xff] }
  0x96   : > { %2431 = vmatprep.subr.bf16.mxu1 %v2331_v27  ;;  %2332 = vmatprep.subr.bf16.mxu0 %v2331_v27  ;;  %v3149_v8 = vld [vmem:[%s3123_s16 + $0x8] sm:$0xff]  ;;  %v2359_v11 = vpack.c.bf16 %v352_v7, %v348_v6  ;;  %v3165_v17 = vld [vmem:[%s3123_s16 + $0x98] sm:$0xff]  ;;  %v2361_v18 = vpack.c.bf16 %v351_v13, %v347_v12  ;;  %v3175_v25 = vld [vmem:[%s3123_s16 + $0xa0] sm:$0xff] }
  0x97   : > { %v356_v14 = vld [vmem:[#allocation5 + $0x118] sm:$0xff]  ;;  %v355_v20 = vld [vmem:[#allocation5 + $0x110] sm:$0xff]  ;;  %v3195_v41 = vld [vmem:[%s3123_s16 + $0xb0] sm:$0xff] }
  0x98   : > { %v360_v15 = vld [vmem:[#allocation5 + $0x138] sm:$0xff]  ;;  %v359_v21 = vld [vmem:[#allocation5 + $0x130] sm:$0xff]  ;;  %v3199_v46 = vld [vmem:[%s3123_s16 + $0x30] sm:$0xff] }
  0x99   : > { %2439 = vmatpush1.bf16.msra.mxu1 %v2333_v32  ;;  %2334 = vmatpush1.bf16.msra.mxu0 %v2333_v32  ;;  %v2363_v19 = vpack.c.bf16 %v360_v15, %v356_v14  ;;  %v364_v22 = vld [vmem:[#allocation5 + $0x158] sm:$0xff]  ;;  %v3169_v24 = vld [vmem:[%s3123_s16 + $0x18] sm:$0xff]  ;;  %v2365_v26 = vpack.c.bf16 %v359_v21, %v355_v20  ;;  %v3232_v54 = vld [vmem:[%s3123_s16 + $0xd0] sm:$0xff] }
  0x9a   : > { %2432 = vmatprep.subr.bf16.mxu1 %v2335_v33  ;;  %2336 = vmatprep.subr.bf16.mxu0 %v2335_v33  ;;  %v368_v23 = vld [vmem:[#allocation5 + $0x178] sm:$0xff]  ;;  %v363_v28 = vld [vmem:[#allocation5 + $0x150] sm:$0xff]  ;;  %v298_v55 = vld [vmem:[%s3123_s16 + $0x50] sm:$0xff] }
  0x9b   : > { %v2367_v27 = vpack.c.bf16 %v368_v23, %v364_v22  ;;  %v367_v29 = vld [vmem:[#allocation5 + $0x170] sm:$0xff]  ;;  %v372_v30 = vld [vmem:[#allocation5 + $0x198] sm:$0xff]  ;;  %v1309_v7 = vld [vmem:[#allocation7 + $0x8] sm:$0xff] }
  0x9c   : > { %v376_v31 = vld [vmem:[#allocation5 + $0x1b8] sm:$0xff]  ;;  %v2369_v34 = vpack.c.bf16 %v367_v29, %v363_v28  ;;  %v371_v36 = vld [vmem:[#allocation5 + $0x190] sm:$0xff]  ;;  %v1312_v14 = vld [vmem:[#allocation7 + $0x20] sm:$0xff] }
  0x9d   : > { %2440 = vmatpush1.bf16.msra.mxu1 %v2337_v38  ;;  %2338 = vmatpush1.bf16.msra.mxu0 %v2337_v38  ;;  %v3179_v32 = vld [vmem:[%s3123_s16 + $0x20] sm:$0xff]  ;;  %v3185_v33 = vld [vmem:[%s3123_s16 + $0xa8] sm:$0xff]  ;;  %v2371_v35 = vpack.c.bf16 %v376_v31, %v372_v30  ;;  %v3205_v47 = vld [vmem:[%s3123_s16 + $0xb8] sm:$0xff] }
  0x9e   : > { %2433 = vmatprep.subr.bf16.mxu1 %v2339_v39  ;;  %2340 = vmatprep.subr.bf16.mxu0 %v2339_v39  ;;  %v375_v37 = vld [vmem:[#allocation5 + $0x1b0] sm:$0xff]  ;;  %v380_v38 = vld [vmem:[#allocation5 + $0x1d8] sm:$0xff]  ;;  %v1313_v15 = vld [vmem:[#allocation7 + $0x28] sm:$0xff] }
  0x9f   : > { %v384_v39 = vld [vmem:[#allocation5 + $0x1f8] sm:$0xff]  ;;  %v2373_v42 = vpack.c.bf16 %v375_v37, %v371_v36  ;;  %v3209_v49 = vld [vmem:[%s3123_s16 + $0x38] sm:$0xff]  ;;  %v1316_v21 = vld [vmem:[#allocation7 + $0x40] sm:$0xff] }
  0xa0   : > { %v3189_v40 = vld [vmem:[%s3123_s16 + $0x28] sm:$0xff]  ;;  %v2375_v43 = vpack.c.bf16 %v384_v39, %v380_v38  ;;  %v3246_v59 = vld [vmem:[%s3123_s16 + $0xe0] sm:$0xff]  ;;  %v3273_v4 = vld [vmem:[%s3123_s16 + $0xf8] sm:$0xff] }
  0xa1   : > { %2441 = vmatpush1.bf16.msra.mxu1 %v2341_v44  ;;  %2342 = vmatpush1.bf16.msra.mxu0 %v2341_v44  ;;  %v379_v44 = vld [vmem:[#allocation5 + $0x1d0] sm:$0xff]  ;;  %v3225_v52 = vld [vmem:[%s3123_s16 + $0xc8] sm:$0xff]  ;;  %v1317_v22 = vld [vmem:[#allocation7 + $0x48] sm:$0xff] }
  0xa2   : > { %2434 = vmatprep.subr.bf16.mxu1 %v2343_v45  ;;  %2344 = vmatprep.subr.bf16.mxu0 %v2343_v45  ;;  %v383_v45 = vld [vmem:[#allocation5 + $0x1f0] sm:$0xff]  ;;  %v297_v53 = vld [vmem:[%s3123_s16 + $0x48] sm:$0xff]  ;;  %v2392_v23 = vpack.c.bf16 %v1317_v22, %v1316_v21  ;;  %v1321_v29 = vld [vmem:[#allocation7 + $0x68] sm:$0xff] }
  0xa3   : > { %v2377_v48 = vpack.c.bf16 %v383_v45, %v379_v44  ;;  %v300_v60 = vld [vmem:[%s3123_s16 + $0x60] sm:$0xff]  ;;  %v3253_v61 = vld [vmem:[%s3123_s16 + $0xe8] sm:$0xff]  ;;  %v3277_v5 = vld [vmem:[%s3123_s16 + $0x78] sm:$0xff] }
  0xa4   : > { %v3257_v62 = vld [vmem:[%s3123_s16 + $0x68] sm:$0xff]  ;;  %v3283_v6 = vld [vmem:[%s3123_s16 + $0x100] sm:$0xff]  ;;  %v1325_v36 = vld [vmem:[#allocation7 + $0x88] sm:$0xff] }
  0xa5   : > { %2442 = vmatpush1.bf16.msra.mxu1 %v2345_v50  ;;  %2346 = vmatpush1.bf16.msra.mxu0 %v2345_v50  ;;  %v3215_v50 = vld [vmem:[%s3123_s16 + $0xc0] sm:$0xff]  ;;  %v1320_v28 = vld [vmem:[#allocation7 + $0x60] sm:$0xff]  ;;  %v1333_v45 = vld [vmem:[#allocation7 + $0xc8] sm:$0xff] }
  0xa6   : > { %2348 = vmatprep.subr.bf16.mxu1 %v2347_v51  ;;  %v3219_v51 = vld [vmem:[%s3123_s16 + $0x40] sm:$0xff]  ;;  %v2398_v30 = vpack.c.bf16 %v1321_v29, %v1320_v28  ;;  %v1328_v39 = vld [vmem:[#allocation7 + $0xa0] sm:$0xff] }
  0xa7   : > { %v1311_v12 = vld [vmem:[#allocation7 + $0x18] sm:$0xff]  ;;  %v1322_v31 = vld [vmem:[#allocation7 + $0x70] sm:$0xff]  ;;  %v1332_v44 = vld [vmem:[#allocation7 + $0xc0] sm:$0xff] }
  0xa8   : > { %546 = vmatmul.mubr.f32.vlgmr.msra.gmra.mrb[0].mxu1 %v3136_v56  ;;  %450 = vmatmul.mubr.f32.vlgmr.msra.gmra.mrb[0].mxu0 %v3139_v63  ;;  %v1326_v37 = vld [vmem:[#allocation7 + $0x90] sm:$0xff]  ;;  %v1327_v38 = vld [vmem:[#allocation7 + $0x98] sm:$0xff] }
  0xa9   : > { %2350 = vmatpush1.bf16.msra.mxu1 %v2349_v57  ;;  %551 = vmatprep.mubr.f32.mxu1 %v2911_v0  ;;  %v3239_v57 = vld [vmem:[%s3123_s16 + $0xd8] sm:$0xff] }
  0xaa   : > { %2352 = vmatprep.subr.bf16.mxu1 %v2351_v58  ;;  %455 = vmatprep.mubr.f32.mxu0 %v2911_v0  ;;  %v299_v58 = vld [vmem:[%s3123_s16 + $0x58] sm:$0xff] }
  0xac   : > { %552 = vmatmul.mubr.f32.gmra.mrb[2].mxu1 %v3145_v1  ;;  %456 = vmatmul.mubr.f32.gmra.mrb[2].mxu0 %v3149_v8 }
  0xad   : > { %557 = vmatprep.mubr.f32.mxu1 %v2911_v0  ;;  %2354 = vmatpush1.bf16.msra.mxu1 %v2353_v2  ;;  %v3263_v2 = vld [vmem:[%s3123_s16 + $0xf0] sm:$0xff] }
  0xae   : > { %2356 = vmatprep.subr.bf16.mxu1 %v2355_v3  ;;  %461 = vmatprep.mubr.f32.mxu0 %v2911_v0  ;;  %v3267_v3 = vld [vmem:[%s3123_s16 + $0x70] sm:$0xff] }
  0xb0   : > { %558 = vmatmul.mubr.f32.gmra.mrb[4].mxu1 %v3155_v9  ;;  %462 = vmatmul.mubr.f32.gmra.mrb[4].mxu0 %v3159_v16 }
  0xb1   : > { %563 = vmatprep.mubr.f32.mxu1 %v2911_v0  ;;  %2358 = vmatpush1.bf16.msra.mxu1 %v2357_v10  ;;  %v2912_v10 = vmov 0.0|0.0  }
  0xb2   : > { %2360 = vmatprep.subr.bf16.mxu1 %v2359_v11  ;;  %467 = vmatprep.mubr.f32.mxu0 %v2911_v0  ;;  %v1310_v11 = vld [vmem:[#allocation7 + $0x10] sm:$0xff] }
  0xb3   : > { %2379 = vmatprep.subr.bf16.mxu0 %v2912_v10  ;;  %v2383_v13 = vpack.c.bf16 %v1311_v12, %v1310_v11 }
  0xb4   : > { %564 = vmatmul.mubr.f32.gmra.mrb[6].mxu1 %v3165_v17  ;;  %468 = vmatmul.mubr.f32.gmra.mrb[6].mxu0 %v3169_v24 }
  0xb5   : > { %569 = vmatprep.mubr.f32.mxu1 %v2911_v0  ;;  %2362 = vmatpush1.bf16.msra.mxu1 %v2361_v18  ;;  %v1314_v18 = vld [vmem:[#allocation7 + $0x30] sm:$0xff] }
  0xb6   : > { %2364 = vmatprep.subr.bf16.mxu1 %v2363_v19  ;;  %473 = vmatprep.mubr.f32.mxu0 %v2911_v0  ;;  %v1315_v19 = vld [vmem:[#allocation7 + $0x38] sm:$0xff] }
  0xb7   : > { %v2389_v20 = vpack.c.bf16 %v1315_v19, %v1314_v18 }
  0xb8   : > { %570 = vmatmul.mubr.f32.gmra.mrb[8].mxu1 %v3175_v25  ;;  %474 = vmatmul.mubr.f32.gmra.mrb[8].mxu0 %v3179_v32 }
  0xb9   : > { %575 = vmatprep.mubr.f32.mxu1 %v2911_v0  ;;  %2366 = vmatpush1.bf16.msra.mxu1 %v2365_v26  ;;  %v1319_v26 = vld [vmem:[#allocation7 + $0x58] sm:$0xff] }
  0xba   : > { %2368 = vmatprep.subr.bf16.mxu1 %v2367_v27  ;;  %479 = vmatprep.mubr.f32.mxu0 %v2911_v0 }
  0xbc   : > { %576 = vmatmul.mubr.f32.gmra.mrb[10].mxu1 %v3185_v33  ;;  %480 = vmatmul.mubr.f32.gmra.mrb[10].mxu0 %v3189_v40 }
  0xbd   : > { %581 = vmatprep.mubr.f32.mxu1 %v2911_v0  ;;  %2370 = vmatpush1.bf16.msra.mxu1 %v2369_v34 }
  0xbe   : > { %2372 = vmatprep.subr.bf16.mxu1 %v2371_v35  ;;  %485 = vmatprep.mubr.f32.mxu0 %v2911_v0  ;;  %v1324_v35 = vld [vmem:[#allocation7 + $0x80] sm:$0xff] }
  0xc0   : > { %582 = vmatmul.mubr.f32.gmra.mrb[12].mxu1 %v3195_v41  ;;  %486 = vmatmul.mubr.f32.gmra.mrb[12].mxu0 %v3199_v46 }
  0xc1   : > { %587 = vmatprep.mubr.f32.mxu1 %v2911_v0  ;;  %2374 = vmatpush1.bf16.msra.mxu1 %v2373_v42  ;;  %v1330_v42 = vld [vmem:[#allocation7 + $0xb0] sm:$0xff] }
  0xc2   : > { %2376 = vmatprep.subr.bf16.mxu1 %v2375_v43  ;;  %491 = vmatprep.mubr.f32.mxu0 %v2911_v0  ;;  %v1331_v43 = vld [vmem:[#allocation7 + $0xb8] sm:$0xff] }
  0xc4   : > { %588 = vmatmul.mubr.f32.gmra.mrb[14].mxu1 %v3205_v47  ;;  %492 = vmatmul.mubr.f32.gmra.mrb[14].mxu0 %v3209_v49 }
  0xc5   : > { %593 = vmatprep.mubr.f32.mxu1 %v2911_v0  ;;  %2378 = vmatpush1.bf16.msra.mxu1 %v2377_v48  ;;  %v1335_v48 = vld [vmem:[#allocation7 + $0xd8] sm:$0xff] }
  0xc6   : > { %497 = vmatprep.mubr.f32.mxu0 %v2911_v0 }
  0xc8   : > { %594 = vmatmul.mubr.f32.gmra.mrb[16].mxu1 %v3215_v50  ;;  %498 = vmatmul.mubr.f32.gmra.mrb[16].mxu0 %v3219_v51 }
  0xc9   : > { %599 = vmatprep.mubr.f32.mxu1 %v2911_v0  ;;  %503 = vmatprep.mubr.f32.mxu0 %v2911_v0 }
  0xcc   : > { %600 = vmatmul.mubr.f32.gmra.mrb[18].mxu1 %v3225_v52  ;;  %504 = vmatmul.mubr.f32.gmra.mrb[18].mxu0 %v297_v53 }
  0xcd   : > { %605 = vmatprep.mubr.f32.mxu1 %v2911_v0  ;;  %509 = vmatprep.mubr.f32.mxu0 %v2911_v0 }
  0xd0   : > { %606 = vmatmul.mubr.f32.gmra.mrb[20].mxu1 %v3232_v54  ;;  %510 = vmatmul.mubr.f32.gmra.mrb[20].mxu0 %v298_v55 }
  0xd1   : > { %611 = vmatprep.mubr.f32.mxu1 %v2911_v0  ;;  %515 = vmatprep.mubr.f32.mxu0 %v2911_v0 }
  0xd4   : > { %612 = vmatmul.mubr.f32.gmra.mrb[22].mxu1 %v3239_v57  ;;  %516 = vmatmul.mubr.f32.gmra.mrb[22].mxu0 %v299_v58 }
  0xd5   : > { %617 = vmatprep.mubr.f32.mxu1 %v2911_v0  ;;  %521 = vmatprep.mubr.f32.mxu0 %v2911_v0 }
  0xd8   : > { %618 = vmatmul.mubr.f32.gmra.mrb[24].mxu1 %v3246_v59  ;;  %522 = vmatmul.mubr.f32.gmra.mrb[24].mxu0 %v300_v60 }
  0xd9   : > { %623 = vmatprep.mubr.f32.mxu1 %v2911_v0  ;;  %527 = vmatprep.mubr.f32.mxu0 %v2911_v0 }
  0xdc   : > { %624 = vmatmul.mubr.f32.gmra.mrb[26].mxu1 %v3253_v61  ;;  %528 = vmatmul.mubr.f32.gmra.mrb[26].mxu0 %v3257_v62 }
  0xdd   : > { %629 = vmatprep.mubr.f32.mxu1 %v2911_v0  ;;  %533 = vmatprep.mubr.f32.mxu0 %v2911_v0 }
  0xe0   : > { %630 = vmatmul.mubr.f32.gmra.mrb[28].mxu1 %v3263_v2  ;;  %534 = vmatmul.mubr.f32.gmra.mrb[28].mxu0 %v3267_v3 }
  0xe1   : > { %635 = vmatprep.mubr.f32.mxu1 %v2911_v0  ;;  %539 = vmatprep.mubr.f32.mxu0 %v2911_v0 }
  0xe4   : > { %636 = vmatmul.mubr.f32.gmra.mrb[30].mxu1 %v3273_v4  ;;  %540 = vmatmul.mubr.f32.gmra.mrb[30].mxu0 %v3277_v5 }
  0xe5   : > { %641 = vmatprep.mubr.f32.mxu1 %v2911_v0 }
  0xe8   : > { %642 = vmatmul.mubr.f32.gmra.mrb[32].mxu1 %v3283_v6 }
  0xe9   : > { %712 = vmatprep.mubr.f32.mxu1 %v2911_v0 }
  0xec   : > { %713 = vmatmul.mubr.f32.vlgmr.msra.gmra.mrb[34].mxu1 %v3139_v63  ;;  %v1308_v63 = vld [vmem:[#allocation7] sm:$0xff] }
  0xed   : > { %718 = vmatprep.mubr.f32.mxu1 %v2911_v0 }
  0xf0   : > { %719 = vmatmul.mubr.f32.gmra.mrb[36].mxu1 %v3149_v8  ;;  %v2380_v8 = vpack.c.bf16 %v1309_v7, %v1308_v63 }
  0xf1   : > { %724 = vmatprep.mubr.f32.mxu1 %v2911_v0 }
  0xf2   : > { %2381 = vmatpush1.bf16.msra.mxu0 %v2380_v8 }
  0xf3   : > { %2382 = vmatprep.subr.bf16.mxu0 %v2912_v10 }
  0xf4   : > { %725 = vmatmul.mubr.f32.gmra.mrb[38].mxu1 %v3159_v16  ;;  %v2386_v16 = vpack.c.bf16 %v1313_v15, %v1312_v14 }
  0xf5   : > { %730 = vmatprep.mubr.f32.mxu1 %v2911_v0 }
  0xf6   : > { %2384 = vmatpush1.bf16.msra.mxu0 %v2383_v13 }
  0xf7   : > { %2385 = vmatprep.subr.bf16.mxu0 %v2912_v10 }
  0xf8   : > { %731 = vmatmul.mubr.f32.gmra.mrb[40].mxu1 %v3169_v24  ;;  %v1318_v24 = vld [vmem:[#allocation7 + $0x50] sm:$0xff] }
  0xf9   : > { %736 = vmatprep.mubr.f32.mxu1 %v2911_v0  ;;  %v2395_v27 = vpack.c.bf16 %v1319_v26, %v1318_v24 }
  0xfa   : > { %2387 = vmatpush1.bf16.msra.mxu0 %v2386_v16 }
  0xfb   : > { %2388 = vmatprep.subr.bf16.mxu0 %v2912_v10 }
  0xfc   : > { %737 = vmatmul.mubr.f32.gmra.mrb[42].mxu1 %v3179_v32  ;;  %v1323_v32 = vld [vmem:[#allocation7 + $0x78] sm:$0xff] }
  0xfd   : > { %742 = vmatprep.mubr.f32.mxu1 %v2911_v0  ;;  %v2401_v34 = vpack.c.bf16 %v1323_v32, %v1322_v31 }
  0xfe   : > { %2390 = vmatpush1.bf16.msra.mxu0 %v2389_v20 }
  0xff   : > { %2391 = vmatprep.subr.bf16.mxu0 %v2912_v10 }
 0x100   : > { %743 = vmatmul.mubr.f32.gmra.mrb[44].mxu1 %v3189_v40  ;;  %v1329_v40 = vld [vmem:[#allocation7 + $0xa8] sm:$0xff] }
 0x101   : > { %748 = vmatprep.mubr.f32.mxu1 %v2911_v0 }
 0x102   : > { %2393 = vmatpush1.bf16.msra.mxu0 %v2392_v23 }
 0x103   : > { %2394 = vmatprep.subr.bf16.mxu0 %v2912_v10 }
 0x104   : > { %749 = vmatmul.mubr.f32.gmra.mrb[46].mxu1 %v3199_v46  ;;  %v1334_v46 = vld [vmem:[#allocation7 + $0xd0] sm:$0xff] }
 0x105   : > { %754 = vmatprep.mubr.f32.mxu1 %v2911_v0 }
 0x106   : > { %2396 = vmatpush1.bf16.msra.mxu0 %v2395_v27 }
 0x107   : > { %2397 = vmatprep.subr.bf16.mxu0 %v2912_v10 }
 0x108   : > { %755 = vmatmul.mubr.f32.gmra.mrb[48].mxu1 %v3209_v49  ;;  %v1336_v49 = vld [vmem:[#allocation7 + $0xe0] sm:$0xff] }
 0x109   : > { %760 = vmatprep.mubr.f32.mxu1 %v2911_v0 }
 0x10a   : > { %2399 = vmatpush1.bf16.msra.mxu0 %v2398_v30 }
 0x10b   : > { %2400 = vmatprep.subr.bf16.mxu0 %v2912_v10 }
 0x10c   : > { %761 = vmatmul.mubr.f32.gmra.mrb[50].mxu1 %v3219_v51  ;;  %v1337_v51 = vld [vmem:[#allocation7 + $0xe8] sm:$0xff] }
 0x10d   : > { %766 = vmatprep.mubr.f32.mxu1 %v2911_v0 }
 0x10e   : > { %2402 = vmatpush1.bf16.msra.mxu0 %v2401_v34 }
 0x10f   : > { %2403 = vmatprep.subr.bf16.mxu0 %v2912_v10 }
 0x110   : > { %767 = vmatmul.mubr.f32.gmra.mrb[52].mxu1 %v297_v53  ;;  %v1338_v53 = vld [vmem:[#allocation7 + $0xf0] sm:$0xff] }
 0x111   : > { %772 = vmatprep.mubr.f32.mxu1 %v2911_v0 }
 0x114   : > { %773 = vmatmul.mubr.f32.gmra.mrb[54].mxu1 %v298_v55  ;;  %v1339_v55 = vld [vmem:[#allocation7 + $0xf8] sm:$0xff] }
 0x115   : > { %778 = vmatprep.mubr.f32.mxu1 %v2911_v0 }
 0x118   : > { %779 = vmatmul.mubr.f32.gmra.mrb[56].mxu1 %v299_v58 }
 0x119   : > { %784 = vmatprep.mubr.f32.mxu1 %v2911_v0 }
 0x11c   : > { %785 = vmatmul.mubr.f32.gmra.mrb[58].mxu1 %v300_v60 }
 0x11d   : > { %790 = vmatprep.mubr.f32.mxu1 %v2911_v0 }
 0x120   : > { %791 = vmatmul.mubr.f32.gmra.mrb[60].mxu1 %v3257_v62 }
 0x121   : > { %796 = vmatprep.mubr.f32.mxu1 %v2911_v0 }
 0x124   : > { %797 = vmatmul.mubr.f32.gmra.mrb[62].mxu1 %v3267_v3 }
 0x125   : > { %802 = vmatprep.mubr.f32.mxu1 %v2911_v0 }
 0x128   : > { %803 = vmatmul.mubr.f32.gmra.mrb[64].mxu1 %v3277_v5 }
 0x129   : > { %808 = vmatprep.mubr.f32.mxu1 %v2911_v0 }
 0x12c   : > { %809 = vmatmul.mubr.f32.gmra.mrb[66].mxu1 %v3136_v56  ;;  %v2404_v56 = vpack.c.bf16 %v1325_v36, %v1324_v35 }
 0x12d   : > { %814 = vmatprep.mubr.f32.mxu1 %v2911_v0 }
 0x12e   : > { %2405 = vmatpush1.bf16.msra.mxu0 %v2404_v56 }
 0x12f   : > { %2406 = vmatprep.subr.bf16.mxu0 %v2912_v10 }
 0x130   : > { %815 = vmatmul.mubr.f32.gmra.mrb[68].mxu1 %v3145_v1  ;;  %v2407_v1 = vpack.c.bf16 %v1327_v38, %v1326_v37 }
 0x131   : > { %820 = vmatprep.mubr.f32.mxu1 %v2911_v0 }
 0x132   : > { %2408 = vmatpush1.bf16.msra.mxu0 %v2407_v1 }
 0x133   : > { %2409 = vmatprep.subr.bf16.mxu0 %v2912_v10 }
 0x134   : > { %821 = vmatmul.mubr.f32.gmra.mrb[70].mxu1 %v3155_v9  ;;  %v2410_v9 = vpack.c.bf16 %v1329_v40, %v1328_v39 }
 0x135   : > { %826 = vmatprep.mubr.f32.mxu1 %v2911_v0 }
 0x136   : > { %2411 = vmatpush1.bf16.msra.mxu0 %v2410_v9 }
 0x137   : > { %2412 = vmatprep.subr.bf16.mxu0 %v2912_v10 }
 0x138   : > { %827 = vmatmul.mubr.f32.gmra.mrb[72].mxu1 %v3165_v17  ;;  %v2413_v17 = vpack.c.bf16 %v1331_v43, %v1330_v42 }
 0x139   : > { %832 = vmatprep.mubr.f32.mxu1 %v2911_v0 }
 0x13a   : > { %2414 = vmatpush1.bf16.msra.mxu0 %v2413_v17 }
 0x13b   : > { %2415 = vmatprep.subr.bf16.mxu0 %v2912_v10 }
 0x13c   : > { %833 = vmatmul.mubr.f32.gmra.mrb[74].mxu1 %v3175_v25  ;;  %v2416_v25 = vpack.c.bf16 %v1333_v45, %v1332_v44 }
 0x13d   : > { %838 = vmatprep.mubr.f32.mxu1 %v2911_v0 }
 0x13e   : > { %2417 = vmatpush1.bf16.msra.mxu0 %v2416_v25 }
 0x13f   : > { %2418 = vmatprep.subr.bf16.mxu0 %v2912_v10 }
 0x140   : > { %839 = vmatmul.mubr.f32.gmra.mrb[76].mxu1 %v3185_v33  ;;  %v2419_v33 = vpack.c.bf16 %v1335_v48, %v1334_v46 }
 0x141   : > { %844 = vmatprep.mubr.f32.mxu1 %v2911_v0 }
 0x142   : > { %2420 = vmatpush1.bf16.msra.mxu0 %v2419_v33 }
 0x143   : > { %2421 = vmatprep.subr.bf16.mxu0 %v2912_v10 }
 0x144   : > { %845 = vmatmul.mubr.f32.gmra.mrb[78].mxu1 %v3195_v41  ;;  %v2422_v41 = vpack.c.bf16 %v1337_v51, %v1336_v49 }
 0x145   : > { %850 = vmatprep.mubr.f32.mxu1 %v2911_v0 }
 0x146   : > { %2423 = vmatpush1.bf16.msra.mxu0 %v2422_v41 }
 0x147   : > { %2424 = vmatprep.subr.bf16.mxu0 %v2912_v10 }
 0x148   : > { %851 = vmatmul.mubr.f32.gmra.mrb[80].mxu1 %v3205_v47  ;;  %v2425_v47 = vpack.c.bf16 %v1339_v55, %v1338_v53 }
 0x149   : > { %856 = vmatprep.mubr.f32.mxu1 %v2911_v0 }
 0x14a   : > { %2426 = vmatpush1.bf16.msra.mxu0 %v2425_v47 }
 0x14c   : > { %857 = vmatmul.mubr.f32.gmra.mrb[82].mxu1 %v3215_v50 }
 0x14d   : > { %862 = vmatprep.mubr.f32.mxu1 %v2911_v0 }
 0x150   : > { %863 = vmatmul.mubr.f32.gmra.mrb[84].mxu1 %v3225_v52 }
 0x151   : > { %868 = vmatprep.mubr.f32.mxu1 %v2911_v0 }
 0x154   : > { %869 = vmatmul.mubr.f32.gmra.mrb[86].mxu1 %v3232_v54 }
 0x155   : > { %874 = vmatprep.mubr.f32.mxu1 %v2911_v0 }
 0x158   : > { %875 = vmatmul.mubr.f32.gmra.mrb[88].mxu1 %v3239_v57 }
 0x159   : > { %880 = vmatprep.mubr.f32.mxu1 %v2911_v0 }
 0x15c   : > { %881 = vmatmul.mubr.f32.gmra.mrb[90].mxu1 %v3246_v59 }
 0x15d   : > { %886 = vmatprep.mubr.f32.mxu1 %v2911_v0 }
 0x160   : > { %887 = vmatmul.mubr.f32.gmra.mrb[92].mxu1 %v3253_v61 }
 0x161   : > { %892 = vmatprep.mubr.f32.mxu1 %v2911_v0 }
 0x164   : > { %893 = vmatmul.mubr.f32.gmra.mrb[94].mxu1 %v3263_v2 }
 0x165   : > { %898 = vmatprep.mubr.f32.mxu1 %v2911_v0 }
 0x168   : > { %899 = vmatmul.mubr.f32.gmra.mrb[96].mxu1 %v3273_v4 }
 0x169   : > { %904 = vmatprep.mubr.f32.mxu1 %v2911_v0 }
 0x16c   : > { %905 = vmatmul.mubr.f32.gmra.mrb[98].mxu1 %v3283_v6 }
 0x17b   : > { %v3364_v50 = vpop.f32.mrb[0].mxu1  ;;  %v3366_v52 = vpop.f32.mrb[0].mxu0 }
 0x17c   : > { %v3368_v54 = vpop.f32.mrb[1].mxu1  ;;  %v3370_v57 = vpop.f32.mrb[1].mxu0 }
 0x17f   : > { %v3372_v58 = vpop.f32.mrb[2].mxu1  ;;  %v3374_v59 = vpop.f32.mrb[2].mxu0 }
 0x180   : > { %v3376_v60 = vpop.f32.mrb[3].mxu1  ;;  %v3378_v61 = vpop.f32.mrb[3].mxu0 }
 0x183   : > { %v3380_v62 = vpop.f32.mrb[4].mxu1  ;;  %v3382_v0 = vpop.f32.mrb[4].mxu0 }
 0x184   : > { %4142 = vst [vmem:[#allocation13_spill] sm:$0xff] %v3380_v62  ;;  %v3384_v2 = vpop.f32.mrb[5].mxu1  ;;  %v3386_v3 = vpop.f32.mrb[5].mxu0 }
 0x185   : > { %4143 = vst [vmem:[#allocation14_spill] sm:$0xff] %v3384_v2 }
 0x187   : > { %v3388_v4 = vpop.f32.mrb[6].mxu1  ;;  %v3390_v5 = vpop.f32.mrb[6].mxu0 }
 0x188   : > { %4144 = vst [vmem:[#allocation15_spill] sm:$0xff] %v3388_v4  ;;  %v3392_v6 = vpop.f32.mrb[7].mxu1  ;;  %v3394_v63 = vpop.f32.mrb[7].mxu0 }
 0x189   : > { %4145 = vst [vmem:[#allocation16_spill] sm:$0xff] %v3392_v6 }
 0x18b   : > { %v3396_v7 = vpop.f32.mrb[8].mxu1  ;;  %v3398_v8 = vpop.f32.mrb[8].mxu0 }
 0x18c   : > { %4146 = vst [vmem:[#allocation17_spill] sm:$0xff] %v3396_v7  ;;  %v3400_v10 = vpop.f32.mrb[9].mxu1  ;;  %v3402_v11 = vpop.f32.mrb[9].mxu0 }
 0x18d   : > { %4147 = vst [vmem:[#allocation18_spill] sm:$0xff] %v3400_v10 }
 0x18f   : > { %v3404_v12 = vpop.f32.mrb[10].mxu1  ;;  %v3406_v13 = vpop.f32.mrb[10].mxu0 }
 0x190   : > { %4148 = vst [vmem:[#allocation19_spill] sm:$0xff] %v3404_v12  ;;  %v3408_v14 = vpop.f32.mrb[11].mxu1  ;;  %v3410_v15 = vpop.f32.mrb[11].mxu0 }
 0x191   : > { %4149 = vst [vmem:[#allocation20_spill] sm:$0xff] %v3408_v14 }
 0x193   : > { %v3412_v16 = vpop.f32.mrb[12].mxu1  ;;  %v3414_v18 = vpop.f32.mrb[12].mxu0 }
 0x194   : > { %4150 = vst [vmem:[#allocation21_spill] sm:$0xff] %v3412_v16  ;;  %v3416_v19 = vpop.f32.mrb[13].mxu1  ;;  %v3418_v20 = vpop.f32.mrb[13].mxu0 }
 0x195   : > { %4151 = vst [vmem:[#allocation22_spill] sm:$0xff] %v3416_v19 }
 0x197   : > { %v3420_v21 = vpop.f32.mrb[14].mxu1  ;;  %v3422_v22 = vpop.f32.mrb[14].mxu0 }
 0x198   : > { %4152 = vst [vmem:[#allocation23_spill] sm:$0xff] %v3420_v21  ;;  %v3424_v23 = vpop.f32.mrb[15].mxu1  ;;  %v3426_v24 = vpop.f32.mrb[15].mxu0 }
 0x199   : > { %4153 = vst [vmem:[#allocation24_spill] sm:$0xff] %v3424_v23 }
 0x19b   : > { %v3428_v26 = vpop.f32.mrb[16].mxu1  ;;  %v3430_v27 = vpop.f32.mrb[16].mxu0 }
 0x19c   : > { %4154 = vst [vmem:[#allocation25_spill] sm:$0xff] %v3428_v26  ;;  %v3432_v28 = vpop.f32.mrb[17].mxu1  ;;  %v3434_v29 = vpop.f32.mrb[17].mxu0 }
 0x19d   : > { %4155 = vst [vmem:[#allocation26_spill] sm:$0xff] %v3432_v28 }
 0x19f   : > { %v3436_v30 = vpop.f32.mrb[18].mxu1  ;;  %v3438_v31 = vpop.f32.mrb[18].mxu0 }
 0x1a0   : > { %4156 = vst [vmem:[#allocation27_spill] sm:$0xff] %v3436_v30  ;;  %v3440_v32 = vpop.f32.mrb[19].mxu1  ;;  %v3442_v34 = vpop.f32.mrb[19].mxu0 }
 0x1a1   : > { %4157 = vst [vmem:[#allocation28_spill] sm:$0xff] %v3440_v32 }
 0x1a3   : > { %v3444_v35 = vpop.f32.mrb[20].mxu1  ;;  %v3446_v36 = vpop.f32.mrb[20].mxu0 }
 0x1a4   : > { %4158 = vst [vmem:[#allocation29_spill] sm:$0xff] %v3444_v35  ;;  %v3448_v56 = vpop.f32.mrb[21].mxu1  ;;  %v3450_v37 = vpop.f32.mrb[21].mxu0 }
 0x1a5   : > { %4159 = vst [vmem:[#allocation30_spill] sm:$0xff] %v3448_v56 }
 0x1a7   : > { %v3452_v38 = vpop.f32.mrb[22].mxu1  ;;  %v3454_v1 = vpop.f32.mrb[22].mxu0 }
 0x1a8   : > { %4160 = vst [vmem:[#allocation31_spill] sm:$0xff] %v3452_v38  ;;  %v3456_v39 = vpop.f32.mrb[23].mxu1  ;;  %v3458_v40 = vpop.f32.mrb[23].mxu0 }
 0x1a9   : > { %4161 = vst [vmem:[#allocation32_spill] sm:$0xff] %v3456_v39 }
 0x1ab   : > { %v3460_v9 = vpop.f32.mrb[24].mxu1  ;;  %v3462_v42 = vpop.f32.mrb[24].mxu0 }
 0x1ac   : > { %4162 = vst [vmem:[#allocation33_spill] sm:$0xff] %v3460_v9  ;;  %v3464_v43 = vpop.f32.mrb[25].mxu1  ;;  %v3466_v17 = vpop.f32.mrb[25].mxu0 }
 0x1ad   : > { %4163 = vst [vmem:[#allocation34_spill] sm:$0xff] %v3464_v43 }
 0x1af   : > { %v3468_v44 = vpop.f32.mrb[26].mxu1  ;;  %v3470_v45 = vpop.f32.mrb[26].mxu0 }
 0x1b0   : > { %4164 = vst [vmem:[#allocation35_spill] sm:$0xff] %v3468_v44  ;;  %v3472_v25 = vpop.f32.mrb[27].mxu1  ;;  %v3474_v46 = vpop.f32.mrb[27].mxu0 }
 0x1b1   : > { %4165 = vst [vmem:[#allocation36_spill] sm:$0xff] %v3472_v25 }
 0x1b3   : > { %v3476_v48 = vpop.f32.mrb[28].mxu1  ;;  %v3478_v33 = vpop.f32.mrb[28].mxu0 }
 0x1b4   : > { %4166 = vst [vmem:[#allocation37_spill] sm:$0xff] %v3476_v48  ;;  %v3480_v49 = vpop.f32.mrb[29].mxu1  ;;  %v3482_v51 = vpop.f32.mrb[29].mxu0 }
 0x1b5   : > { %4167 = vst [vmem:[#allocation38_spill] sm:$0xff] %v3480_v49 }
 0x1b7   : > { %v3484_v41 = vpop.f32.mrb[30].mxu1  ;;  %v3486_v53 = vpop.f32.mrb[30].mxu0 }
 0x1b8   : > { %4168 = vst [vmem:[#allocation39_spill] sm:$0xff] %v3484_v41  ;;  %v3488_v55 = vpop.f32.mrb[31].mxu1  ;;  %v3490_v47 = vpop.f32.mrb[31].mxu0 }
 0x1b9   : > { %4169 = vst [vmem:[#allocation40_spill] sm:$0xff] %v3488_v55 }
 0x1bb   : > { %v3492_v44 = vpop.f32.mrb[32].mxu1 }
 0x1bc   : > { %4170 = vst [vmem:[#allocation41_spill] sm:$0xff] %v3492_v44  ;;  %v3494_v25 = vpop.f32.mrb[33].mxu1 }
 0x1bd   : > { %4171 = vst [vmem:[#allocation42_spill] sm:$0xff] %v3494_v25 }
 0x1bf   : > { %v714_v43 = vpop.f32.mrb[34].mxu1 }
 0x1c0   : > { %v978_v48 = vmul.f32 0.70710677, %v714_v43  ;;  %v716_v9 = vpop.f32.mrb[35].mxu1  ;;  %v911_v21 = vmul.f32 0.5, %v714_v43 }
 0x1c1   : > { %v979_v39 = vmul.f32 0.70710677, %v716_v9  ;;  %v912_v19 = vmul.f32 0.5, %v716_v9 }
 0x1c2   : > { %2515 = verf.f32 %v978_v48 }
 0x1c3   : > { %2517 = verf.f32 %v979_v39  ;;  %v720_v49 = vpop.f32.mrb[36].mxu1 }
 0x1c4   : > { %v980_v38 = vmul.f32 0.70710677, %v720_v49  ;;  %v722_v56 = vpop.f32.mrb[37].mxu1 }
 0x1c5   : > { %v981_v41 = vmul.f32 0.70710677, %v722_v56  ;;  %v914_v62 = vmul.f32 0.5, %v722_v56 }
 0x1c6   : > { %2519 = verf.f32 %v980_v38 }
 0x1c7   : > { %2521 = verf.f32 %v981_v41  ;;  %v726_v35 = vpop.f32.mrb[38].mxu1 }
 0x1c8   : > { %v982_v55 = vmul.f32 0.70710677, %v726_v35  ;;  %v728_v32 = vpop.f32.mrb[39].mxu1 }
 0x1c9   : > { %v983_v30 = vmul.f32 0.70710677, %v728_v32  ;;  %v916_v56 = vmul.f32 0.5, %v728_v32 }
 0x1ca   : > { %2523 = verf.f32 %v982_v55 }
 0x1cb   : > { %2525 = verf.f32 %v983_v30  ;;  %v732_v44 = vpop.f32.mrb[40].mxu1  ;;  %v913_v30 = vmul.f32 0.5, %v720_v49 }
 0x1cc   : > { %v2516_v25 = vpop.eup %2515  ;;  %v984_v28 = vmul.f32 0.70710677, %v732_v44  ;;  %v734_v26 = vpop.f32.mrb[41].mxu1 }
 0x1cd   : > { %v2518_v23 = vpop.eup %2517  ;;  %v985_v48 = vmul.f32 0.70710677, %v734_v26  ;;  %v1110_v39 = vadd.f32 1.0, %v2516_v25  ;;  %v918_v32 = vmul.f32 0.5, %v734_v26 }
 0x1ce   : > { %2527 = verf.f32 %v984_v28  ;;  %v1111_v16 = vadd.f32 1.0, %v2518_v23 }
 0x1cf   : > { %2529 = verf.f32 %v985_v48  ;;  %v738_v38 = vpop.f32.mrb[42].mxu1  ;;  %v1176_v41 = vmul.f32 %v1110_v39, %v911_v21 }
 0x1d0   : > { %v2520_v14 = vpop.eup %2519  ;;  %v986_v12 = vmul.f32 0.70710677, %v738_v38  ;;  %v740_v10 = vpop.f32.mrb[43].mxu1  ;;  %v1177_v7 = vmul.f32 %v1111_v16, %v912_v19  ;;  %v915_v19 = vmul.f32 0.5, %v726_v35  ;;  %v917_v35 = vmul.f32 0.5, %v732_v44 }
 0x1d1   : > { %v2522_v55 = vpop.eup %2521  ;;  %v1242_v6 = vmul.f32 %v1176_v41, %v3366_v52  ;;  %v987_v4 = vmul.f32 0.70710677, %v740_v10  ;;  %v1112_v2 = vadd.f32 1.0, %v2520_v14  ;;  %v919_v44 = vmul.f32 0.5, %v738_v38 }
 0x1d2   : > { %2531 = verf.f32 %v986_v12  ;;  %v1243_v43 = vmul.f32 %v1177_v7, %v3370_v57  ;;  %v1113_v9 = vadd.f32 1.0, %v2522_v55  ;;  %v920_v26 = vmul.f32 0.5, %v740_v10 }
 0x1d3   : > { %2533 = verf.f32 %v987_v4  ;;  %v744_v23 = vpop.f32.mrb[44].mxu1  ;;  %v1178_v28 = vmul.f32 %v1112_v2, %v913_v30 }
 0x1d4   : > { %v2524_v25 = vpop.eup %2523  ;;  %v988_v21 = vmul.f32 0.70710677, %v744_v23  ;;  %v746_v48 = vpop.f32.mrb[45].mxu1  ;;  %1404 = vmatprep.mubr.f32.mxu0 %v1243_v43  ;;  %v1179_v39 = vmul.f32 %v1113_v9, %v914_v62  ;;  %v921_v38 = vmul.f32 0.5, %v744_v23 }
 0x1d5   : > { %v2526_v16 = vpop.eup %2525  ;;  %v1244_v49 = vmul.f32 %v1178_v28, %v3374_v59  ;;  %v989_v52 = vmul.f32 0.70710677, %v746_v48  ;;  %1405 = vmatmul.mubr.f32.vlgmr.msra.gmra.mrb[32].mxu0 %v1242_v6  ;;  %v1114_v14 = vadd.f32 1.0, %v2524_v25  ;;  %v922_v10 = vmul.f32 0.5, %v746_v48 }
 0x1d6   : > { %2535 = verf.f32 %v988_v21  ;;  %v1245_v57 = vmul.f32 %v1179_v39, %v3378_v61  ;;  %v1115_v7 = vadd.f32 1.0, %v2526_v16 }
 0x1d7   : > { %2537 = verf.f32 %v989_v52  ;;  %v750_v4 = vpop.f32.mrb[46].mxu1  ;;  %v1180_v2 = vmul.f32 %v1114_v14, %v915_v19 }
 0x1d8   : > { %v2528_v12 = vpop.eup %2527  ;;  %v990_v41 = vmul.f32 0.70710677, %v750_v4  ;;  %v752_v55 = vpop.f32.mrb[47].mxu1  ;;  %1409 = vmatprep.mubr.f32.mxu0 %v1245_v57  ;;  %v1181_v62 = vmul.f32 %v1115_v7, %v916_v56  ;;  %v923_v23 = vmul.f32 0.5, %v750_v4 }
 0x1d9   : > { %v2530_v30 = vpop.eup %2529  ;;  %v1246_v59 = vmul.f32 %v1180_v2, %v3382_v0  ;;  %v991_v43 = vmul.f32 0.70710677, %v752_v55  ;;  %1410 = vmatmul.mubr.f32.gmra.mrb[34].mxu0 %v1244_v49  ;;  %v1116_v6 = vadd.f32 1.0, %v2528_v12  ;;  %v924_v48 = vmul.f32 0.5, %v752_v55 }
 0x1da   : > { %2539 = verf.f32 %v990_v41  ;;  %v1247_v61 = vmul.f32 %v1181_v62, %v3386_v3  ;;  %v1117_v9 = vadd.f32 1.0, %v2530_v30 }
 0x1db   : > { %2541 = verf.f32 %v991_v43  ;;  %v756_v28 = vpop.f32.mrb[48].mxu1  ;;  %v1182_v25 = vmul.f32 %v1116_v6, %v917_v35 }
 0x1dc   : > { %v2532_v21 = vpop.eup %2531  ;;  %v992_v39 = vmul.f32 0.70710677, %v756_v28  ;;  %v758_v16 = vpop.f32.mrb[49].mxu1  ;;  %1414 = vmatprep.mubr.f32.mxu0 %v1247_v61  ;;  %v1183_v19 = vmul.f32 %v1117_v9, %v918_v32  ;;  %v925_v4 = vmul.f32 0.5, %v756_v28 }
 0x1dd   : > { %v2534_v52 = vpop.eup %2533  ;;  %v1248_v0 = vmul.f32 %v1182_v25, %v3390_v5  ;;  %v993_v14 = vmul.f32 0.70710677, %v758_v16  ;;  %1415 = vmatmul.mubr.f32.gmra.mrb[36].mxu0 %v1246_v59  ;;  %v1118_v49 = vadd.f32 1.0, %v2532_v21  ;;  %v926_v55 = vmul.f32 0.5, %v758_v16 }
 0x1de   : > { %2543 = verf.f32 %v992_v39  ;;  %v1249_v3 = vmul.f32 %v1183_v19, %v3394_v63  ;;  %v1119_v56 = vadd.f32 1.0, %v2534_v52 }
 0x1df   : > { %2545 = verf.f32 %v993_v14  ;;  %v762_v57 = vpop.f32.mrb[50].mxu1  ;;  %v1184_v7 = vmul.f32 %v1118_v49, %v919_v44 }
 0x1e0   : > { %v2536_v2 = vpop.eup %2535  ;;  %v994_v12 = vmul.f32 0.70710677, %v762_v57  ;;  %v764_v41 = vpop.f32.mrb[51].mxu1  ;;  %1419 = vmatprep.mubr.f32.mxu0 %v1249_v3  ;;  %v1185_v62 = vmul.f32 %v1119_v56, %v920_v26  ;;  %v927_v28 = vmul.f32 0.5, %v762_v57 }
 0x1e1   : > { %v2538_v30 = vpop.eup %2537  ;;  %v1250_v5 = vmul.f32 %v1184_v7, %v3398_v8  ;;  %v995_v35 = vmul.f32 0.70710677, %v764_v41  ;;  %1420 = vmatmul.mubr.f32.gmra.mrb[38].mxu0 %v1248_v0  ;;  %v1120_v59 = vadd.f32 1.0, %v2536_v2  ;;  %v928_v16 = vmul.f32 0.5, %v764_v41 }
 0x1e2   : > { %2547 = verf.f32 %v994_v12  ;;  %v1251_v63 = vmul.f32 %v1185_v62, %v3402_v11  ;;  %v1121_v43 = vadd.f32 1.0, %v2538_v30 }
 0x1e3   : > { %2549 = verf.f32 %v995_v35  ;;  %v768_v6 = vpop.f32.mrb[52].mxu1  ;;  %v1186_v32 = vmul.f32 %v1120_v59, %v921_v38 }
 0x1e4   : > { %v2540_v61 = vpop.eup %2539  ;;  %v996_v9 = vmul.f32 0.70710677, %v768_v6  ;;  %v770_v25 = vpop.f32.mrb[53].mxu1  ;;  %1424 = vmatprep.mubr.f32.mxu0 %v1251_v63  ;;  %v1187_v21 = vmul.f32 %v1121_v43, %v922_v10  ;;  %v929_v57 = vmul.f32 0.5, %v768_v6 }
 0x1e5   : > { %v2542_v39 = vpop.eup %2541  ;;  %v1252_v8 = vmul.f32 %v1186_v32, %v3406_v13  ;;  %v997_v19 = vmul.f32 0.70710677, %v770_v25  ;;  %1425 = vmatmul.mubr.f32.gmra.mrb[40].mxu0 %v1250_v5  ;;  %v1122_v52 = vadd.f32 1.0, %v2540_v61  ;;  %v930_v41 = vmul.f32 0.5, %v770_v25 }
 0x1e6   : > { %2551 = verf.f32 %v996_v9  ;;  %v1253_v11 = vmul.f32 %v1187_v21, %v3410_v15  ;;  %v1123_v44 = vadd.f32 1.0, %v2542_v39 }
 0x1e7   : > { %2553 = verf.f32 %v997_v19  ;;  %v774_v0 = vpop.f32.mrb[54].mxu1  ;;  %v1188_v14 = vmul.f32 %v1122_v52, %v923_v23 }
 0x1e8   : > { %v2544_v49 = vpop.eup %2543  ;;  %v998_v26 = vmul.f32 0.70710677, %v774_v0  ;;  %v776_v3 = vpop.f32.mrb[55].mxu1  ;;  %1429 = vmatprep.mubr.f32.mxu0 %v1253_v11  ;;  %v1189_v56 = vmul.f32 %v1123_v44, %v924_v48  ;;  %v931_v6 = vmul.f32 0.5, %v774_v0 }
 0x1e9   : > { %v2546_v7 = vpop.eup %2545  ;;  %v1254_v13 = vmul.f32 %v1188_v14, %v3414_v18  ;;  %v999_v2 = vmul.f32 0.70710677, %v776_v3  ;;  %1430 = vmatmul.mubr.f32.gmra.mrb[42].mxu0 %v1252_v8  ;;  %v1124_v12 = vadd.f32 1.0, %v2544_v49  ;;  %v932_v25 = vmul.f32 0.5, %v776_v3 }
 0x1ea   : > { %2555 = verf.f32 %v998_v26  ;;  %v1255_v15 = vmul.f32 %v1189_v56, %v3418_v20  ;;  %v1125_v62 = vadd.f32 1.0, %v2546_v7 }
 0x1eb   : > { %2557 = verf.f32 %v999_v2  ;;  %v780_v30 = vpop.f32.mrb[56].mxu1  ;;  %v1190_v38 = vmul.f32 %v1124_v12, %v925_v4 }
 0x1ec   : > { %v2548_v5 = vpop.eup %2547  ;;  %v1000_v35 = vmul.f32 0.70710677, %v780_v30  ;;  %v782_v59 = vpop.f32.mrb[57].mxu1  ;;  %1434 = vmatprep.mubr.f32.mxu0 %v1255_v15  ;;  %v1191_v10 = vmul.f32 %v1125_v62, %v926_v55  ;;  %v933_v0 = vmul.f32 0.5, %v780_v30 }
 0x1ed   : > { %v2550_v63 = vpop.eup %2549  ;;  %v1256_v18 = vmul.f32 %v1190_v38, %v3422_v22  ;;  %v1001_v43 = vmul.f32 0.70710677, %v782_v59  ;;  %1435 = vmatmul.mubr.f32.gmra.mrb[44].mxu0 %v1254_v13  ;;  %v1126_v32 = vadd.f32 1.0, %v2548_v5  ;;  %v934_v3 = vmul.f32 0.5, %v782_v59 }
 0x1ee   : > { %2559 = verf.f32 %v1000_v35  ;;  %v1257_v20 = vmul.f32 %v1191_v10, %v3426_v24  ;;  %v1127_v61 = vadd.f32 1.0, %v2550_v63 }
 0x1ef   : > { %2561 = verf.f32 %v1001_v43  ;;  %v786_v9 = vpop.f32.mrb[58].mxu1  ;;  %v1192_v21 = vmul.f32 %v1126_v32, %v927_v28 }
 0x1f0   : > { %v2552_v39 = vpop.eup %2551  ;;  %v1002_v23 = vmul.f32 0.70710677, %v786_v9  ;;  %v788_v8 = vpop.f32.mrb[59].mxu1  ;;  %1439 = vmatprep.mubr.f32.mxu0 %v1257_v20  ;;  %v1193_v19 = vmul.f32 %v1127_v61, %v928_v16  ;;  %v935_v30 = vmul.f32 0.5, %v786_v9 }
 0x1f1   : > { %v2554_v52 = vpop.eup %2553  ;;  %v1258_v22 = vmul.f32 %v1192_v21, %v3430_v27  ;;  %v1003_v48 = vmul.f32 0.70710677, %v788_v8  ;;  %1440 = vmatmul.mubr.f32.gmra.mrb[46].mxu0 %v1256_v18  ;;  %v1128_v11 = vadd.f32 1.0, %v2552_v39  ;;  %v936_v59 = vmul.f32 0.5, %v788_v8 }
 0x1f2   : > { %2563 = verf.f32 %v1002_v23  ;;  %v1259_v24 = vmul.f32 %v1193_v19, %v3434_v29  ;;  %v1129_v44 = vadd.f32 1.0, %v2554_v52 }
 0x1f3   : > { %2565 = verf.f32 %v1003_v48  ;;  %v792_v14 = vpop.f32.mrb[60].mxu1  ;;  %v1194_v49 = vmul.f32 %v1128_v11, %v929_v57 }
 0x1f4   : > { %v2556_v26 = vpop.eup %2555  ;;  %v1004_v56 = vmul.f32 0.70710677, %v792_v14  ;;  %v794_v7 = vpop.f32.mrb[61].mxu1  ;;  %1444 = vmatprep.mubr.f32.mxu0 %v1259_v24  ;;  %v1195_v4 = vmul.f32 %v1129_v44, %v930_v41  ;;  %v937_v9 = vmul.f32 0.5, %v792_v14 }
 0x1f5   : > { %v2558_v13 = vpop.eup %2557  ;;  %v1260_v27 = vmul.f32 %v1194_v49, %v3438_v31  ;;  %v1005_v2 = vmul.f32 0.70710677, %v794_v7  ;;  %1445 = vmatmul.mubr.f32.gmra.mrb[48].mxu0 %v1258_v22  ;;  %v1130_v12 = vadd.f32 1.0, %v2556_v26  ;;  %v938_v8 = vmul.f32 0.5, %v794_v7 }
 0x1f6   : > { %2567 = verf.f32 %v1004_v56  ;;  %v1261_v29 = vmul.f32 %v1195_v4, %v3442_v34  ;;  %v1131_v55 = vadd.f32 1.0, %v2558_v13 }
 0x1f7   : > { %2569 = verf.f32 %v1005_v2  ;;  %v798_v15 = vpop.f32.mrb[62].mxu1  ;;  %v1196_v62 = vmul.f32 %v1130_v12, %v931_v6 }
 0x1f8   : > { %v2560_v38 = vpop.eup %2559  ;;  %v1006_v5 = vmul.f32 0.70710677, %v798_v15  ;;  %v800_v35 = vpop.f32.mrb[63].mxu1  ;;  %1449 = vmatprep.mubr.f32.mxu0 %v1261_v29  ;;  %v1197_v10 = vmul.f32 %v1131_v55, %v932_v25  ;;  %v939_v29 = vmul.f32 0.5, %v798_v15 }
 0x1f9   : > { %v2562_v63 = vpop.eup %2561  ;;  %v1262_v31 = vmul.f32 %v1196_v62, %v3446_v36  ;;  %v1007_v28 = vmul.f32 0.70710677, %v800_v35  ;;  %1450 = vmatmul.mubr.f32.gmra.mrb[50].mxu0 %v1260_v27  ;;  %v1132_v18 = vadd.f32 1.0, %v2560_v38  ;;  %v940_v62 = vmul.f32 0.5, %v800_v35 }
 0x1fa   : > { %2571 = verf.f32 %v1006_v5  ;;  %v1263_v34 = vmul.f32 %v1197_v10, %v3450_v37  ;;  %v1133_v43 = vadd.f32 1.0, %v2562_v63 }
 0x1fb   : > { %2573 = verf.f32 %v1007_v28  ;;  %v804_v32 = vpop.f32.mrb[64].mxu1  ;;  %v1198_v16 = vmul.f32 %v1132_v18, %v933_v0 }
 0x1fc   : > { %v2564_v20 = vpop.eup %2563  ;;  %v1008_v61 = vmul.f32 0.70710677, %v804_v32  ;;  %v806_v21 = vpop.f32.mrb[65].mxu1  ;;  %1454 = vmatprep.mubr.f32.mxu0 %v1263_v34  ;;  %v1199_v39 = vmul.f32 %v1133_v43, %v934_v3 }
 0x1fd   : > { %v2566_v23 = vpop.eup %2565  ;;  %v1264_v36 = vmul.f32 %v1198_v16, %v3454_v1  ;;  %v1009_v19 = vmul.f32 0.70710677, %v806_v21  ;;  %1455 = vmatmul.mubr.f32.gmra.mrb[52].mxu0 %v1262_v31  ;;  %v1134_v52 = vadd.f32 1.0, %v2564_v20  ;;  %v942_v34 = vmul.f32 0.5, %v806_v21 }
 0x1fe   : > { %2575 = verf.f32 %v1008_v61  ;;  %v1265_v37 = vmul.f32 %v1199_v39, %v3458_v40  ;;  %v1135_v57 = vadd.f32 1.0, %v2566_v23 }
 0x1ff   : > { %2577 = verf.f32 %v1009_v19  ;;  %v810_v22 = vpop.f32.mrb[66].mxu1  ;;  %v1200_v48 = vmul.f32 %v1134_v52, %v935_v30 }
 0x200   : > { %v2568_v11 = vpop.eup %2567  ;;  %v1010_v41 = vmul.f32 0.70710677, %v810_v22  ;;  %v812_v24 = vpop.f32.mrb[67].mxu1  ;;  %1459 = vmatprep.mubr.f32.mxu0 %v1265_v37  ;;  %v1201_v44 = vmul.f32 %v1135_v57, %v936_v59 }
 0x201   : > { %v2570_v49 = vpop.eup %2569  ;;  %v1266_v1 = vmul.f32 %v1200_v48, %v3462_v42  ;;  %v1011_v26 = vmul.f32 0.70710677, %v812_v24  ;;  %1460 = vmatmul.mubr.f32.gmra.mrb[54].mxu0 %v1264_v36  ;;  %v1136_v56 = vadd.f32 1.0, %v2568_v11  ;;  %v944_v52 = vmul.f32 0.5, %v812_v24 }
 0x202   : > { %2579 = verf.f32 %v1010_v41  ;;  %v1267_v40 = vmul.f32 %v1201_v44, %v3466_v17  ;;  %v1137_v4 = vadd.f32 1.0, %v2570_v49 }
 0x203   : > { %2581 = verf.f32 %v1011_v26  ;;  %v816_v13 = vpop.f32.mrb[68].mxu1  ;;  %v1202_v6 = vmul.f32 %v1136_v56, %v937_v9 }
 0x204   : > { %v2572_v27 = vpop.eup %2571  ;;  %v1012_v2 = vmul.f32 0.70710677, %v816_v13  ;;  %v3522_v12 = vpop.f32.mrb[69].mxu1  ;;  %1464 = vmatprep.mubr.f32.mxu0 %v1267_v40  ;;  %v1203_v25 = vmul.f32 %v1137_v4, %v938_v8  ;;  %v945_v49 = vmul.f32 0.5, %v816_v13 }
 0x205   : > { %v2574_v14 = vpop.eup %2573  ;;  %v1268_v42 = vmul.f32 %v1202_v6, %v3470_v45  ;;  %v1013_v55 = vmul.f32 0.70710677, %v3522_v12  ;;  %1465 = vmatmul.mubr.f32.gmra.mrb[56].mxu0 %v1266_v1  ;;  %v1138_v7 = vadd.f32 1.0, %v2572_v27  ;;  %v941_v45 = vmul.f32 0.5, %v804_v32 }
 0x206   : > { %2583 = verf.f32 %v1012_v2  ;;  %v1269_v17 = vmul.f32 %v1203_v25, %v3474_v46  ;;  %v1139_v38 = vadd.f32 1.0, %v2574_v14  ;;  %v946_v24 = vmul.f32 0.5, %v3522_v12 }
 0x207   : > { %2585 = verf.f32 %v1013_v55  ;;  %v822_v5 = vpop.f32.mrb[70].mxu1  ;;  %v1204_v10 = vmul.f32 %v1138_v7, %v939_v29 }
 0x208   : > { %v2576_v63 = vpop.eup %2575  ;;  %v1014_v0 = vmul.f32 0.70710677, %v822_v5  ;;  %v3527_v31 = vpop.f32.mrb[71].mxu1  ;;  %1469 = vmatprep.mubr.f32.mxu0 %v1269_v17  ;;  %v1205_v15 = vmul.f32 %v1139_v38, %v940_v62  ;;  %v947_v2 = vmul.f32 0.5, %v822_v5 }
 0x209   : > { %v2578_v28 = vpop.eup %2577  ;;  %v1270_v18 = vmul.f32 %v1204_v10, %v3478_v33  ;;  %v1015_v3 = vmul.f32 0.70710677, %v3527_v31  ;;  %1470 = vmatmul.mubr.f32.gmra.mrb[58].mxu0 %v1268_v42  ;;  %v1140_v35 = vadd.f32 1.0, %v2576_v63  ;;  %v943_v33 = vmul.f32 0.5, %v810_v22 }
 0x20a   : > { %2587 = verf.f32 %v1014_v0  ;;  %v1271_v46 = vmul.f32 %v1205_v15, %v3482_v51  ;;  %v1141_v43 = vadd.f32 1.0, %v2578_v28  ;;  %v948_v12 = vmul.f32 0.5, %v3527_v31 }
 0x20b   : > { %2589 = verf.f32 %v1015_v3  ;;  %v828_v16 = vpop.f32.mrb[72].mxu1  ;;  %v1206_v20 = vmul.f32 %v1140_v35, %v941_v45 }
 0x20c   : > { %v2580_v61 = vpop.eup %2579  ;;  %v1016_v39 = vmul.f32 0.70710677, %v828_v16  ;;  %v3532_v23 = vpop.f32.mrb[73].mxu1  ;;  %1474 = vmatprep.mubr.f32.mxu0 %v1271_v46  ;;  %v1207_v32 = vmul.f32 %v1141_v43, %v942_v34  ;;  %v949_v10 = vmul.f32 0.5, %v828_v16 }
 0x20d   : > { %v2582_v30 = vpop.eup %2581  ;;  %v1142_v36 = vadd.f32 1.0, %v2580_v61  ;;  %v1272_v19 = vmul.f32 %v1206_v20, %v3486_v53  ;;  %v1017_v21 = vmul.f32 0.70710677, %v3532_v23  ;;  %1475 = vmatmul.mubr.f32.gmra.mrb[60].mxu0 %v1270_v18  ;;  %v950_v31 = vmul.f32 0.5, %v3532_v23 }
 0x20e   : > { %v1143_v51 = vadd.f32 1.0, %v2582_v30  ;;  %2591 = verf.f32 %v1016_v39  ;;  %v1273_v59 = vmul.f32 %v1207_v32, %v3490_v47  ;;  %v4174_v32 = vld [vmem:[#allocation15_spill] sm:$0xff] }
 0x20f   : > { %v1208_v37 = vmul.f32 %v1142_v36, %v943_v33  ;;  %2593 = verf.f32 %v1017_v21  ;;  %v834_v57 = vpop.f32.mrb[74].mxu1  ;;  %v4175_v36 = vld [vmem:[#allocation16_spill] sm:$0xff] }
 0x210   : > { %v2584_v48 = vpop.eup %2583  ;;  %v1209_v11 = vmul.f32 %v1143_v51, %v944_v52  ;;  %v1018_v41 = vmul.f32 0.70710677, %v834_v57  ;;  %v836_v44 = vpop.f32.mrb[75].mxu1  ;;  %1479 = vmatprep.mubr.f32.mxu0 %v1273_v59  ;;  %v951_v20 = vmul.f32 0.5, %v834_v57 }
 0x211   : > { %v2586_v22 = vpop.eup %2585  ;;  %v1144_v9 = vadd.f32 1.0, %v2584_v48  ;;  %v1019_v53 = vmul.f32 0.70710677, %v836_v44  ;;  %1480 = vmatmul.mubr.f32.gmra.mrb[62].mxu0 %v1272_v19  ;;  %v1274_v1 = vmul.f32 %v1208_v37, %v3364_v50  ;;  %v952_v23 = vmul.f32 0.5, %v836_v44 }
 0x212   : > { %v1145_v26 = vadd.f32 1.0, %v2586_v22  ;;  %2595 = verf.f32 %v1018_v41  ;;  %v1275_v47 = vmul.f32 %v1209_v11, %v3368_v54 }
 0x213   : > { %v1210_v56 = vmul.f32 %v1144_v9, %v945_v49  ;;  %2597 = verf.f32 %v1019_v53  ;;  %v840_v8 = vpop.f32.mrb[76].mxu1  ;;  %v4176_v49 = vld [vmem:[#allocation17_spill] sm:$0xff] }
 0x214   : > { %v2588_v40 = vpop.eup %2587  ;;  %v1211_v4 = vmul.f32 %v1145_v26, %v946_v24  ;;  %v1020_v6 = vmul.f32 0.70710677, %v840_v8  ;;  %v842_v27 = vpop.f32.mrb[77].mxu1  ;;  %1484 = vmatprep.mubr.f32.mxu0 %v1275_v47  ;;  %v953_v57 = vmul.f32 0.5, %v840_v8 }
 0x215   : > { %v2590_v13 = vpop.eup %2589  ;;  %v1146_v25 = vadd.f32 1.0, %v2588_v40  ;;  %v1021_v14 = vmul.f32 0.70710677, %v842_v27  ;;  %1485 = vmatmul.mubr.f32.gmra.mrb[64].mxu0 %v1274_v1  ;;  %v1276_v50 = vmul.f32 %v1210_v56, %v3372_v58  ;;  %v4172_v58 = vld [vmem:[#allocation13_spill] sm:$0xff]  ;;  %v954_v44 = vmul.f32 0.5, %v842_v27  ;;  %v4177_v1 = vld [vmem:[#allocation18_spill] sm:$0xff] }
 0x216   : > { %v1147_v29 = vadd.f32 1.0, %v2590_v13  ;;  %2599 = verf.f32 %v1020_v6  ;;  %v1277_v54 = vmul.f32 %v1211_v4, %v3376_v60  ;;  %v4173_v60 = vld [vmem:[#allocation14_spill] sm:$0xff] }
 0x217   : > { %v1212_v42 = vmul.f32 %v1146_v25, %v947_v2  ;;  %2601 = verf.f32 %v1021_v14  ;;  %v846_v55 = vpop.f32.mrb[78].mxu1  ;;  %v4178_v14 = vld [vmem:[#allocation19_spill] sm:$0xff] }
 0x218   : > { %v2592_v7 = vpop.eup %2591  ;;  %v1213_v62 = vmul.f32 %v1147_v29, %v948_v12  ;;  %v1022_v17 = vmul.f32 0.70710677, %v846_v55  ;;  %v848_v38 = vpop.f32.mrb[79].mxu1  ;;  %1489 = vmatprep.mubr.f32.mxu0 %v1277_v54  ;;  %v955_v8 = vmul.f32 0.5, %v846_v55  ;;  %v4179_v29 = vld [vmem:[#allocation20_spill] sm:$0xff] }
 0x219   : > { %v2594_v5 = vpop.eup %2593  ;;  %v1148_v63 = vadd.f32 1.0, %v2592_v7  ;;  %v1023_v0 = vmul.f32 0.70710677, %v848_v38  ;;  %1490 = vmatmul.mubr.f32.gmra.mrb[66].mxu0 %v1276_v50  ;;  %v1278_v15 = vmul.f32 %v1212_v42, %v4172_v58  ;;  %v956_v27 = vmul.f32 0.5, %v848_v38 }
 0x21a   : > { %v1149_v28 = vadd.f32 1.0, %v2594_v5  ;;  %2603 = verf.f32 %v1022_v17  ;;  %v1279_v45 = vmul.f32 %v1213_v62, %v4173_v60  ;;  %v4181_v60 = vld [vmem:[#allocation22_spill] sm:$0xff] }
 0x21b   : > { %v1214_v18 = vmul.f32 %v1148_v63, %v949_v10  ;;  %2605 = verf.f32 %v1023_v0  ;;  %v852_v3 = vpop.f32.mrb[80].mxu1 }
 0x21c   : > { %v2596_v35 = vpop.eup %2595  ;;  %v1215_v34 = vmul.f32 %v1149_v28, %v950_v31  ;;  %v1024_v46 = vmul.f32 0.70710677, %v852_v3  ;;  %v854_v43 = vpop.f32.mrb[81].mxu1  ;;  %1494 = vmatprep.mubr.f32.mxu0 %v1279_v45  ;;  %v957_v55 = vmul.f32 0.5, %v852_v3 }
 0x21d   : > { %v2598_v16 = vpop.eup %2597  ;;  %v1150_v61 = vadd.f32 1.0, %v2596_v35  ;;  %v1025_v39 = vmul.f32 0.70710677, %v854_v43  ;;  %1495 = vmatmul.mubr.f32.gmra.mrb[68].mxu0 %v1278_v15  ;;  %v1280_v30 = vmul.f32 %v1214_v18, %v4174_v32  ;;  %v4180_v15 = vld [vmem:[#allocation21_spill] sm:$0xff]  ;;  %v958_v38 = vmul.f32 0.5, %v854_v43 }
 0x21e   : > { %v1151_v33 = vadd.f32 1.0, %v2598_v16  ;;  %2607 = verf.f32 %v1024_v46  ;;  %v1281_v19 = vmul.f32 %v1215_v34, %v4175_v36  ;;  %v4183_v36 = vld [vmem:[#allocation24_spill] sm:$0xff] }
 0x21f   : > { %v1216_v21 = vmul.f32 %v1150_v61, %v951_v20  ;;  %2609 = verf.f32 %v1025_v39  ;;  %v858_v52 = vpop.f32.mrb[82].mxu1 }
 0x220   : > { %v2600_v51 = vpop.eup %2599  ;;  %v1217_v59 = vmul.f32 %v1151_v33, %v952_v23  ;;  %v1026_v37 = vmul.f32 0.70710677, %v858_v52  ;;  %v860_v48 = vpop.f32.mrb[83].mxu1  ;;  %1499 = vmatprep.mubr.f32.mxu0 %v1281_v19  ;;  %v959_v3 = vmul.f32 0.5, %v858_v52 }
 0x221   : > { %v2602_v11 = vpop.eup %2601  ;;  %v1152_v41 = vadd.f32 1.0, %v2600_v51  ;;  %v1027_v22 = vmul.f32 0.70710677, %v860_v48  ;;  %1500 = vmatmul.mubr.f32.gmra.mrb[70].mxu0 %v1280_v30  ;;  %v1282_v9 = vmul.f32 %v1216_v21, %v4176_v49  ;;  %v4182_v30 = vld [vmem:[#allocation23_spill] sm:$0xff]  ;;  %v960_v43 = vmul.f32 0.5, %v860_v48 }
 0x222   : > { %v1153_v53 = vadd.f32 1.0, %v2602_v11  ;;  %2611 = verf.f32 %v1026_v37  ;;  %v1283_v24 = vmul.f32 %v1217_v59, %v4177_v1  ;;  %v4185_v1 = vld [vmem:[#allocation26_spill] sm:$0xff] }
 0x223   : > { %v1218_v26 = vmul.f32 %v1152_v41, %v953_v57  ;;  %2613 = verf.f32 %v1027_v22  ;;  %v864_v47 = vpop.f32.mrb[84].mxu1 }
 0x224   : > { %v2604_v56 = vpop.eup %2603  ;;  %v1219_v40 = vmul.f32 %v1153_v53, %v954_v44  ;;  %v1028_v4 = vmul.f32 0.70710677, %v864_v47  ;;  %v866_v6 = vpop.f32.mrb[85].mxu1  ;;  %1504 = vmatprep.mubr.f32.mxu0 %v1283_v24  ;;  %v961_v52 = vmul.f32 0.5, %v864_v47 }
 0x225   : > { %v2606_v13 = vpop.eup %2605  ;;  %v1154_v2 = vadd.f32 1.0, %v2604_v56  ;;  %v1029_v25 = vmul.f32 0.70710677, %v866_v6  ;;  %1505 = vmatmul.mubr.f32.gmra.mrb[72].mxu0 %v1282_v9  ;;  %v1284_v50 = vmul.f32 %v1218_v26, %v4178_v14  ;;  %v4184_v9 = vld [vmem:[#allocation25_spill] sm:$0xff]  ;;  %v962_v48 = vmul.f32 0.5, %v866_v6 }
 0x226   : > { %v1155_v12 = vadd.f32 1.0, %v2606_v13  ;;  %2615 = verf.f32 %v1028_v4  ;;  %v1285_v54 = vmul.f32 %v1219_v40, %v4179_v29  ;;  %v4187_v29 = vld [vmem:[#allocation28_spill] sm:$0xff] }
 0x227   : > { %v1220_v42 = vmul.f32 %v1154_v2, %v955_v8  ;;  %2617 = verf.f32 %v1029_v25  ;;  %v870_v7 = vpop.f32.mrb[86].mxu1 }
 0x228   : > { %v2608_v62 = vpop.eup %2607  ;;  %v1221_v17 = vmul.f32 %v1155_v12, %v956_v27  ;;  %v1030_v5 = vmul.f32 0.70710677, %v870_v7  ;;  %v872_v10 = vpop.f32.mrb[87].mxu1  ;;  %1509 = vmatprep.mubr.f32.mxu0 %v1285_v54  ;;  %v963_v47 = vmul.f32 0.5, %v870_v7 }
 0x229   : > { %v2610_v63 = vpop.eup %2609  ;;  %v1156_v0 = vadd.f32 1.0, %v2608_v62  ;;  %v1031_v58 = vmul.f32 0.70710677, %v872_v10  ;;  %1510 = vmatmul.mubr.f32.gmra.mrb[74].mxu0 %v1284_v50  ;;  %v1286_v31 = vmul.f32 %v1220_v42, %v4180_v15  ;;  %v4186_v50 = vld [vmem:[#allocation27_spill] sm:$0xff]  ;;  %v964_v6 = vmul.f32 0.5, %v872_v10 }
 0x22a   : > { %v1157_v28 = vadd.f32 1.0, %v2610_v63  ;;  %2619 = verf.f32 %v1030_v5  ;;  %v1287_v45 = vmul.f32 %v1221_v17, %v4181_v60  ;;  %v4189_v60 = vld [vmem:[#allocation30_spill] sm:$0xff] }
 0x22b   : > { %v1222_v18 = vmul.f32 %v1156_v0, %v957_v55  ;;  %2621 = verf.f32 %v1031_v58  ;;  %v876_v35 = vpop.f32.mrb[88].mxu1 }
 0x22c   : > { %v2612_v34 = vpop.eup %2611  ;;  %v1223_v46 = vmul.f32 %v1157_v28, %v958_v38  ;;  %v1032_v16 = vmul.f32 0.70710677, %v876_v35  ;;  %v878_v20 = vpop.f32.mrb[89].mxu1  ;;  %1514 = vmatprep.mubr.f32.mxu0 %v1287_v45  ;;  %v965_v7 = vmul.f32 0.5, %v876_v35 }
 0x22d   : > { %v2614_v61 = vpop.eup %2613  ;;  %v1158_v39 = vadd.f32 1.0, %v2612_v34  ;;  %v1033_v32 = vmul.f32 0.70710677, %v878_v20  ;;  %1515 = vmatmul.mubr.f32.gmra.mrb[76].mxu0 %v1286_v31  ;;  %v1288_v23 = vmul.f32 %v1222_v18, %v4182_v30  ;;  %v4188_v31 = vld [vmem:[#allocation29_spill] sm:$0xff]  ;;  %v966_v10 = vmul.f32 0.5, %v878_v20 }
 0x22e   : > { %v1159_v33 = vadd.f32 1.0, %v2614_v61  ;;  %2623 = verf.f32 %v1032_v16  ;;  %v1289_v19 = vmul.f32 %v1223_v46, %v4183_v36  ;;  %v4191_v36 = vld [vmem:[#allocation32_spill] sm:$0xff] }
 0x22f   : > { %v1224_v21 = vmul.f32 %v1158_v39, %v959_v3  ;;  %2625 = verf.f32 %v1033_v32  ;;  %v882_v51 = vpop.f32.mrb[90].mxu1 }
 0x230   : > { %v2616_v59 = vpop.eup %2615  ;;  %v1225_v37 = vmul.f32 %v1159_v33, %v960_v43  ;;  %v1034_v11 = vmul.f32 0.70710677, %v882_v51  ;;  %v884_v57 = vpop.f32.mrb[91].mxu1  ;;  %1519 = vmatprep.mubr.f32.mxu0 %v1289_v19  ;;  %v967_v35 = vmul.f32 0.5, %v882_v51 }
 0x231   : > { %v2618_v41 = vpop.eup %2617  ;;  %v1160_v22 = vadd.f32 1.0, %v2616_v59  ;;  %v1035_v49 = vmul.f32 0.70710677, %v884_v57  ;;  %1520 = vmatmul.mubr.f32.gmra.mrb[78].mxu0 %v1288_v23  ;;  %v1290_v44 = vmul.f32 %v1224_v21, %v4184_v9  ;;  %v4190_v23 = vld [vmem:[#allocation31_spill] sm:$0xff]  ;;  %v968_v20 = vmul.f32 0.5, %v884_v57 }
 0x232   : > { %v1161_v53 = vadd.f32 1.0, %v2618_v41  ;;  %2627 = verf.f32 %v1034_v11  ;;  %v1291_v24 = vmul.f32 %v1225_v37, %v4185_v1  ;;  %v4193_v1 = vld [vmem:[#allocation34_spill] sm:$0xff] }
 0x233   : > { %v1226_v26 = vmul.f32 %v1160_v22, %v961_v52  ;;  %2629 = verf.f32 %v1035_v49  ;;  %v888_v56 = vpop.f32.mrb[92].mxu1 }
 0x234   : > { %v2620_v40 = vpop.eup %2619  ;;  %v1227_v4 = vmul.f32 %v1161_v53, %v962_v48  ;;  %v1036_v13 = vmul.f32 0.70710677, %v888_v56  ;;  %v890_v8 = vpop.f32.mrb[93].mxu1  ;;  %1524 = vmatprep.mubr.f32.mxu0 %v1291_v24  ;;  %v969_v51 = vmul.f32 0.5, %v888_v56  ;;  %v4194_v56 = vld [vmem:[#allocation35_spill] sm:$0xff] }
 0x235   : > { %v2622_v2 = vpop.eup %2621  ;;  %v1162_v25 = vadd.f32 1.0, %v2620_v40  ;;  %v1037_v14 = vmul.f32 0.70710677, %v890_v8  ;;  %1525 = vmatmul.mubr.f32.gmra.mrb[80].mxu0 %v1290_v44  ;;  %v1292_v27 = vmul.f32 %v1226_v26, %v4186_v50  ;;  %v4192_v44 = vld [vmem:[#allocation33_spill] sm:$0xff]  ;;  %v970_v57 = vmul.f32 0.5, %v890_v8 }
 0x236   : > { %v1163_v12 = vadd.f32 1.0, %v2622_v2  ;;  %2631 = verf.f32 %v1036_v13  ;;  %v1293_v54 = vmul.f32 %v1227_v4, %v4187_v29 }
 0x237   : > { %v1228_v42 = vmul.f32 %v1162_v25, %v963_v47  ;;  %2633 = verf.f32 %v1037_v14  ;;  %v894_v62 = vpop.f32.mrb[94].mxu1 }
 0x238   : > { %v2624_v17 = vpop.eup %2623  ;;  %v1229_v5 = vmul.f32 %v1163_v12, %v964_v6  ;;  %v1038_v63 = vmul.f32 0.70710677, %v894_v62  ;;  %v896_v55 = vpop.f32.mrb[95].mxu1  ;;  %1529 = vmatprep.mubr.f32.mxu0 %v1293_v54  ;;  %v971_v2 = vmul.f32 0.5, %v894_v62 }
 0x239   : > { %v2626_v0 = vpop.eup %2625  ;;  %v1164_v58 = vadd.f32 1.0, %v2624_v17  ;;  %v1039_v15 = vmul.f32 0.70710677, %v896_v55  ;;  %1530 = vmatmul.mubr.f32.gmra.mrb[82].mxu0 %v1292_v27  ;;  %v1294_v38 = vmul.f32 %v1228_v42, %v4188_v31  ;;  %v972_v14 = vmul.f32 0.5, %v896_v55  ;;  %v4195_v27 = vld [vmem:[#allocation36_spill] sm:$0xff] }
 0x23a   : > { %v1165_v28 = vadd.f32 1.0, %v2626_v0  ;;  %2635 = verf.f32 %v1038_v63  ;;  %v1295_v45 = vmul.f32 %v1229_v5, %v4189_v60  ;;  %v4196_v5 = vld [vmem:[#allocation37_spill] sm:$0xff]  ;;  %v4198_v60 = vld [vmem:[#allocation39_spill] sm:$0xff] }
 0x23b   : > { %v1230_v18 = vmul.f32 %v1164_v58, %v965_v7  ;;  %2637 = verf.f32 %v1039_v15  ;;  %v900_v34 = vpop.f32.mrb[96].mxu1  ;;  %v4197_v7 = vld [vmem:[#allocation38_spill] sm:$0xff] }
 0x23c   : > { %v2628_v46 = vpop.eup %2627  ;;  %v1231_v16 = vmul.f32 %v1165_v28, %v966_v10  ;;  %v1040_v61 = vmul.f32 0.70710677, %v900_v34  ;;  %v902_v3 = vpop.f32.mrb[97].mxu1  ;;  %1534 = vmatprep.mubr.f32.mxu0 %v1295_v45  ;;  %v973_v42 = vmul.f32 0.5, %v900_v34 }
 0x23d   : > { %v2630_v39 = vpop.eup %2629  ;;  %v1166_v32 = vadd.f32 1.0, %v2628_v46  ;;  %v1041_v30 = vmul.f32 0.70710677, %v902_v3  ;;  %1535 = vmatmul.mubr.f32.gmra.mrb[84].mxu0 %v1294_v38  ;;  %v1296_v43 = vmul.f32 %v1230_v18, %v4190_v23  ;;  %v974_v0 = vmul.f32 0.5, %v902_v3  ;;  %v4199_v46 = vld [vmem:[#allocation40_spill] sm:$0xff] }
 0x23e   : > { %v1167_v33 = vadd.f32 1.0, %v2630_v39  ;;  %2639 = verf.f32 %v1040_v61  ;;  %v1297_v19 = vmul.f32 %v1231_v16, %v4191_v36  ;;  %v4200_v39 = vld [vmem:[#allocation41_spill] sm:$0xff] }
 0x23f   : > { %v1232_v21 = vmul.f32 %v1166_v32, %v967_v35  ;;  %2641 = verf.f32 %v1041_v30  ;;  %v906_v59 = vpop.f32.mrb[98].mxu1  ;;  %v4201_v32 = vld [vmem:[#allocation42_spill] sm:$0xff] }
 0x240   : > { %v2632_v37 = vpop.eup %2631  ;;  %v1233_v11 = vmul.f32 %v1167_v33, %v968_v20  ;;  %v1042_v41 = vmul.f32 0.70710677, %v906_v59  ;;  %v908_v52 = vpop.f32.mrb[99].mxu1  ;;  %1539 = vmatprep.mubr.f32.mxu0 %v1297_v19  ;;  %v975_v10 = vmul.f32 0.5, %v906_v59 }
 0x241   : > { %v2634_v22 = vpop.eup %2633  ;;  %v1168_v49 = vadd.f32 1.0, %v2632_v37  ;;  %v1043_v9 = vmul.f32 0.70710677, %v908_v52  ;;  %1540 = vmatmul.mubr.f32.gmra.mrb[86].mxu0 %v1296_v43  ;;  %v1298_v48 = vmul.f32 %v1232_v21, %v4192_v44  ;;  %v976_v18 = vmul.f32 0.5, %v908_v52  ;;  %v2713_v43 = vld [vmem:[%s3123_s16] sm:$0xff]  ;;  %v2714_v21 = vld [vmem:[%s3123_s16 + $0x8] sm:$0xff] }
 0x242   : > { %v1169_v53 = vadd.f32 1.0, %v2634_v22  ;;  %2643 = verf.f32 %v1042_v41  ;;  %v1299_v24 = vmul.f32 %v1233_v11, %v4193_v1  ;;  %v2715_v41 = vld [vmem:[%s3123_s16 + $0x10] sm:$0xff] }
 0x243   : > { %v1234_v26 = vmul.f32 %v1168_v49, %v969_v51  ;;  %2645 = verf.f32 %v1043_v9  ;;  %v2716_v9 = vld [vmem:[%s3123_s16 + $0x18] sm:$0xff] }
 0x244   : > { %v2636_v40 = vpop.eup %2635  ;;  %v1235_v4 = vmul.f32 %v1169_v53, %v970_v57  ;;  %1544 = vmatprep.mubr.f32.mxu0 %v1299_v24  ;;  %v2717_v24 = vld [vmem:[%s3123_s16 + $0x20] sm:$0xff] }
 0x245   : > { %v2638_v13 = vpop.eup %2637  ;;  %v1170_v47 = vadd.f32 1.0, %v2636_v40  ;;  %1545 = vmatmul.mubr.f32.gmra.mrb[88].mxu0 %v1298_v48  ;;  %v1300_v25 = vmul.f32 %v1234_v26, %v4194_v56 }
 0x246   : > { %v1171_v50 = vadd.f32 1.0, %v2638_v13  ;;  %v1301_v6 = vmul.f32 %v1235_v4, %v4195_v27  ;;  %v2718_v13 = vld [vmem:[%s3123_s16 + $0x28] sm:$0xff] }
 0x247   : > { %v1236_v8 = vmul.f32 %v1170_v47, %v971_v2 }
 0x248   : > { %v2640_v12 = vpop.eup %2639  ;;  %v1237_v29 = vmul.f32 %v1171_v50, %v972_v14  ;;  %1549 = vmatprep.mubr.f32.mxu0 %v1301_v6  ;;  %v2719_v50 = vld [vmem:[%s3123_s16 + $0x30] sm:$0xff] }
 0x249   : > { %v2642_v54 = vpop.eup %2641  ;;  %v1172_v17 = vadd.f32 1.0, %v2640_v12  ;;  %1550 = vmatmul.mubr.f32.gmra.mrb[90].mxu0 %v1300_v25  ;;  %v1302_v63 = vmul.f32 %v1236_v8, %v4196_v5  ;;  %v2720_v12 = vld [vmem:[%s3123_s16 + $0x38] sm:$0xff] }
 0x24a   : > { %v1173_v62 = vadd.f32 1.0, %v2642_v54  ;;  %v1303_v58 = vmul.f32 %v1237_v29, %v4197_v7 }
 0x24b   : > { %v1238_v15 = vmul.f32 %v1172_v17, %v973_v42 }
 0x24c   : > { %v2644_v31 = vpop.eup %2643  ;;  %v1239_v55 = vmul.f32 %v1173_v62, %v974_v0  ;;  %1554 = vmatprep.mubr.f32.mxu0 %v1303_v58  ;;  %v2722_v58 = vld [vmem:[%s3123_s16 + $0x48] sm:$0xff] }
 0x24d   : > { %v2646_v38 = vpop.eup %2645  ;;  %v1174_v28 = vadd.f32 1.0, %v2644_v31  ;;  %1555 = vmatmul.mubr.f32.gmra.mrb[92].mxu0 %v1302_v63  ;;  %v1304_v45 = vmul.f32 %v1238_v15, %v4198_v60  ;;  %v2721_v63 = vld [vmem:[%s3123_s16 + $0x40] sm:$0xff] }
 0x24e   : > { %v1175_v34 = vadd.f32 1.0, %v2646_v38  ;;  %v1305_v16 = vmul.f32 %v1239_v55, %v4199_v46 }
 0x24f   : > { %v1240_v61 = vmul.f32 %v1174_v28, %v975_v10  ;;  %v2723_v28 = vld [vmem:[%s3123_s16 + $0x50] sm:$0xff] }
 0x250   : > { %v1241_v3 = vmul.f32 %v1175_v34, %v976_v18  ;;  %1559 = vmatprep.mubr.f32.mxu0 %v1305_v16  ;;  %v2724_v34 = vld [vmem:[%s3123_s16 + $0x58] sm:$0xff] }
 0x251   : > { %1560 = vmatmul.mubr.f32.gmra.mrb[94].mxu0 %v1304_v45  ;;  %v1306_v35 = vmul.f32 %v1240_v61, %v4200_v39 }
 0x252   : > { %v1307_v30 = vmul.f32 %v1241_v3, %v4201_v32 }
 0x254   : > { %1564 = vmatprep.mubr.f32.mxu0 %v1307_v30 }
 0x255   : > { %1565 = vmatmul.mubr.f32.gmra.mrb[96].mxu0 %v1306_v35  ;;  %v2725_v35 = vld [vmem:[%s3123_s16 + $0x60] sm:$0xff] }
 0x2a8   : > { %v1406_v23 = vpop.f32.mrb[32].mxu0 }
 0x2a9   : > { %v3575_v20 = vadd.f32 %v2713_v43, %v1406_v23  ;;  %v1408_v33 = vpop.f32.mrb[33].mxu0  ;;  %v2726_v43 = vld [vmem:[%s3123_s16 + $0x68] sm:$0xff] }
 0x2ab   : > { %1605 = vadd.xlane.f32.xlu0 %v3575_v20  ;;  %v1705_v36 = vmul.f32 %v3575_v20, %v3575_v20 }
 0x2ac   : > { %v1411_v19 = vpop.f32.mrb[34].mxu0 }
 0x2ad   : > { %v3581_v59 = vadd.f32 %v2714_v21, %v1411_v19  ;;  %1738 = vadd.xlane.f32.xlu1 %v1705_v36  ;;  %v1413_v37 = vpop.f32.mrb[35].mxu0 }
 0x2af   : > { %1607 = vadd.xlane.f32.xlu0 %v3581_v59  ;;  %v1706_v51 = vmul.f32 %v3581_v59, %v3581_v59 }
 0x2b0   : > { %v1416_v11 = vpop.f32.mrb[36].mxu0 }
 0x2b1   : > { %v3585_v52 = vadd.f32 %v2715_v41, %v1416_v11  ;;  %v1418_v22 = vpop.f32.mrb[37].mxu0  ;;  %v2727_v11 = vld [vmem:[%s3123_s16 + $0x70] sm:$0xff] }
 0x2b3   : > { %1740 = vadd.xlane.f32.xlu0 %v1706_v51  ;;  %1609 = vadd.xlane.f32.xlu1 %v3585_v52  ;;  %v1707_v57 = vmul.f32 %v3585_v52, %v3585_v52 }
 0x2b4   : > { %v1421_v49 = vpop.f32.mrb[38].mxu0 }
 0x2b5   : > { %v3591_v44 = vadd.f32 %v2716_v9, %v1421_v49  ;;  %v1423_v48 = vpop.f32.mrb[39].mxu0  ;;  %v2728_v49 = vld [vmem:[%s3123_s16 + $0x78] sm:$0xff] }
 0x2b7   : > { %1742 = vadd.xlane.f32.xlu1 %v1707_v57  ;;  %v1708_v53 = vmul.f32 %v3591_v44, %v3591_v44 }
 0x2b8   : > { %v1426_v1 = vpop.f32.mrb[40].mxu0 }
 0x2b9   : > { %v3598_v26 = vadd.f32 %v2717_v24, %v1426_v1  ;;  %1744 = vadd.xlane.f32.xlu0 %v1708_v53  ;;  %v1428_v40 = vpop.f32.mrb[41].mxu0  ;;  %v2729_v24 = vld [vmem:[%s3123_s16 + $0x80] sm:$0xff] }
 0x2bb   : > { %1611 = vadd.xlane.f32.xlu1 %v3591_v44  ;;  %v1709_v56 = vmul.f32 %v3598_v26, %v3598_v26 }
 0x2bc   : > { %v1431_v4 = vpop.f32.mrb[42].mxu0 }
 0x2bd   : > { %v3602_v2 = vadd.f32 %v2718_v13, %v1431_v4  ;;  %1613 = vadd.xlane.f32.xlu0 %v3598_v26  ;;  %v1433_v47 = vpop.f32.mrb[43].mxu0 }
 0x2be   : > { %v2730_v47 = vld [vmem:[%s3123_s16 + $0x88] sm:$0xff] }
 0x2bf   : > { %1746 = vadd.xlane.f32.xlu1 %v1709_v56  ;;  %v1710_v25 = vmul.f32 %v3602_v2, %v3602_v2 }
 0x2c0   : > { %v1436_v14 = vpop.f32.mrb[44].mxu0 }
 0x2c1   : > { %v3610_v27 = vadd.f32 %v2719_v50, %v1436_v14  ;;  %1748 = vadd.xlane.f32.xlu0 %v1710_v25  ;;  %v1438_v6 = vpop.f32.mrb[45].mxu0 }
 0x2c3   : > { %1615 = vadd.xlane.f32.xlu1 %v3602_v2  ;;  %v1711_v42 = vmul.f32 %v3610_v27, %v3610_v27 }
 0x2c4   : > { %v1441_v8 = vpop.f32.mrb[46].mxu0 }
 0x2c5   : > { %v3614_v29 = vadd.f32 %v2720_v12, %v1441_v8  ;;  %1617 = vadd.xlane.f32.xlu0 %v3610_v27  ;;  %v1443_v54 = vpop.f32.mrb[47].mxu0  ;;  %v2731_v8 = vld [vmem:[%s3123_s16 + $0x90] sm:$0xff] }
 0x2c7   : > { %1750 = vadd.xlane.f32.xlu1 %v1711_v42  ;;  %v1712_v17 = vmul.f32 %v3614_v29, %v3614_v29 }
 0x2c8   : > { %v1446_v5 = vpop.f32.mrb[48].mxu0 }
 0x2c9   : > { %v3622_v0 = vadd.f32 %v2721_v63, %v1446_v5  ;;  %1752 = vadd.xlane.f32.xlu0 %v1712_v17  ;;  %v1448_v62 = vpop.f32.mrb[49].mxu0  ;;  %v2732_v17 = vld [vmem:[%s3123_s16 + $0x98] sm:$0xff] }
 0x2cb   : > { %1619 = vadd.xlane.f32.xlu1 %v3614_v29  ;;  %v1713_v55 = vmul.f32 %v3622_v0, %v3622_v0 }
 0x2cc   : > { %v1451_v7 = vpop.f32.mrb[50].mxu0 }
 0x2cd   : > { %v3626_v15 = vadd.f32 %v2722_v58, %v1451_v7  ;;  %1621 = vadd.xlane.f32.xlu0 %v3622_v0  ;;  %v1453_v31 = vpop.f32.mrb[51].mxu0 }
 0x2ce   : > { %v2733_v31 = vld [vmem:[%s3123_s16 + $0xa0] sm:$0xff] }
 0x2cf   : > { %1754 = vadd.xlane.f32.xlu1 %v1713_v55  ;;  %v1714_v38 = vmul.f32 %v3626_v15, %v3626_v15 }
 0x2d0   : > { %v1456_v10 = vpop.f32.mrb[52].mxu0 }
 0x2d1   : > { %v3634_v60 = vadd.f32 %v2723_v28, %v1456_v10  ;;  %1756 = vadd.xlane.f32.xlu0 %v1714_v38  ;;  %v1458_v45 = vpop.f32.mrb[53].mxu0  ;;  %v2734_v28 = vld [vmem:[%s3123_s16 + $0xa8] sm:$0xff] }
 0x2d3   : > { %1623 = vadd.xlane.f32.xlu1 %v3626_v15  ;;  %v1715_v61 = vmul.f32 %v3634_v60, %v3634_v60 }
 0x2d4   : > { %v1461_v18 = vpop.f32.mrb[54].mxu0 }
 0x2d5   : > { %v3638_v46 = vadd.f32 %v2724_v34, %v1461_v18  ;;  %1625 = vadd.xlane.f32.xlu0 %v3634_v60  ;;  %v1463_v16 = vpop.f32.mrb[55].mxu0 }
 0x2d7   : > { %1758 = vadd.xlane.f32.xlu1 %v1715_v61  ;;  %v1716_v3 = vmul.f32 %v3638_v46, %v3638_v46 }
 0x2d8   : > { %v1466_v39 = vpop.f32.mrb[56].mxu0 }
 0x2d9   : > { %v3646_v32 = vadd.f32 %v2725_v35, %v1466_v39  ;;  %1760 = vadd.xlane.f32.xlu0 %v1716_v3  ;;  %v1468_v30 = vpop.f32.mrb[57].mxu0  ;;  %v2735_v3 = vld [vmem:[%s3123_s16 + $0xb0] sm:$0xff] }
 0x2db   : > { %1627 = vadd.xlane.f32.xlu1 %v3638_v46  ;;  %v1717_v19 = vmul.f32 %v3646_v32, %v3646_v32 }
 0x2dc   : > { %v1471_v23 = vpop.f32.mrb[58].mxu0 }
 0x2dd   : > { %v3650_v33 = vadd.f32 %v2726_v43, %v1471_v23  ;;  %1629 = vadd.xlane.f32.xlu0 %v3646_v32  ;;  %v1473_v36 = vpop.f32.mrb[59].mxu0  ;;  %v2736_v23 = vld [vmem:[%s3123_s16 + $0xb8] sm:$0xff] }
 0x2df   : > { %1762 = vadd.xlane.f32.xlu1 %v1717_v19  ;;  %v1718_v21 = vmul.f32 %v3650_v33, %v3650_v33 }
 0x2e0   : > { %v1476_v37 = vpop.f32.mrb[60].mxu0 }
 0x2e1   : > { %v3658_v41 = vadd.f32 %v2727_v11, %v1476_v37  ;;  %1764 = vadd.xlane.f32.xlu0 %v1718_v21  ;;  %v1478_v22 = vpop.f32.mrb[61].mxu0  ;;  %v2737_v11 = vld [vmem:[%s3123_s16 + $0xc0] sm:$0xff] }
 0x2e3   : > { %1631 = vadd.xlane.f32.xlu1 %v3650_v33  ;;  %v1719_v57 = vmul.f32 %v3658_v41, %v3658_v41 }
 0x2e4   : > { %v1481_v51 = vpop.f32.mrb[62].mxu0 }
 0x2e5   : > { %v3662_v9 = vadd.f32 %v2728_v49, %v1481_v51  ;;  %1633 = vadd.xlane.f32.xlu0 %v3658_v41  ;;  %v1483_v48 = vpop.f32.mrb[63].mxu0 }
 0x2e6   : > { %v2738_v48 = vld [vmem:[%s3123_s16 + $0xc8] sm:$0xff] }
 0x2e7   : > { %1766 = vadd.xlane.f32.xlu1 %v1719_v57  ;;  %v1720_v53 = vmul.f32 %v3662_v9, %v3662_v9 }
 0x2e8   : > { %v1486_v1 = vpop.f32.mrb[64].mxu0 }
 0x2e9   : > { %v3670_v40 = vadd.f32 %v2729_v24, %v1486_v1  ;;  %1768 = vadd.xlane.f32.xlu0 %v1720_v53  ;;  %v1488_v4 = vpop.f32.mrb[65].mxu0 }
 0x2eb   : > { %1635 = vadd.xlane.f32.xlu1 %v3662_v9  ;;  %v1721_v14 = vmul.f32 %v3670_v40, %v3670_v40 }
 0x2ec   : > { %v1491_v13 = vpop.f32.mrb[66].mxu0 }
 0x2ed   : > { %v3674_v56 = vadd.f32 %v2730_v47, %v1491_v13  ;;  %1637 = vadd.xlane.f32.xlu0 %v3670_v40  ;;  %v1493_v25 = vpop.f32.mrb[67].mxu0  ;;  %v2739_v13 = vld [vmem:[%s3123_s16 + $0xd0] sm:$0xff] }
 0x2ef   : > { %1770 = vadd.xlane.f32.xlu1 %v1721_v14  ;;  %v1722_v50 = vmul.f32 %v3674_v56, %v3674_v56 }
 0x2f0   : > { %v1496_v6 = vpop.f32.mrb[68].mxu0 }
 0x2f1   : > { %v3682_v12 = vadd.f32 %v2731_v8, %v1496_v6  ;;  %1772 = vadd.xlane.f32.xlu0 %v1722_v50  ;;  %v1498_v54 = vpop.f32.mrb[69].mxu0  ;;  %v2740_v50 = vld [vmem:[%s3123_s16 + $0xd8] sm:$0xff] }
 0x2f3   : > { %1639 = vadd.xlane.f32.xlu1 %v3674_v56  ;;  %v1723_v62 = vmul.f32 %v3682_v12, %v3682_v12 }
 0x2f4   : > { %v1501_v42 = vpop.f32.mrb[70].mxu0 }
 0x2f5   : > { %v3686_v5 = vadd.f32 %v2732_v17, %v1501_v42  ;;  %1641 = vadd.xlane.f32.xlu0 %v3682_v12  ;;  %v1503_v63 = vpop.f32.mrb[71].mxu0 }
 0x2f6   : > { %v2741_v63 = vld [vmem:[%s3123_s16 + $0xe0] sm:$0xff] }
 0x2f7   : > { %1774 = vadd.xlane.f32.xlu1 %v1723_v62  ;;  %v1724_v7 = vmul.f32 %v3686_v5, %v3686_v5 }
 0x2f8   : > { %v1506_v58 = vpop.f32.mrb[72].mxu0 }
 0x2f9   : > { %v3694_v55 = vadd.f32 %v2733_v31, %v1506_v58  ;;  %1776 = vadd.xlane.f32.xlu0 %v1724_v7  ;;  %v1508_v38 = vpop.f32.mrb[73].mxu0  ;;  %v2742_v31 = vld [vmem:[%s3123_s16 + $0xe8] sm:$0xff] }
 0x2fb   : > { %1643 = vadd.xlane.f32.xlu1 %v3686_v5  ;;  %v1725_v34 = vmul.f32 %v3694_v55, %v3694_v55 }
 0x2fc   : > { %v1511_v10 = vpop.f32.mrb[74].mxu0 }
 0x2fd   : > { %v3698_v45 = vadd.f32 %v2734_v28, %v1511_v10  ;;  %1645 = vadd.xlane.f32.xlu0 %v3694_v55  ;;  %v1513_v18 = vpop.f32.mrb[75].mxu0 }
 0x2ff   : > { %1778 = vadd.xlane.f32.xlu1 %v1725_v34  ;;  %v1726_v16 = vmul.f32 %v3698_v45, %v3698_v45 }
 0x300   : > { %v1516_v61 = vpop.f32.mrb[76].mxu0 }
 0x301   : > { %v3706_v39 = vadd.f32 %v2735_v3, %v1516_v61  ;;  %1780 = vadd.xlane.f32.xlu0 %v1726_v16  ;;  %v1518_v35 = vpop.f32.mrb[77].mxu0  ;;  %v2743_v16 = vld [vmem:[%s3123_s16 + $0xf0] sm:$0xff] }
 0x303   : > { %1647 = vadd.xlane.f32.xlu1 %v3698_v45  ;;  %v1727_v19 = vmul.f32 %v3706_v39, %v3706_v39 }
 0x304   : > { %v1521_v30 = vpop.f32.mrb[78].mxu0 }
 0x305   : > { %v3710_v43 = vadd.f32 %v2736_v23, %v1521_v30  ;;  %1649 = vadd.xlane.f32.xlu0 %v3706_v39  ;;  %v1523_v36 = vpop.f32.mrb[79].mxu0 }
 0x307   : > { %1782 = vadd.xlane.f32.xlu1 %v1727_v19  ;;  %v1728_v21 = vmul.f32 %v3710_v43, %v3710_v43  ;;  %v2744_v19 = vld [vmem:[%s3123_s16 + $0xf8] sm:$0xff] }
 0x308   : > { %v1526_v37 = vpop.f32.mrb[80].mxu0 }
 0x309   : > { %v3718_v22 = vadd.f32 %v2737_v11, %v1526_v37  ;;  %1784 = vadd.xlane.f32.xlu0 %v1728_v21  ;;  %v1528_v51 = vpop.f32.mrb[81].mxu0  ;;  %v2745_v37 = vld [vmem:[%s3123_s16 + $0x100] sm:$0xff] }
 0x30b   : > { %1651 = vadd.xlane.f32.xlu1 %v3710_v43  ;;  %v1729_v1 = vmul.f32 %v3718_v22, %v3718_v22 }
 0x30c   : > { %v1531_v49 = vpop.f32.mrb[82].mxu0 }
 0x30d   : > { %v3722_v57 = vadd.f32 %v2738_v48, %v1531_v49  ;;  %1653 = vadd.xlane.f32.xlu0 %v3718_v22  ;;  %v1533_v53 = vpop.f32.mrb[83].mxu0 }
 0x30f   : > { %1786 = vadd.xlane.f32.xlu1 %v1729_v1  ;;  %v1730_v24 = vmul.f32 %v3722_v57, %v3722_v57 }
 0x310   : > { %v1536_v4 = vpop.f32.mrb[84].mxu0 }
 0x311   : > { %v3730_v47 = vadd.f32 %v2739_v13, %v1536_v4  ;;  %1788 = vadd.xlane.f32.xlu0 %v1730_v24  ;;  %v1538_v25 = vpop.f32.mrb[85].mxu0 }
 0x313   : > { %1655 = vadd.xlane.f32.xlu1 %v3722_v57  ;;  %v1731_v54 = vmul.f32 %v3730_v47, %v3730_v47 }
 0x314   : > { %v1541_v14 = vpop.f32.mrb[86].mxu0 }
 0x315   : > { %v3734_v6 = vadd.f32 %v2740_v50, %v1541_v14  ;;  %1657 = vadd.xlane.f32.xlu0 %v3730_v47  ;;  %v1543_v8 = vpop.f32.mrb[87].mxu0 }
 0x317   : > { %1790 = vadd.xlane.f32.xlu1 %v1731_v54  ;;  %v1732_v42 = vmul.f32 %v3734_v6, %v3734_v6 }
 0x318   : > { %v1546_v17 = vpop.f32.mrb[88].mxu0 }
 0x319   : > { %v3742_v62 = vadd.f32 %v2741_v63, %v1546_v17  ;;  %1792 = vadd.xlane.f32.xlu0 %v1732_v42  ;;  %v1548_v7 = vpop.f32.mrb[89].mxu0 }
 0x31b   : > { %1659 = vadd.xlane.f32.xlu1 %v3734_v6  ;;  %v1733_v28 = vmul.f32 %v3742_v62, %v3742_v62 }
 0x31c   : > { %v1551_v58 = vpop.f32.mrb[90].mxu0 }
 0x31d   : > { %v3746_v38 = vadd.f32 %v2742_v31, %v1551_v58  ;;  %1661 = vadd.xlane.f32.xlu0 %v3742_v62  ;;  %v1553_v10 = vpop.f32.mrb[91].mxu0 }
 0x31f   : > { %1794 = vadd.xlane.f32.xlu1 %v1733_v28  ;;  %v1734_v18 = vmul.f32 %v3746_v38, %v3746_v38 }
 0x320   : > { %v1556_v34 = vpop.f32.mrb[92].mxu0 }
 0x321   : > { %v3754_v61 = vadd.f32 %v2743_v16, %v1556_v34  ;;  %1796 = vadd.xlane.f32.xlu0 %v1734_v18  ;;  %v1558_v3 = vpop.f32.mrb[93].mxu0 }
 0x323   : > { %1663 = vadd.xlane.f32.xlu1 %v3746_v38  ;;  %v1735_v23 = vmul.f32 %v3754_v61, %v3754_v61 }
 0x324   : > { %v1561_v35 = vpop.f32.mrb[94].mxu0 }
 0x325   : > { %1665 = vadd.xlane.f32.xlu0 %v3754_v61  ;;  %v1563_v30 = vpop.f32.mrb[95].mxu0  ;;  %v3761_v21 = vadd.f32 %v2744_v19, %v1561_v35 }
 0x327   : > { %1798 = vadd.xlane.f32.xlu1 %v1735_v23  ;;  %v1736_v49 = vmul.f32 %v3761_v21, %v3761_v21 }
 0x328   : > { %v1566_v36 = vpop.f32.mrb[96].mxu0 }
 0x329   : > { %v3764_v11 = vadd.f32 %v2745_v37, %v1566_v36  ;;  %v1568_v51 = vpop.f32.mrb[97].mxu0 }
 0x32b   : > { %1667 = vadd.xlane.f32.xlu1 %v3761_v21  ;;  %1669 = vadd.xlane.f32.xlu0 %v3764_v11  ;;  %v1737_v48 = vmul.f32 %v3764_v11, %v3764_v11 }
 0x32f   : > { %1800 = vadd.xlane.f32.xlu0 %v1736_v49  ;;  %1802 = vadd.xlane.f32.xlu1 %v1737_v48 }
 0x338   : > { %v1606_v53 = vpop.xlane.xlu0 %1605 }
 0x339   : > { %v1672_v1 = vmul.f32 0.0078125, %v1606_v53 }
 0x33a   : > { %v1739_v24 = vpop.xlane.xlu1 %1738 }
 0x33b   : > { %v1837_v4 = vmul.f32 %v1672_v1, %v1672_v1  ;;  %v1804_v13 = vmul.f32 0.0078125, %v1739_v24  ;;  %v1936_v53 = vsub.f32 %v3575_v20, %v1672_v1 }
 0x33c   : > { %v1608_v25 = vpop.xlane.xlu0 %1607 }
 0x33d   : > { %v1870_v14 = vsub.f32 %v1804_v13, %v1837_v4  ;;  %v1673_v50 = vmul.f32 0.0078125, %v1608_v25  ;;  %v3782_v13 = vld [vmem:[%s4124_s3] ss:$0 sm:$0xff] }
 0x33f   : > { %v1903_v8 = vmax.f32 %v1870_v14, 0.0  ;;  %v1838_v63 = vmul.f32 %v1673_v50, %v1673_v50 }
 0x340   : > { %v1741_v54 = vpop.xlane.xlu0 %1740  ;;  %v1610_v42 = vpop.xlane.xlu1 %1609 }
 0x341   : > { %v1969_v17 = vadd.f32 1e-05, %v1903_v8  ;;  %v1805_v7 = vmul.f32 0.0078125, %v1741_v54  ;;  %v1674_v58 = vmul.f32 0.0078125, %v1610_v42 }
 0x343   : > { %2647 = vrsqrt.f32 %v1969_v17  ;;  %v1871_v31 = vsub.f32 %v1805_v7, %v1838_v63  ;;  %v1839_v18 = vmul.f32 %v1674_v58, %v1674_v58  ;;  %v3789_v17 = vld [vmem:[%s4125_s4] ss:$0 sm:$0xff] }
 0x344   : > { %v1743_v10 = vpop.xlane.xlu1 %1742 }
 0x345   : > { %v1904_v28 = vmax.f32 %v1871_v31, 0.0  ;;  %v1806_v34 = vmul.f32 0.0078125, %v1743_v10 }
 0x346   : > { %v1745_v16 = vpop.xlane.xlu0 %1744 }
 0x347   : > { %v1970_v3 = vadd.f32 1e-05, %v1904_v28  ;;  %v1872_v35 = vsub.f32 %v1806_v34, %v1839_v18  ;;  %v1807_v51 = vmul.f32 0.0078125, %v1745_v16  ;;  %v1937_v18 = vsub.f32 %v3581_v59, %v1673_v50 }
 0x348   : > { %v1612_v30 = vpop.xlane.xlu1 %1611 }
 0x349   : > { %2649 = vrsqrt.f32 %v1970_v3  ;;  %v1905_v23 = vmax.f32 %v1872_v35, 0.0  ;;  %v3772_v36 = vmul.f32 0.0078125, %v1612_v30 }
 0x34a   : > { %v1614_v19 = vpop.xlane.xlu0 %1613 }
 0x34b   : > { %v1971_v37 = vadd.f32 1e-05, %v1905_v23  ;;  %v1840_v49 = vmul.f32 %v3772_v36, %v3772_v36  ;;  %v3776_v48 = vmul.f32 0.0078125, %v1614_v19 }
 0x34c   : > { %v1747_v24 = vpop.xlane.xlu1 %1746 }
 0x34d   : > { %v2648_v4 = vpop.eup %2647  ;;  %2651 = vrsqrt.f32 %v1971_v37  ;;  %v1873_v25 = vsub.f32 %v1807_v51, %v1840_v49  ;;  %v1841_v14 = vmul.f32 %v3776_v48, %v3776_v48  ;;  %v1808_v54 = vmul.f32 0.0078125, %v1747_v24 }
 0x34e   : > { %v2035_v8 = vmul.f32 %v2648_v4, %v1936_v53  ;;  %v1749_v42 = vpop.xlane.xlu0 %1748  ;;  %v1938_v24 = vsub.f32 %v3585_v52, %v1674_v58 }
 0x34f   : > { %v1906_v20 = vmax.f32 %v1873_v25, 0.0  ;;  %v1874_v63 = vsub.f32 %v1808_v54, %v1841_v14  ;;  %v1809_v35 = vmul.f32 0.0078125, %v1749_v42 }
 0x350   : > { %v2074_v1 = vmul.f32 %v3782_v13, %v2035_v8  ;;  %v1616_v7 = vpop.xlane.xlu1 %1615 }
 0x351   : > { %v1972_v31 = vadd.f32 1e-05, %v1906_v20  ;;  %v3792_v10 = vmul.f32 0.0078125, %v1616_v7  ;;  %v1907_v34 = vmax.f32 %v1874_v63, 0.0 }
 0x352   : > { %v2113_v28 = vadd.f32 %v3789_v17, %v2074_v1  ;;  %v1618_v16 = vpop.xlane.xlu0 %1617 }
 0x353   : > { %v2650_v3 = vpop.eup %2649  ;;  %2653 = vrsqrt.f32 %v1972_v31  ;;  %v1842_v30 = vmul.f32 %v3792_v10, %v3792_v10  ;;  %v3798_v23 = vmul.f32 0.0078125, %v1618_v16  ;;  %v1973_v37 = vadd.f32 1e-05, %v1907_v34 }
 0x354   : > { %2146 = vst [vmem:[%s3802_s26] sm:$0xff] %v2113_v28  ;;  %v2036_v19 = vmul.f32 %v2650_v3, %v1937_v18  ;;  %v1751_v51 = vpop.xlane.xlu1 %1750  ;;  %v1939_v16 = vsub.f32 %v3591_v44, %v3772_v36 }
 0x355   : > { %v1875_v49 = vsub.f32 %v1809_v35, %v1842_v30  ;;  %v1843_v59 = vmul.f32 %v3798_v23, %v3798_v23  ;;  %v1810_v50 = vmul.f32 0.0078125, %v1751_v51  ;;  %2655 = vrsqrt.f32 %v1973_v37 }
 0x356   : > { %v2075_v53 = vmul.f32 %v3782_v13, %v2036_v19  ;;  %v1753_v4 = vpop.xlane.xlu0 %1752 }
 0x357   : > { %v2652_v25 = vpop.eup %2651  ;;  %v1908_v14 = vmax.f32 %v1875_v49, 0.0  ;;  %v1876_v8 = vsub.f32 %v1810_v50, %v1843_v59  ;;  %v1811_v58 = vmul.f32 0.0078125, %v1753_v4  ;;  %v1940_v50 = vsub.f32 %v3598_v26, %v3776_v48 }
 0x358   : > { %v2114_v54 = vadd.f32 %v3789_v17, %v2075_v53  ;;  %v2037_v42 = vmul.f32 %v2652_v25, %v1938_v24  ;;  %v1620_v20 = vpop.xlane.xlu1 %1619  ;;  %v1941_v48 = vsub.f32 %v3602_v2, %v3792_v10 }
 0x359   : > { %v1974_v1 = vadd.f32 1e-05, %v1908_v14  ;;  %v1909_v63 = vmax.f32 %v1876_v8, 0.0  ;;  %v3810_v7 = vmul.f32 0.0078125, %v1620_v20 }
 0x35a   : > { %2147 = vst [vmem:[%s3802_s26 + $0x8] sm:$0xff] %v2114_v54  ;;  %v2076_v31 = vmul.f32 %v3782_v13, %v2037_v42  ;;  %v1622_v28 = vpop.xlane.xlu0 %1621 }
 0x35b   : > { %2657 = vrsqrt.f32 %v1974_v1  ;;  %v1975_v52 = vadd.f32 1e-05, %v1909_v63  ;;  %v1844_v18 = vmul.f32 %v3810_v7, %v3810_v7  ;;  %v3819_v3 = vmul.f32 0.0078125, %v1622_v28 }
 0x35c   : > { %v2115_v34 = vadd.f32 %v3789_v17, %v2076_v31  ;;  %v1755_v35 = vpop.xlane.xlu1 %1754 }
 0x35d   : > { %v2654_v30 = vpop.eup %2653  ;;  %2659 = vrsqrt.f32 %v1975_v52  ;;  %v1877_v19 = vsub.f32 %v1811_v58, %v1844_v18  ;;  %v1812_v37 = vmul.f32 0.0078125, %v1755_v35  ;;  %v1845_v49 = vmul.f32 %v3819_v3, %v3819_v3 }
 0x35e   : > { %2148 = vst [vmem:[%s3802_s26 + $0x10] sm:$0xff] %v2115_v34  ;;  %v2038_v51 = vmul.f32 %v2654_v30, %v1939_v16  ;;  %v1757_v59 = vpop.xlane.xlu0 %1756  ;;  %v1942_v30 = vsub.f32 %v3610_v27, %v3798_v23 }
 0x35f   : > { %v1910_v53 = vmax.f32 %v1877_v19, 0.0  ;;  %v2656_v24 = vpop.eup %2655  ;;  %v1878_v36 = vsub.f32 %v1812_v37, %v1845_v49  ;;  %v1813_v63 = vmul.f32 0.0078125, %v1757_v59 }
 0x360   : > { %v2077_v44 = vmul.f32 %v3782_v13, %v2038_v51  ;;  %v1624_v4 = vpop.xlane.xlu1 %1623  ;;  %v2039_v25 = vmul.f32 %v2656_v24, %v1940_v50 }
 0x361   : > { %v1976_v14 = vadd.f32 1e-05, %v1910_v53  ;;  %v3827_v8 = vmul.f32 0.0078125, %v1624_v4  ;;  %v1911_v42 = vmax.f32 %v1878_v36, 0.0 }
 0x362   : > { %v2116_v54 = vadd.f32 %v3789_v17, %v2077_v44  ;;  %v1626_v20 = vpop.xlane.xlu0 %1625  ;;  %v2078_v1 = vmul.f32 %v3782_v13, %v2039_v25 }
 0x363   : > { %2661 = vrsqrt.f32 %v1976_v14  ;;  %v1846_v26 = vmul.f32 %v3827_v8, %v3827_v8  ;;  %v1977_v31 = vadd.f32 1e-05, %v1911_v42  ;;  %v3836_v28 = vmul.f32 0.0078125, %v1626_v20 }
 0x364   : > { %2149 = vst [vmem:[%s3802_s26 + $0x18] sm:$0xff] %v2116_v54  ;;  %v1759_v52 = vpop.xlane.xlu1 %1758  ;;  %v2117_v18 = vadd.f32 %v3789_v17, %v2078_v1  ;;  %v1943_v42 = vsub.f32 %v3614_v29, %v3810_v7 }
 0x365   : > { %v2658_v58 = vpop.eup %2657  ;;  %v1879_v34 = vsub.f32 %v1813_v63, %v1846_v26  ;;  %v1814_v16 = vmul.f32 0.0078125, %v1759_v52  ;;  %2663 = vrsqrt.f32 %v1977_v31  ;;  %v1847_v19 = vmul.f32 %v3836_v28, %v3836_v28 }
 0x366   : > { %v2040_v35 = vmul.f32 %v2658_v58, %v1941_v48  ;;  %v1761_v37 = vpop.xlane.xlu0 %1760  ;;  %2150 = vst [vmem:[%s3802_s26 + $0x20] sm:$0xff] %v2117_v18  ;;  %v1944_v18 = vsub.f32 %v3622_v0, %v3819_v3 }
 0x367   : > { %v2660_v51 = vpop.eup %2659  ;;  %v1912_v2 = vmax.f32 %v1879_v34, 0.0  ;;  %v1880_v59 = vsub.f32 %v1814_v16, %v1847_v19  ;;  %v1815_v4 = vmul.f32 0.0078125, %v1761_v37 }
 0x368   : > { %v2079_v10 = vmul.f32 %v3782_v13, %v2040_v35  ;;  %v2041_v49 = vmul.f32 %v2660_v51, %v1942_v30  ;;  %v1628_v50 = vpop.xlane.xlu1 %1627 }
 0x369   : > { %v1978_v53 = vadd.f32 1e-05, %v1912_v2  ;;  %v3845_v24 = vmul.f32 0.0078125, %v1628_v50  ;;  %v1913_v23 = vmax.f32 %v1880_v59, 0.0  ;;  %v1945_v50 = vsub.f32 %v3626_v15, %v3827_v8 }
 0x36a   : > { %v2118_v44 = vadd.f32 %v3789_v17, %v2079_v10  ;;  %v2080_v27 = vmul.f32 %v3782_v13, %v2041_v49  ;;  %v1630_v36 = vpop.xlane.xlu0 %1629 }
 0x36b   : > { %2665 = vrsqrt.f32 %v1978_v53  ;;  %v1848_v25 = vmul.f32 %v3845_v24, %v3845_v24  ;;  %v3851_v14 = vmul.f32 0.0078125, %v1630_v36  ;;  %v1979_v20 = vadd.f32 1e-05, %v1913_v23 }
 0x36c   : > { %2151 = vst [vmem:[%s3802_s26 + $0x28] sm:$0xff] %v2118_v44  ;;  %v2119_v54 = vadd.f32 %v3789_v17, %v2080_v27  ;;  %v1763_v1 = vpop.xlane.xlu1 %1762 }
 0x36d   : > { %v2662_v63 = vpop.eup %2661  ;;  %v1881_v26 = vsub.f32 %v1815_v4, %v1848_v25  ;;  %v1849_v48 = vmul.f32 %v3851_v14, %v3851_v14  ;;  %v1816_v31 = vmul.f32 0.0078125, %v1763_v1  ;;  %2667 = vrsqrt.f32 %v1979_v20 }
 0x36e   : > { %2152 = vst [vmem:[%s3802_s26 + $0x30] sm:$0xff] %v2119_v54  ;;  %v2042_v52 = vmul.f32 %v2662_v63, %v1943_v42  ;;  %v1765_v58 = vpop.xlane.xlu0 %1764  ;;  %v1946_v20 = vsub.f32 %v3634_v60, %v3836_v28  ;;  %v1947_v28 = vsub.f32 %v3638_v46, %v3845_v24 }
 0x36f   : > { %v1914_v34 = vmax.f32 %v1881_v26, 0.0  ;;  %v1882_v16 = vsub.f32 %v1816_v31, %v1849_v48  ;;  %v2664_v35 = vpop.eup %2663  ;;  %v1817_v10 = vmul.f32 0.0078125, %v1765_v58 }
 0x370   : > { %v2081_v29 = vmul.f32 %v3782_v13, %v2042_v52  ;;  %v1632_v7 = vpop.xlane.xlu1 %1631  ;;  %v2043_v30 = vmul.f32 %v2664_v35, %v1944_v18 }
 0x371   : > { %v1980_v19 = vadd.f32 1e-05, %v1914_v34  ;;  %v1915_v37 = vmax.f32 %v1882_v16, 0.0  ;;  %v3863_v51 = vmul.f32 0.0078125, %v1632_v7 }
 0x372   : > { %v2120_v2 = vadd.f32 %v3789_v17, %v2081_v29  ;;  %v1634_v49 = vpop.xlane.xlu0 %1633  ;;  %v2082_v59 = vmul.f32 %v3782_v13, %v2043_v30 }
 0x373   : > { %2669 = vrsqrt.f32 %v1980_v19  ;;  %v1981_v0 = vadd.f32 1e-05, %v1915_v37  ;;  %v1850_v3 = vmul.f32 %v3863_v51, %v3863_v51  ;;  %v3872_v53 = vmul.f32 0.0078125, %v1634_v49 }
 0x374   : > { %2153 = vst [vmem:[%s3802_s26 + $0x38] sm:$0xff] %v2120_v2  ;;  %v1767_v44 = vpop.xlane.xlu1 %1766  ;;  %v2121_v23 = vadd.f32 %v3789_v17, %v2082_v59  ;;  %v1948_v59 = vsub.f32 %v3646_v32, %v3851_v14 }
 0x375   : > { %v2666_v27 = vpop.eup %2665  ;;  %2671 = vrsqrt.f32 %v1981_v0  ;;  %v1883_v36 = vsub.f32 %v1817_v10, %v1850_v3  ;;  %v1818_v4 = vmul.f32 0.0078125, %v1767_v44  ;;  %v1851_v54 = vmul.f32 %v3872_v53, %v3872_v53 }
 0x376   : > { %v2044_v25 = vmul.f32 %v2666_v27, %v1945_v50  ;;  %v1769_v42 = vpop.xlane.xlu0 %1768  ;;  %2154 = vst [vmem:[%s3802_s26 + $0x40] sm:$0xff] %v2121_v23 }
 0x377   : > { %v1916_v15 = vmax.f32 %v1883_v36, 0.0  ;;  %v2668_v8 = vpop.eup %2667  ;;  %v1884_v63 = vsub.f32 %v1818_v4, %v1851_v54  ;;  %v1819_v35 = vmul.f32 0.0078125, %v1769_v42 }
 0x378   : > { %v2083_v1 = vmul.f32 %v3782_v13, %v2044_v25  ;;  %v1636_v26 = vpop.xlane.xlu1 %1635  ;;  %v2045_v48 = vmul.f32 %v2668_v8, %v1946_v20 }
 0x379   : > { %v1982_v31 = vadd.f32 1e-05, %v1916_v15  ;;  %v3881_v52 = vmul.f32 0.0078125, %v1636_v26  ;;  %v1917_v18 = vmax.f32 %v1884_v63, 0.0 }
 0x37a   : > { %v2122_v58 = vadd.f32 %v3789_v17, %v2083_v1  ;;  %v1638_v34 = vpop.xlane.xlu0 %1637  ;;  %v2084_v16 = vmul.f32 %v3782_v13, %v2045_v48  ;;  %v1949_v1 = vsub.f32 %v3650_v33, %v3863_v51 }
 0x37b   : > { %2673 = vrsqrt.f32 %v1982_v31  ;;  %v1852_v60 = vmul.f32 %v3881_v52, %v3881_v52  ;;  %v1983_v29 = vadd.f32 1e-05, %v1917_v18  ;;  %v3890_v7 = vmul.f32 0.0078125, %v1638_v34 }
 0x37c   : > { %2155 = vst [vmem:[%s3802_s26 + $0x48] sm:$0xff] %v2122_v58  ;;  %v1771_v30 = vpop.xlane.xlu1 %1770  ;;  %v2123_v37 = vadd.f32 %v3789_v17, %v2084_v16 }
 0x37d   : > { %v2670_v19 = vpop.eup %2669  ;;  %v1885_v2 = vsub.f32 %v1819_v35, %v1852_v60  ;;  %v1820_v10 = vmul.f32 0.0078125, %v1771_v30  ;;  %2675 = vrsqrt.f32 %v1983_v29  ;;  %v1853_v0 = vmul.f32 %v3890_v7, %v3890_v7 }
 0x37e   : > { %v2046_v49 = vmul.f32 %v2670_v19, %v1947_v28  ;;  %v1773_v3 = vpop.xlane.xlu0 %1772  ;;  %2156 = vst [vmem:[%s3802_s26 + $0x50] sm:$0xff] %v2123_v37  ;;  %v1950_v35 = vsub.f32 %v3658_v41, %v3872_v53 }
 0x37f   : > { %v2672_v50 = vpop.eup %2671  ;;  %v1918_v46 = vmax.f32 %v1885_v2, 0.0  ;;  %v1886_v27 = vsub.f32 %v1820_v10, %v1853_v0  ;;  %v1821_v42 = vmul.f32 0.0078125, %v1773_v3  ;;  %v1951_v3 = vsub.f32 %v3662_v9, %v3881_v52 }
 0x380   : > { %v2085_v24 = vmul.f32 %v3782_v13, %v2046_v49  ;;  %v2047_v44 = vmul.f32 %v2672_v50, %v1948_v59  ;;  %v1640_v23 = vpop.xlane.xlu1 %1639 }
 0x381   : > { %v1984_v36 = vadd.f32 1e-05, %v1918_v46  ;;  %v3899_v4 = vmul.f32 0.0078125, %v1640_v23  ;;  %v1919_v14 = vmax.f32 %v1886_v27, 0.0 }
 0x382   : > { %v2124_v25 = vadd.f32 %v3789_v17, %v2085_v24  ;;  %v2086_v32 = vmul.f32 %v3782_v13, %v2047_v44  ;;  %v1642_v54 = vpop.xlane.xlu0 %1641 }
 0x383   : > { %2677 = vrsqrt.f32 %v1984_v36  ;;  %v1854_v20 = vmul.f32 %v3899_v4, %v3899_v4  ;;  %v3905_v15 = vmul.f32 0.0078125, %v1642_v54  ;;  %v1985_v63 = vadd.f32 1e-05, %v1919_v14 }
 0x384   : > { %2157 = vst [vmem:[%s3802_s26 + $0x58] sm:$0xff] %v2124_v25  ;;  %v2125_v8 = vadd.f32 %v3789_v17, %v2086_v32  ;;  %v1775_v26 = vpop.xlane.xlu1 %1774  ;;  %v1952_v14 = vsub.f32 %v3670_v40, %v3890_v7  ;;  %v1953_v7 = vsub.f32 %v3674_v56, %v3899_v4 }
 0x385   : > { %v2674_v48 = vpop.eup %2673  ;;  %v1887_v31 = vsub.f32 %v1821_v42, %v1854_v20  ;;  %v1855_v58 = vmul.f32 %v3905_v15, %v3905_v15  ;;  %v1822_v18 = vmul.f32 0.0078125, %v1775_v26  ;;  %2679 = vrsqrt.f32 %v1985_v63 }
 0x386   : > { %2158 = vst [vmem:[%s3802_s26 + $0x60] sm:$0xff] %v2125_v8  ;;  %v2048_v34 = vmul.f32 %v2674_v48, %v1949_v1  ;;  %v1777_v16 = vpop.xlane.xlu0 %1776 }
 0x387   : > { %v1920_v60 = vmax.f32 %v1887_v31, 0.0  ;;  %v1888_v28 = vsub.f32 %v1822_v18, %v1855_v58  ;;  %v2676_v29 = vpop.eup %2675  ;;  %v1823_v49 = vmul.f32 0.0078125, %v1777_v16 }
 0x388   : > { %v2087_v33 = vmul.f32 %v3782_v13, %v2048_v34  ;;  %v1644_v51 = vpop.xlane.xlu1 %1643  ;;  %v2049_v30 = vmul.f32 %v2676_v29, %v1950_v35 }
 0x389   : > { %v1986_v19 = vadd.f32 1e-05, %v1920_v60  ;;  %v1921_v37 = vmax.f32 %v1888_v28, 0.0  ;;  %v3917_v2 = vmul.f32 0.0078125, %v1644_v51 }
 0x38a   : > { %v2126_v10 = vadd.f32 %v3789_v17, %v2087_v33  ;;  %v1646_v59 = vpop.xlane.xlu0 %1645  ;;  %v2088_v0 = vmul.f32 %v3782_v13, %v2049_v30  ;;  %v1954_v30 = vsub.f32 %v3682_v12, %v3905_v15 }
 0x38b   : > { %2681 = vrsqrt.f32 %v1986_v19  ;;  %v1987_v41 = vadd.f32 1e-05, %v1921_v37  ;;  %v1856_v53 = vmul.f32 %v3917_v2, %v3917_v2  ;;  %v3926_v50 = vmul.f32 0.0078125, %v1646_v59 }
 0x38c   : > { %2159 = vst [vmem:[%s3802_s26 + $0x68] sm:$0xff] %v2126_v10  ;;  %v1779_v46 = vpop.xlane.xlu1 %1778  ;;  %v2127_v44 = vadd.f32 %v3789_v17, %v2088_v0 }
 0x38d   : > { %v2678_v24 = vpop.eup %2677  ;;  %2683 = vrsqrt.f32 %v1987_v41  ;;  %v1889_v27 = vsub.f32 %v1823_v49, %v1856_v53  ;;  %v1824_v23 = vmul.f32 0.0078125, %v1779_v46  ;;  %v1857_v25 = vmul.f32 %v3926_v50, %v3926_v50 }
 0x38e   : > { %v2050_v36 = vmul.f32 %v2678_v24, %v1951_v3  ;;  %v1781_v32 = vpop.xlane.xlu0 %1780  ;;  %2160 = vst [vmem:[%s3802_s26 + $0x70] sm:$0xff] %v2127_v44 }
 0x38f   : > { %v1922_v9 = vmax.f32 %v1889_v27, 0.0  ;;  %v2680_v52 = vpop.eup %2679  ;;  %v1890_v42 = vsub.f32 %v1824_v23, %v1857_v25  ;;  %v1825_v18 = vmul.f32 0.0078125, %v1781_v32 }
 0x390   : > { %v2089_v54 = vmul.f32 %v3782_v13, %v2050_v36  ;;  %v1648_v20 = vpop.xlane.xlu1 %1647  ;;  %v2051_v8 = vmul.f32 %v2680_v52, %v1952_v14  ;;  %v1955_v36 = vsub.f32 %v3686_v5, %v3917_v2 }
 0x391   : > { %v1988_v1 = vadd.f32 1e-05, %v1922_v9  ;;  %v3935_v63 = vmul.f32 0.0078125, %v1648_v20  ;;  %v1923_v48 = vmax.f32 %v1890_v42, 0.0 }
 0x392   : > { %v2128_v26 = vadd.f32 %v3789_v17, %v2089_v54  ;;  %v1650_v31 = vpop.xlane.xlu0 %1649  ;;  %v2090_v58 = vmul.f32 %v3782_v13, %v2051_v8  ;;  %v1956_v8 = vsub.f32 %v3694_v55, %v3926_v50 }
 0x393   : > { %2685 = vrsqrt.f32 %v1988_v1  ;;  %v1858_v40 = vmul.f32 %v3935_v63, %v3935_v63  ;;  %v1989_v34 = vadd.f32 1e-05, %v1923_v48  ;;  %v3944_v16 = vmul.f32 0.0078125, %v1650_v31 }
 0x394   : > { %2161 = vst [vmem:[%s3802_s26 + $0x78] sm:$0xff] %v2128_v26  ;;  %v1783_v35 = vpop.xlane.xlu1 %1782  ;;  %v2129_v28 = vadd.f32 %v3789_v17, %v2090_v58 }
 0x395   : > { %v2682_v60 = vpop.eup %2681  ;;  %v1891_v29 = vsub.f32 %v1825_v18, %v1858_v40  ;;  %v1826_v33 = vmul.f32 0.0078125, %v1783_v35  ;;  %2687 = vrsqrt.f32 %v1989_v34  ;;  %v1859_v19 = vmul.f32 %v3944_v16, %v3944_v16 }
 0x396   : > { %v2052_v51 = vmul.f32 %v2682_v60, %v1953_v7  ;;  %v1785_v37 = vpop.xlane.xlu0 %1784  ;;  %2162 = vst [vmem:[%s3802_s26 + $0x80] sm:$0xff] %v2129_v28  ;;  %v1957_v28 = vsub.f32 %v3698_v45, %v3935_v63 }
 0x397   : > { %v2684_v10 = vpop.eup %2683  ;;  %v1924_v56 = vmax.f32 %v1891_v29, 0.0  ;;  %v1892_v59 = vsub.f32 %v1826_v33, %v1859_v19  ;;  %v1827_v24 = vmul.f32 0.0078125, %v1785_v37 }
 0x398   : > { %v2091_v4 = vmul.f32 %v3782_v13, %v2052_v51  ;;  %v2053_v49 = vmul.f32 %v2684_v10, %v1954_v30  ;;  %v1652_v0 = vpop.xlane.xlu1 %1651 }
 0x399   : > { %v1990_v41 = vadd.f32 1e-05, %v1924_v56  ;;  %v3953_v53 = vmul.f32 0.0078125, %v1652_v0  ;;  %v1925_v15 = vmax.f32 %v1892_v59, 0.0 }
 0x39a   : > { %v2130_v3 = vadd.f32 %v3789_v17, %v2091_v4  ;;  %v2092_v12 = vmul.f32 %v3782_v13, %v2053_v49  ;;  %v1654_v46 = vpop.xlane.xlu0 %1653  ;;  %v1958_v49 = vsub.f32 %v3706_v39, %v3944_v16 }
 0x39b   : > { %2689 = vrsqrt.f32 %v1990_v41  ;;  %v1860_v44 = vmul.f32 %v3953_v53, %v3953_v53  ;;  %v3959_v27 = vmul.f32 0.0078125, %v1654_v46  ;;  %v1991_v25 = vadd.f32 1e-05, %v1925_v15 }
 0x39c   : > { %2163 = vst [vmem:[%s3802_s26 + $0x88] sm:$0xff] %v2130_v3  ;;  %v2131_v23 = vadd.f32 %v3789_v17, %v2092_v12  ;;  %v1787_v32 = vpop.xlane.xlu1 %1786  ;;  %v1959_v16 = vsub.f32 %v3710_v43, %v3953_v53 }
 0x39d   : > { %v2686_v14 = vpop.eup %2685  ;;  %v1893_v9 = vsub.f32 %v1827_v24, %v1860_v44  ;;  %v1861_v52 = vmul.f32 %v3959_v27, %v3959_v27  ;;  %v1828_v54 = vmul.f32 0.0078125, %v1787_v32  ;;  %2691 = vrsqrt.f32 %v1991_v25 }
 0x39e   : > { %2164 = vst [vmem:[%s3802_s26 + $0x90] sm:$0xff] %v2131_v23  ;;  %v2054_v42 = vmul.f32 %v2686_v14, %v1955_v36  ;;  %v1789_v20 = vpop.xlane.xlu0 %1788 }
 0x39f   : > { %v1926_v1 = vmax.f32 %v1893_v9, 0.0  ;;  %v1894_v26 = vsub.f32 %v1828_v54, %v1861_v52  ;;  %v2688_v48 = vpop.eup %2687  ;;  %v1829_v34 = vmul.f32 0.0078125, %v1789_v20 }
 0x3a0   : > { %v2093_v5 = vmul.f32 %v3782_v13, %v2054_v42  ;;  %v1656_v2 = vpop.xlane.xlu1 %1655  ;;  %v2055_v31 = vmul.f32 %v2688_v48, %v1956_v8  ;;  %v1960_v8 = vsub.f32 %v3718_v22, %v3959_v27 }
 0x3a1   : > { %v1992_v58 = vadd.f32 1e-05, %v1926_v1  ;;  %v1927_v18 = vmax.f32 %v1894_v26, 0.0  ;;  %v3971_v40 = vmul.f32 0.0078125, %v1656_v2 }
 0x3a2   : > { %v2132_v7 = vadd.f32 %v3789_v17, %v2093_v5  ;;  %v1658_v35 = vpop.xlane.xlu0 %1657  ;;  %v2094_v60 = vmul.f32 %v3782_v13, %v2055_v31 }
 0x3a3   : > { %2693 = vrsqrt.f32 %v1992_v58  ;;  %v1993_v55 = vadd.f32 1e-05, %v1927_v18  ;;  %v1862_v50 = vmul.f32 %v3971_v40, %v3971_v40  ;;  %v3980_v29 = vmul.f32 0.0078125, %v1658_v35 }
 0x3a4   : > { %2165 = vst [vmem:[%s3802_s26 + $0x98] sm:$0xff] %v2132_v7  ;;  %v1791_v33 = vpop.xlane.xlu1 %1790  ;;  %v2133_v30 = vadd.f32 %v3789_v17, %v2094_v60 }
 0x3a5   : > { %v2690_v51 = vpop.eup %2689  ;;  %2695 = vrsqrt.f32 %v1993_v55  ;;  %v1895_v19 = vsub.f32 %v1829_v34, %v1862_v50  ;;  %v1830_v37 = vmul.f32 0.0078125, %v1791_v33  ;;  %v1863_v56 = vmul.f32 %v3980_v29, %v3980_v29 }
 0x3a6   : > { %v2056_v10 = vmul.f32 %v2690_v51, %v1957_v28  ;;  %v1793_v4 = vpop.xlane.xlu0 %1792  ;;  %2166 = vst [vmem:[%s3802_s26 + $0xa0] sm:$0xff] %v2133_v30  ;;  %v1961_v28 = vsub.f32 %v3722_v57, %v3971_v40 }
 0x3a7   : > { %v1928_v45 = vmax.f32 %v1895_v19, 0.0  ;;  %v2692_v63 = vpop.eup %2691  ;;  %v1896_v0 = vsub.f32 %v1830_v37, %v1863_v56  ;;  %v1831_v36 = vmul.f32 0.0078125, %v1793_v4  ;;  %v1962_v4 = vsub.f32 %v3730_v47, %v3980_v29 }
 0x3a8   : > { %v2095_v59 = vmul.f32 %v3782_v13, %v2056_v10  ;;  %v1660_v41 = vpop.xlane.xlu1 %1659  ;;  %v2057_v3 = vmul.f32 %v2692_v63, %v1958_v49 }
 0x3a9   : > { %v1994_v12 = vadd.f32 1e-05, %v1928_v45  ;;  %v3989_v15 = vmul.f32 0.0078125, %v1660_v41  ;;  %v1929_v24 = vmax.f32 %v1896_v0, 0.0 }
 0x3aa   : > { %v2134_v46 = vadd.f32 %v3789_v17, %v2095_v59  ;;  %v1662_v44 = vpop.xlane.xlu0 %1661  ;;  %v2096_v23 = vmul.f32 %v3782_v13, %v2057_v3 }
 0x3ab   : > { %2697 = vrsqrt.f32 %v1994_v12  ;;  %v1864_v39 = vmul.f32 %v3989_v15, %v3989_v15  ;;  %v1995_v25 = vadd.f32 1e-05, %v1929_v24  ;;  %v3998_v32 = vmul.f32 0.0078125, %v1662_v44 }
 0x3ac   : > { %2167 = vst [vmem:[%s3802_s26 + $0xa8] sm:$0xff] %v2134_v46  ;;  %v1795_v14 = vpop.xlane.xlu1 %1794  ;;  %v2135_v52 = vadd.f32 %v3789_v17, %v2096_v23  ;;  %v1963_v29 = vsub.f32 %v3734_v6, %v3989_v15 }
 0x3ad   : > { %v2694_v9 = vpop.eup %2693  ;;  %v1897_v54 = vsub.f32 %v1831_v36, %v1864_v39  ;;  %v1832_v42 = vmul.f32 0.0078125, %v1795_v14  ;;  %2699 = vrsqrt.f32 %v1995_v25  ;;  %v1865_v1 = vmul.f32 %v3998_v32, %v3998_v32 }
 0x3ae   : > { %v2058_v20 = vmul.f32 %v2694_v9, %v1959_v16  ;;  %v1797_v26 = vpop.xlane.xlu0 %1796  ;;  %2168 = vst [vmem:[%s3802_s26 + $0xb0] sm:$0xff] %v2135_v52 }
 0x3af   : > { %v2696_v48 = vpop.eup %2695  ;;  %v1930_v43 = vmax.f32 %v1897_v54, 0.0  ;;  %v1898_v2 = vsub.f32 %v1832_v42, %v1865_v1  ;;  %v1833_v35 = vmul.f32 0.0078125, %v1797_v26  ;;  %v1964_v42 = vsub.f32 %v3742_v62, %v3998_v32 }
 0x3b0   : > { %v2097_v53 = vmul.f32 %v3782_v13, %v2058_v20  ;;  %v2059_v5 = vmul.f32 %v2696_v48, %v1960_v8  ;;  %v1664_v31 = vpop.xlane.xlu1 %1663 }
 0x3b1   : > { %v1996_v58 = vadd.f32 1e-05, %v1930_v43  ;;  %v4007_v18 = vmul.f32 0.0078125, %v1664_v31  ;;  %v1931_v27 = vmax.f32 %v1898_v2, 0.0 }
 0x3b2   : > { %v2136_v7 = vadd.f32 %v3789_v17, %v2097_v53  ;;  %v2098_v22 = vmul.f32 %v3782_v13, %v2059_v5  ;;  %v1666_v34 = vpop.xlane.xlu0 %1665 }
 0x3b3   : > { %2701 = vrsqrt.f32 %v1996_v58  ;;  %v1866_v60 = vmul.f32 %v4007_v18, %v4007_v18  ;;  %v4013_v55 = vmul.f32 0.0078125, %v1666_v34  ;;  %v1997_v33 = vadd.f32 1e-05, %v1931_v27 }
 0x3b4   : > { %2169 = vst [vmem:[%s3802_s26 + $0xb8] sm:$0xff] %v2136_v7  ;;  %v2137_v50 = vadd.f32 %v3789_v17, %v2098_v22  ;;  %v1799_v51 = vpop.xlane.xlu1 %1798  ;;  %v1965_v62 = vsub.f32 %v3746_v38, %v4007_v18 }
 0x3b5   : > { %v2698_v30 = vpop.eup %2697  ;;  %v1899_v19 = vsub.f32 %v1833_v35, %v1866_v60  ;;  %v1867_v37 = vmul.f32 %v4013_v55, %v4013_v55  ;;  %v1834_v10 = vmul.f32 0.0078125, %v1799_v51  ;;  %2703 = vrsqrt.f32 %v1997_v33 }
 0x3b6   : > { %2170 = vst [vmem:[%s3802_s26 + $0xc0] sm:$0xff] %v2137_v50  ;;  %v2060_v56 = vmul.f32 %v2698_v30, %v1961_v28  ;;  %v1966_v7 = vsub.f32 %v3754_v61, %v4013_v55 }
 0x3b7   : > { %v1932_v49 = vmax.f32 %v1899_v19, 0.0  ;;  %v1900_v45 = vsub.f32 %v1834_v10, %v1867_v37  ;;  %v2700_v63 = vpop.eup %2699 }
 0x3b8   : > { %v2099_v57 = vmul.f32 %v3782_v13, %v2060_v56  ;;  %v1668_v40 = vpop.xlane.xlu1 %1667  ;;  %v1670_v59 = vpop.xlane.xlu0 %1669  ;;  %v2061_v0 = vmul.f32 %v2700_v63, %v1962_v4 }
 0x3b9   : > { %v1998_v41 = vadd.f32 1e-05, %v1932_v49  ;;  %v1933_v3 = vmax.f32 %v1900_v45, 0.0  ;;  %v1703_v12 = vmul.f32 0.0078125, %v1668_v40  ;;  %v1704_v24 = vmul.f32 0.0078125, %v1670_v59 }
 0x3ba   : > { %v2138_v46 = vadd.f32 %v3789_v17, %v2099_v57  ;;  %v2100_v44 = vmul.f32 %v3782_v13, %v2061_v0 }
 0x3bb   : > { %2705 = vrsqrt.f32 %v1998_v41  ;;  %v1999_v47 = vadd.f32 1e-05, %v1933_v3  ;;  %v1868_v23 = vmul.f32 %v1703_v12, %v1703_v12  ;;  %v1869_v36 = vmul.f32 %v1704_v24, %v1704_v24 }
 0x3bc   : > { %2171 = vst [vmem:[%s3802_s26 + $0xc8] sm:$0xff] %v2138_v46  ;;  %v1801_v39 = vpop.xlane.xlu0 %1800  ;;  %v1803_v16 = vpop.xlane.xlu1 %1802  ;;  %v2139_v14 = vadd.f32 %v3789_v17, %v2100_v44  ;;  %v1967_v60 = vsub.f32 %v3761_v21, %v1703_v12  ;;  %v1968_v55 = vsub.f32 %v3764_v11, %v1704_v24 }
 0x3bd   : > { %v2702_v25 = vpop.eup %2701  ;;  %2707 = vrsqrt.f32 %v1999_v47  ;;  %v1835_v9 = vmul.f32 0.0078125, %v1801_v39  ;;  %v1836_v52 = vmul.f32 0.0078125, %v1803_v16 }
 0x3be   : > { %v2062_v54 = vmul.f32 %v2702_v25, %v1963_v29  ;;  %2172 = vst [vmem:[%s3802_s26 + $0xd0] sm:$0xff] %v2139_v14 }
 0x3bf   : > { %v1901_v20 = vsub.f32 %v1835_v9, %v1868_v23  ;;  %v1902_v8 = vsub.f32 %v1836_v52, %v1869_v36  ;;  %v2704_v1 = vpop.eup %2703 }
 0x3c0   : > { %v2101_v6 = vmul.f32 %v3782_v13, %v2062_v54  ;;  %v2063_v15 = vmul.f32 %v2704_v1, %v1964_v42 }
 0x3c1   : > { %v1934_v26 = vmax.f32 %v1901_v20, 0.0  ;;  %v1935_v48 = vmax.f32 %v1902_v8, 0.0 }
 0x3c2   : > { %v2140_v43 = vadd.f32 %v3789_v17, %v2101_v6  ;;  %v2102_v53 = vmul.f32 %v3782_v13, %v2063_v15 }
 0x3c3   : > { %v2000_v5 = vadd.f32 1e-05, %v1934_v26  ;;  %v2001_v2 = vadd.f32 1e-05, %v1935_v48 }
 0x3c4   : > { %2173 = vst [vmem:[%s3802_s26 + $0xd8] sm:$0xff] %v2140_v43  ;;  %v2141_v31 = vadd.f32 %v3789_v17, %v2102_v53 }
 0x3c5   : > { %v2706_v32 = vpop.eup %2705  ;;  %2709 = vrsqrt.f32 %v2000_v5 }
 0x3c6   : > { %v2064_v58 = vmul.f32 %v2706_v32, %v1965_v62  ;;  %2711 = vrsqrt.f32 %v2001_v2  ;;  %2174 = vst [vmem:[%s3802_s26 + $0xe0] sm:$0xff] %v2141_v31 }
 0x3c7   : > { %v2708_v22 = vpop.eup %2707 }
 0x3c8   : > { %v2103_v27 = vmul.f32 %v3782_v13, %v2064_v58  ;;  %v2065_v34 = vmul.f32 %v2708_v22, %v1966_v7 }
 0x3ca   : > { %v2142_v35 = vadd.f32 %v3789_v17, %v2103_v27  ;;  %v2104_v38 = vmul.f32 %v3782_v13, %v2065_v34 }
 0x3cc   : > { %2175 = vst [vmem:[%s3802_s26 + $0xe8] sm:$0xff] %v2142_v35  ;;  %v2143_v18 = vadd.f32 %v3789_v17, %v2104_v38 }
 0x3ce   : > { %2176 = vst [vmem:[%s3802_s26 + $0xf0] sm:$0xff] %v2143_v18 }
 0x3cf   : > { %v2710_v61 = vpop.eup %2709 }
 0x3d0   : > { %v2712_v50 = vpop.eup %2711  ;;  %v2066_v28 = vmul.f32 %v2710_v61, %v1967_v60 }
 0x3d1   : > { %v2067_v33 = vmul.f32 %v2712_v50, %v1968_v55  ;;  %2186 = sbr.rel (!%p4202_p9) target bundleno = 1012 (0x3f4), region = 56 }
 0x3d2   : > { %v2105_v51 = vmul.f32 %v3782_v13, %v2066_v28 }
 0x3d3   : > { %v2106_v30 = vmul.f32 %v3782_v13, %v2067_v33 }
 0x3d4   : > { %v2144_v19 = vadd.f32 %v3789_v17, %v2105_v51 }
 0x3d5   : > { %v2145_v37 = vadd.f32 %v3789_v17, %v2106_v30 }
 0x3d6   : > { %2177 = vst [vmem:[%s3802_s26 + $0xf8] sm:$0xff] %v2144_v19 }
 0x3d7   : > { %2178 = vst [vmem:[%s3802_s26 + $0x100] sm:$0xff] %v2145_v37 }
 0x3d8   : > { %s4212_s12 = smov (!%p2189_p10, %s2188_s12), 33 }
 0x3d9   : > { %s4062_s25 = sshll.u32 %s4212_s12, 7 }
 0x3da   : > { %s2193_s28 = ssub.s32 4224, %s4062_s25 }
 0x3db   : > { %2194 = vsyncadd %s2180_s8, %s2193_s28  ;;  %p2307_p1 = scmp.ne.s32.totalorder %s4062_s25, 0  ;;  %s2314_s30 = smul.u32 4224, %s2967_s22 }
 0x3dc   : > { %s2199_s9 = sshll.u32 %s3802_s26, 4  ;;  %s2913_s16 = smov [#allocation8]   ;;  %s4075_s9 = int_to_ptr.vmem [resolvable:$true] %s2199_s9 }
 0x3dd   : > { %s4073_s14 = scalar_lea.hbm %s4126_s5, %s2314_s30  ;;  %s2830_s15 = scalar_lea.vmem %s4075_s9, %s4062_s25 }
 0x3de   : > { %p2831_p3 = scmp.ne.s32.totalorder %s4075_s9, %s2830_s15  ;;  %s2834_s29 = sshll.u32 %s2913_s16, 4  ;;  %s2835_s29 = int_to_ptr.vmem [resolvable:$false] %s2834_s29 }
 0x3df   : > { %s2836_s22 = scalar_lea.vmem %s2835_s29, 8448  ;;  %p2837_p11 = scmp.lt.s32.totalorder %s4075_s9, %s2835_s29 }
 0x3e0   : > { %p2832_p5 = pnand %p2831_p3, %p2307_p1  ;;  %p2838_p13 = scmp.lt.s32.totalorder %s2836_s22, %s2830_s15 }
 0x3e2   : > { %p2833_p6 = pneg %p2832_p5  ;;  %p2839_p0 = por %p2838_p13, %p2837_p11 }
 0x3e4   : > { %p2840_p12 = pnand %p2839_p0, %p2833_p6 }
 0x3e6   : > { %2843 = shalt.err (!%p2840_p12)
}
 0x3e7   : > { %s2844_s7 = scalar_lea.hbm %s4073_s14, %s4062_s25  ;;  %s2848_s26 = scalar_lea.hbm %s4126_s5, 8320 }
 0x3e8   : > { %p2845_p7 = scmp.ne.s32.totalorder %s4073_s14, %s2844_s7  ;;  %p2849_p9 = scmp.lt.u32.totalorder %s4073_s14, %s4126_s5 }
 0x3e9   : > { %p2850_p10 = scmp.lt.u32.totalorder %s2848_s26, %s2844_s7  ;;  %p2852_p5 = scmp.lt.u32.totalorder %s2844_s7, %s4073_s14 }
 0x3ea   : > { %p2846_p2 = pnand %p2845_p7, %p2307_p1 }
 0x3eb   : > { %p2851_p3 = por %p2850_p10, %p2849_p9 }
 0x3ec   : > { %p2847_p8 = pneg %p2846_p2 }
 0x3ed   : > { %p2853_p6 = por %p2852_p5, %p2851_p3 }
 0x3ef   : > { %p2854_p11 = pnand %p2853_p6, %p2847_p8 }
 0x3f1   : > { %2857 = shalt.err (!%p2854_p11)
}
 0x3f2   : > { %s2914_s28 = smov 128   ;;  %s2915_s30 = smov 8  }
 0x3f3   : > { %2205 = dma.vmem_to_hbm [thread:$0]  (%p2307_p1), %s4075_s9, %s4062_s25, %s4073_s14, %s2180_s8, %s2914_s28, %s2914_s28, %s2915_s30  }
 0x3f4 PF: > { %s2214_s27 = sand.u32 1, %s2888_s18   ;;  %p4203_p13 = scmp.ne.s32.totalorder %s4134_s6, 0 }
 0x3f5   : > { %s2215_s11 = scalar_lea.sflag [#allocation4], %s2214_s27 }
 0x3f6   : > { %p2463_p0 = pnand %p2295_p4, %p4203_p13 }
 0x3f8   : > { %2883 = dma.done.wait (!%p2463_p0), %s2215_s11, 4224  }
 0x3f9   : > { %2885 = vsyncadd (!%p2463_p0), %s2215_s11, 4294963072  ;;  %s4204_s15 = sld [smem:[#allocation12_spill]]  ;;  %p19_p12 = scmp.ge.s32.totalorder %s2971_s24, 4  }
 0x3fa   : > { %s4205_s18 = smov %s2892_s19  ;;  %s4206_s19 = smov %s2896_s20 }
 0x3fb   : > { %s4208_s21 = smov %s2971_s24  ;;  %21 = sbr.rel (!%p19_p12) target bundleno = 6 (0x6), region = 93 }
 0x3ff   : > { %s4207_s20 = smov %s4204_s15 }
 0x402   :  { %2220 = vsyncpa [#allocation3], 1 }
 0x403   :  { %2222 = vsyncpa [#allocation3 + $0x1], 1 }
 0x404   :  { %2223 = vsyncpa [#allocation6], 1 }
 0x405   :  { %2224 = vsyncpa [#allocation4], 1 }
 0x406   :  { %2226 = vsyncpa [#allocation4 + $0x1], 1 }

// kernel: tpu_custom_call.1
= control target key start
LH: loop header
LB: loop body
LE: loop exit
PB: predicated region body
PF: predicated region fallthrough
CT: control target
= control target key end

     0   :  { %10 = vsyncpa [#allocation3], 0  ;;  %s4121_s0 = inlined_call_operand.hbm [shape: f32[520,128], index: 0, kind: input, shape index: {}]   ;;  %s4122_s1 = inlined_call_operand.hbm [shape: f32[128,512], index: 1, kind: input, shape index: {}]   ;;  %s4123_s2 = inlined_call_operand.hbm [shape: f32[256,128], index: 2, kind: input, shape index: {}]   ;;  %s4124_s3 = inlined_call_operand.vmem [shape: f32[1,128], index: 3, kind: input, shape index: {}]   ;;  %s4125_s4 = inlined_call_operand.vmem [shape: f32[1,128], index: 4, kind: input, shape index: {}]   ;;  %s4126_s5 = inlined_call_operand.hbm [shape: f32[520,128], index: 5, kind: output, shape index: {}]  }
   0x1   :  { %12 = vsyncpa [#allocation3 + $0x1], 0 }
   0x2   :  { %13 = vsyncpa [#allocation6], 0 }
   0x3   :  { %14 = vsyncpa [#allocation4], 0 }
   0x4   :  { %16 = vsyncpa [#allocation4 + $0x1], 0  ;;  %s2946_s18 = smov 0   ;;  %s2948_s19 = smov 0  }
   0x5   :  { %s2950_s20 = smov 0   ;;  %s2952_s21 = smov 0  }
   0x6 LB: > { %s2967_s22 = sadd.s32 4294967295, %s2900_s21   ;;  %s2291_s23 = sadd.s32 4294967294, %s2900_s21   ;;  %s2900_s21 = sphi %s2952_s21, %s4208_s21   ;;  %s2896_s20 = sphi %s2950_s20, %s4207_s20   ;;  %s2892_s19 = sphi %s2948_s19, %s4206_s19   ;;  %s2888_s18 = sphi %s2946_s18, %s4205_s18  }
   0x7   : > { %s2971_s24 = sadd.s32 1, %s2900_s21   ;;  %s29_s25 = sadd.s32 1, %s2896_s20 }
   0x8   : > { %s26_s26 = ssub.s32 %s2900_s21, %s2971_s24  ;;  %p36_p0 = scmp.ne.s32.totalorder %s2896_s20, %s2892_s19 }
   0x9   : > { %p27_p1 = scmp.eq.s32.totalorder %s26_s26, 0  ;;  %p37_p2 = scmp.eq.s32.totalorder %s2900_s21, 0 }
   0xa   : > { %p42_p3 = scmp.ne.s32.totalorder %s2892_s19, %s2888_s18  ;;  %p4127_p4 = scmp.eq.s32.totalorder %s2967_s22, 0 }
   0xb   : > { %s2983_s27 = scalar_select %p27_p1, %s2896_s20, %s29_s25  }
   0xc   : > { %p2985_p5 = por %p37_p2, %p36_p0  ;;  %p2991_p6 = por %p4127_p4, %p42_p3 }
   0xd   : > { %4130 = sst [smem:[#allocation12_spill]] %s2983_s27  ;;  %p150_p7 = scmp.eq.s32.totalorder %s2967_s22, 1 }
   0xe   : > { %s4131_s28 = scalar_select %p2985_p5, 1, 0 }
   0xf   : > { %s4132_s29 = scalar_select %p2991_p6, 1, 0 }
  0x10   : > { %p156_p8 = scmp.eq.s32.totalorder %s2291_s23, 1  ;;  %p2292_p9 = scmp.ge.s32.totalorder %s2900_s21, 1 }
  0x11   : > { %p163_p10 = scmp.lt.s32.totalorder %s2900_s21, 3  ;;  %p2998_p11 = por %p150_p7, %p36_p0 }
  0x12   : > { %p3002_p12 = por %p156_p8, %p42_p3  ;;  %s2902_s8 = smov [#allocation5]  }
  0x13   : > { %s4133_s30 = scalar_select %p2998_p11, 1, 0 }
  0x14   : > { %s4134_s6 = scalar_select %p3002_p12, 1, 0 }
  0x15   : > { %p3006_p13 = pnand %p2292_p9, %p163_p10  ;;  %s175_s9 = sshll.u32 %s2902_s8, 4  ;;  %s176_s9 = int_to_ptr.vmem [resolvable:$true] %s175_s9 }
  0x16   : > { %s2903_s11 = smov [#allocation7]   ;;  %s2746_s15 = scalar_lea.hbm %s4122_s1, 8192 }
  0x17   : > { %s4135_s7 = scalar_select %p3006_p13, 1, 0 }
  0x18   : > { %p2455_p1 = pneg %p3006_p13  ;;  %s188_s12 = sshll.u32 %s2903_s11, 4  ;;  %s3018_s12 = int_to_ptr.vmem [resolvable:$true] %s188_s12 }
  0x19   : > { %p2747_p0 = scmp.ne.s32.totalorder %s4122_s1, %s2746_s15  ;;  %p2753_p9 = scmp.lt.u32.totalorder %s2746_s15, %s4122_s1 }
  0x1a   : > { %p3014_p2 = pnand %p2455_p1, %p4127_p4 }
  0x1c   : > { %p2748_p3 = pneg %p3014_p2 }
  0x1e   : > { %p2749_p7 = pnand %p2748_p3, %p2747_p0 }
  0x20   : > { %p2750_p8 = pneg %p2749_p7 }
  0x22   : > { %p2755_p10 = pnand %p2753_p9, %p2750_p8 }
  0x24   : > { %2758 = shalt.err (!%p2755_p10)
}
  0x25   : > { %s2759_s26 = scalar_lea.vmem %s176_s9, 8192  ;;  %p2767_p11 = scmp.lt.s32.totalorder %s176_s9, %s176_s9 }
  0x26   : > { %p2760_p1 = scmp.ne.s32.totalorder %s176_s9, %s2759_s26  ;;  %p2768_p6 = scmp.lt.s32.totalorder %s2759_s26, %s2759_s26 }
  0x28   : > { %p2762_p4 = pnand %p2760_p1, %p2748_p3  ;;  %p2769_p13 = por %p2768_p6, %p2767_p11 }
  0x2a   : > { %p2763_p12 = pneg %p2762_p4 }
  0x2c   : > { %p2770_p5 = pnand %p2769_p13, %p2763_p12 }
  0x2e   : > { %2773 = shalt.err (!%p2770_p5)
}
  0x2f   : > { %s2904_s8 = smov 512   ;;  %s2905_s11 = smov 32  }
  0x30   : > { %2458 = dma.hbm_to_vmem [thread:$0]  (!%p3014_p2), %s4122_s1, 8192, %s176_s9, [#allocation6], %s2904_s8, %s2904_s8, %s2905_s11  }
  0x31   : > { %s2774_s17 = scalar_lea.hbm %s4123_s2, 4096 }
  0x32   : > { %p2775_p4 = scmp.ne.s32.totalorder %s4123_s2, %s2774_s17  ;;  %p2781_p11 = scmp.lt.u32.totalorder %s2774_s17, %s4123_s2 }
  0x34   : > { %p2777_p5 = pnand %p2775_p4, %p2748_p3 }
  0x36   : > { %p2778_p6 = pneg %p2777_p5 }
  0x38   : > { %p2783_p12 = pnand %p2781_p11, %p2778_p6 }
  0x3a   : > { %2786 = shalt.err (!%p2783_p12)
}
  0x3b   : > { %s2787_s9 = scalar_lea.vmem %s3018_s12, 4096  ;;  %p2795_p8 = scmp.lt.s32.totalorder %s3018_s12, %s3018_s12 }
  0x3c   : > { %p2788_p13 = scmp.ne.s32.totalorder %s3018_s12, %s2787_s9  ;;  %p2796_p9 = scmp.lt.s32.totalorder %s2787_s9, %s2787_s9 }
  0x3e   : > { %p2790_p0 = pnand %p2788_p13, %p2748_p3  ;;  %p2797_p10 = por %p2796_p9, %p2795_p8 }
  0x40   : > { %p2791_p7 = pneg %p2790_p0 }
  0x42   : > { %p2798_p1 = pnand %p2797_p10, %p2791_p7 }
  0x44   : > { %2801 = shalt.err (!%p2798_p1)
}
  0x45   : > { %s2906_s27 = smov 128   ;;  %s2907_s8 = smov 8  }
  0x46   : > { %2461 = dma.hbm_to_vmem [thread:$0]  (!%p3014_p2), %s4123_s2, 4096, %s3018_s12, [#allocation6], %s2906_s27, %s2906_s27, %s2907_s8  }
  0x47   : > { %p2295_p4 = scmp.ge.s32.totalorder %s2900_s21, 2 }
  0x48   : > { %p4137_p3 = scmp.ne.s32.totalorder (!%p2295_p4), %s4131_s28, 0 }
  0x49   : > { %204 = sbr.rel (%p2295_p4) target bundleno = 115 (0x73), region = 32 }
  0x50   : > { %207 = sbr.rel (!%p4137_p3) target bundleno = 115 (0x73), region = 36  ;;  %s208_s14 = sand.u32 (%p4137_p3), 1, %s2896_s20  }
  0x51   : > { %s213_s15 = smul.u32 (%p4137_p3), 33, %s2900_s21  ;;  %s3077_s23 = scalar_lea.sflag (%p4137_p3), [#allocation3], %s208_s14 }
  0x52   : > { %s2443_s16 = smul.u32 (%p4137_p3), 264, %s208_s14 }
  0x53   : > { %s214_s17 = ssub.s32 (%p4137_p3), 65, %s213_s15 }
  0x54   : > { %p215_p5 = scmp.lt.s32.totalorder (%p4137_p3), %s214_s17, 33  ;;  %s212_s25 = scalar_lea.vmem (%p4137_p3), [#allocation2], %s2443_s16 }
  0x57   : > { %s4210_s17 = smov (!%p215_p5, %s214_s17), 33 }
  0x58   : > { %s3074_s10 = sshll.u32 %s4210_s17, 7 }
  0x59   : > { %s219_s12 = ssub.s32 4224, %s3074_s10 }
  0x5a   : > { %220 = vsyncadd %s3077_s23, %s219_s12  ;;  %p2297_p2 = scmp.ne.s32.totalorder %s3074_s10, 0  ;;  %s2313_s28 = smul.u32 4224, %s2900_s21 }
  0x5b   : > { %s225_s26 = sshll.u32 %s212_s25, 4  ;;  %s2806_s15 = scalar_lea.hbm %s4121_s0, 8320  ;;  %s3087_s26 = int_to_ptr.vmem [resolvable:$true] %s225_s26 }
  0x5c   : > { %s3085_s8 = scalar_lea.hbm %s4121_s0, %s2313_s28 }
  0x5d   : > { %s2802_s11 = scalar_lea.hbm %s3085_s8, %s3074_s10  ;;  %p2807_p13 = scmp.lt.u32.totalorder %s3085_s8, %s4121_s0 }
  0x5e   : > { %p2803_p6 = scmp.ne.s32.totalorder %s3085_s8, %s2802_s11  ;;  %p2808_p0 = scmp.lt.u32.totalorder %s2806_s15, %s2802_s11 }
  0x5f   : > { %p2810_p8 = scmp.lt.u32.totalorder %s2802_s11, %s3085_s8 }
  0x60   : > { %p2804_p11 = pnand %p2803_p6, %p2297_p2  ;;  %p2809_p7 = por %p2808_p0, %p2807_p13 }
  0x62   : > { %p2805_p12 = pneg %p2804_p11  ;;  %p2811_p9 = por %p2810_p8, %p2809_p7 }
  0x64   : > { %p2812_p10 = pnand %p2811_p9, %p2805_p12 }
  0x66   : > { %2815 = shalt.err (!%p2812_p10)
}
  0x67   : > { %s2816_s12 = scalar_lea.vmem %s3087_s26, %s3074_s10  ;;  %s2908_s25 = smov [#allocation2]  }
  0x68   : > { %p2817_p1 = scmp.ne.s32.totalorder %s3087_s26, %s2816_s12  ;;  %s2820_s28 = sshll.u32 %s2908_s25, 4  ;;  %s2821_s28 = int_to_ptr.vmem [resolvable:$false] %s2820_s28 }
  0x69   : > { %s2822_s9 = scalar_lea.vmem %s2821_s28, 8448  ;;  %p2823_p6 = scmp.lt.s32.totalorder %s3087_s26, %s2821_s28 }
  0x6a   : > { %p2818_p3 = pnand %p2817_p1, %p2297_p2  ;;  %p2824_p11 = scmp.lt.s32.totalorder %s2822_s9, %s2816_s12 }
  0x6c   : > { %p2819_p5 = pneg %p2818_p3  ;;  %p2825_p13 = por %p2824_p11, %p2823_p6 }
  0x6e   : > { %p2826_p0 = pnand %p2825_p13, %p2819_p5 }
  0x70   : > { %2829 = shalt.err (!%p2826_p0)
}
  0x71   : > { %s2909_s27 = smov 128   ;;  %s2910_s11 = smov 8  }
  0x72   : > { %231 = dma.hbm_to_vmem [thread:$0]  (%p2297_p2), %s3085_s8, %s3074_s10, %s3087_s26, %s3077_s23, %s2909_s27, %s2909_s27, %s2910_s11  }
  0x73 PF: > { %p4138_p12 = scmp.ne.s32.totalorder %s4135_s7, 0 }
  0x75   : > { %237 = sbr.rel (%p4138_p12) target bundleno = 1012 (0x3f4), region = 40 }
  0x7c   : > { %s3117_s13 = sand.u32 1, %s2892_s19   ;;  %p4139_p7 = scmp.ne.s32.totalorder %s4132_s29, 0 }
  0x7d   : > { %s2444_s14 = smul.u32 264, %s3117_s13  ;;  %s240_s15 = scalar_lea.sflag [#allocation3], %s3117_s13 }
  0x7f   : > { %s3123_s16 = scalar_lea.vmem [#allocation2], %s2444_s14 }
  0x80   : > { %2875 = dma.done.wait (%p4139_p7), %s240_s15, 4224  }
  0x81   : > { %2877 = vsyncadd (%p4139_p7), %s240_s15, 4294963072  ;;  %p4140_p2 = scmp.eq.s32.totalorder %s2967_s22, 0 }
  0x83   : > { %2879 = dma.done.wait (%p4140_p2), [#allocation6], 12288   ;;  %p4141_p8 = pmov %p4140_p2 }
  0x84   : > { %v2911_v0 = vmov 0.0   ;;  %v322_v1 = vld [vmem:[#allocation5 + $0x8] sm:$0xff]  ;;  %v321_v3 = vld [vmem:[#allocation5] sm:$0xff]  ;;  %v324_v48 = vld [vmem:[#allocation5 + $0x18] sm:$0xff]  ;;  %s3802_s26 = scalar_lea.vmem [#allocation8], %s2444_s14  ;;  %s2180_s8 = scalar_lea.sflag [#allocation4], %s3117_s13 }
  0x85   : > { %2881 = vsyncadd (%p4141_p8), [#allocation6], 4294955008  ;;  %545 = vmatprep.mubr.f32.mxu1 %v2911_v0  ;;  %449 = vmatprep.mubr.f32.mxu0 %v2911_v0  ;;  %v326_v2 = vld [vmem:[#allocation5 + $0x28] sm:$0xff]  ;;  %v325_v5 = vld [vmem:[#allocation5 + $0x20] sm:$0xff]  ;;  %p4202_p9 = scmp.ne.s32.totalorder %s4133_s30, 0 }
  0x86   : > { %v2315_v4 = vpack.c.bf16 %v326_v2, %v322_v1  ;;  %v330_v6 = vld [vmem:[#allocation5 + $0x48] sm:$0xff]  ;;  %v2317_v8 = vpack.c.bf16 %v325_v5, %v321_v3  ;;  %v329_v10 = vld [vmem:[#allocation5 + $0x40] sm:$0xff]  ;;  %v328_v49 = vld [vmem:[#allocation5 + $0x38] sm:$0xff]  ;;  %s2187_s17 = smul.u32 (%p4202_p9), 33, %s2967_s22 }
  0x87   : > { %v334_v7 = vld [vmem:[#allocation5 + $0x68] sm:$0xff]  ;;  %v333_v11 = vld [vmem:[#allocation5 + $0x60] sm:$0xff]  ;;  %v2347_v51 = vpack.c.bf16 %v328_v49, %v324_v48  ;;  %v323_v52 = vld [vmem:[#allocation5 + $0x10] sm:$0xff] }
  0x88   : > { %v2319_v9 = vpack.c.bf16 %v334_v7, %v330_v6  ;;  %v338_v12 = vld [vmem:[#allocation5 + $0x88] sm:$0xff]  ;;  %2427 = vmatprep.subr.bf16.mxu1 %v2315_v4  ;;  %2316 = vmatprep.subr.bf16.mxu0 %v2315_v4  ;;  %v2321_v14 = vpack.c.bf16 %v333_v11, %v329_v10  ;;  %v337_v16 = vld [vmem:[#allocation5 + $0x80] sm:$0xff]  ;;  %v327_v53 = vld [vmem:[#allocation5 + $0x30] sm:$0xff]  ;;  %s2188_s12 = ssub.s32 (%p4202_p9), 65, %s2187_s17 }
  0x89   : > { %v342_v13 = vld [vmem:[#allocation5 + $0xa8] sm:$0xff]  ;;  %2435 = vmatpush1.bf16.msra.mxu1 %v2317_v8  ;;  %2318 = vmatpush1.bf16.msra.mxu0 %v2317_v8  ;;  %v341_v17 = vld [vmem:[#allocation5 + $0xa0] sm:$0xff]  ;;  %v332_v54 = vld [vmem:[#allocation5 + $0x58] sm:$0xff]  ;;  %v2349_v57 = vpack.c.bf16 %v327_v53, %v323_v52  ;;  %p2189_p10 = scmp.lt.s32.totalorder (%p4202_p9), %s2188_s12, 33 }
  0x8a   : > { %2428 = vmatprep.subr.bf16.mxu1 %v2319_v9  ;;  %v2323_v15 = vpack.c.bf16 %v342_v13, %v338_v12  ;;  %2320 = vmatprep.subr.bf16.mxu0 %v2319_v9  ;;  %v346_v18 = vld [vmem:[#allocation5 + $0xc8] sm:$0xff]  ;;  %v2325_v20 = vpack.c.bf16 %v341_v17, %v337_v16  ;;  %v345_v22 = vld [vmem:[#allocation5 + $0xc0] sm:$0xff]  ;;  %v336_v55 = vld [vmem:[#allocation5 + $0x78] sm:$0xff] }
  0x8b   : > { %v350_v19 = vld [vmem:[#allocation5 + $0xe8] sm:$0xff]  ;;  %v349_v23 = vld [vmem:[#allocation5 + $0xe0] sm:$0xff]  ;;  %v3136_v56 = vld [vmem:[%s3123_s16 + $0x80] sm:$0xff]  ;;  %v2351_v58 = vpack.c.bf16 %v336_v55, %v332_v54 }
  0x8c   : > { %v2327_v21 = vpack.c.bf16 %v350_v19, %v346_v18  ;;  %v354_v24 = vld [vmem:[#allocation5 + $0x108] sm:$0xff]  ;;  %v2329_v26 = vpack.c.bf16 %v349_v23, %v345_v22  ;;  %v353_v28 = vld [vmem:[#allocation5 + $0x100] sm:$0xff]  ;;  %v331_v59 = vld [vmem:[#allocation5 + $0x50] sm:$0xff] }
  0x8d   : > { %2436 = vmatpush1.bf16.msra.mxu1 %v2321_v14  ;;  %2322 = vmatpush1.bf16.msra.mxu0 %v2321_v14  ;;  %v358_v25 = vld [vmem:[#allocation5 + $0x128] sm:$0xff]  ;;  %v357_v29 = vld [vmem:[#allocation5 + $0x120] sm:$0xff]  ;;  %v335_v60 = vld [vmem:[#allocation5 + $0x70] sm:$0xff] }
  0x8e   : > { %2429 = vmatprep.subr.bf16.mxu1 %v2323_v15  ;;  %2324 = vmatprep.subr.bf16.mxu0 %v2323_v15  ;;  %v2331_v27 = vpack.c.bf16 %v358_v25, %v354_v24  ;;  %v362_v30 = vld [vmem:[#allocation5 + $0x148] sm:$0xff]  ;;  %v2333_v32 = vpack.c.bf16 %v357_v29, %v353_v28  ;;  %v361_v34 = vld [vmem:[#allocation5 + $0x140] sm:$0xff]  ;;  %v340_v61 = vld [vmem:[#allocation5 + $0x98] sm:$0xff]  ;;  %v2353_v2 = vpack.c.bf16 %v335_v60, %v331_v59 }
  0x8f   : > { %v366_v31 = vld [vmem:[#allocation5 + $0x168] sm:$0xff]  ;;  %v365_v35 = vld [vmem:[#allocation5 + $0x160] sm:$0xff]  ;;  %v344_v62 = vld [vmem:[#allocation5 + $0xb8] sm:$0xff] }
  0x90   : > { %v2335_v33 = vpack.c.bf16 %v366_v31, %v362_v30  ;;  %v370_v36 = vld [vmem:[#allocation5 + $0x188] sm:$0xff]  ;;  %v2337_v38 = vpack.c.bf16 %v365_v35, %v361_v34  ;;  %v369_v40 = vld [vmem:[#allocation5 + $0x180] sm:$0xff]  ;;  %v3139_v63 = vld [vmem:[%s3123_s16] sm:$0xff]  ;;  %v2355_v3 = vpack.c.bf16 %v344_v62, %v340_v61 }
  0x91   : > { %2437 = vmatpush1.bf16.msra.mxu1 %v2325_v20  ;;  %2326 = vmatpush1.bf16.msra.mxu0 %v2325_v20  ;;  %v374_v37 = vld [vmem:[#allocation5 + $0x1a8] sm:$0xff]  ;;  %v373_v41 = vld [vmem:[#allocation5 + $0x1a0] sm:$0xff]  ;;  %v339_v4 = vld [vmem:[#allocation5 + $0x90] sm:$0xff] }
  0x92   : > { %2430 = vmatprep.subr.bf16.mxu1 %v2327_v21  ;;  %2328 = vmatprep.subr.bf16.mxu0 %v2327_v21  ;;  %v2339_v39 = vpack.c.bf16 %v374_v37, %v370_v36  ;;  %v378_v42 = vld [vmem:[#allocation5 + $0x1c8] sm:$0xff]  ;;  %v2341_v44 = vpack.c.bf16 %v373_v41, %v369_v40  ;;  %v377_v46 = vld [vmem:[#allocation5 + $0x1c0] sm:$0xff]  ;;  %v343_v5 = vld [vmem:[#allocation5 + $0xb0] sm:$0xff] }
  0x93   : > { %v382_v43 = vld [vmem:[#allocation5 + $0x1e8] sm:$0xff]  ;;  %v381_v47 = vld [vmem:[#allocation5 + $0x1e0] sm:$0xff]  ;;  %v348_v6 = vld [vmem:[#allocation5 + $0xd8] sm:$0xff]  ;;  %v2357_v10 = vpack.c.bf16 %v343_v5, %v339_v4 }
  0x94   : > { %v2343_v45 = vpack.c.bf16 %v382_v43, %v378_v42  ;;  %v2345_v50 = vpack.c.bf16 %v381_v47, %v377_v46  ;;  %v3145_v1 = vld [vmem:[%s3123_s16 + $0x88] sm:$0xff]  ;;  %v3155_v9 = vld [vmem:[%s3123_s16 + $0x90] sm:$0xff]  ;;  %v347_v12 = vld [vmem:[#allocation5 + $0xd0] sm:$0xff] }
  0x95   : > { %2438 = vmatpush1.bf16.msra.mxu1 %v2329_v26  ;;  %2330 = vmatpush1.bf16.msra.mxu0 %v2329_v26  ;;  %v352_v7 = vld [vmem:[#allocation5 + $0xf8] sm:$0xff]  ;;  %v351_v13 = vld [vmem:[#allocation5 + $0xf0] sm:$0xff]  ;;  %v3159_v16 = vld [vmem:[%s3123_s16 + $0x10] sm:$0xff] }
  0x96   : > { %2431 = vmatprep.subr.bf16.mxu1 %v2331_v27  ;;  %2332 = vmatprep.subr.bf16.mxu0 %v2331_v27  ;;  %v3149_v8 = vld [vmem:[%s3123_s16 + $0x8] sm:$0xff]  ;;  %v2359_v11 = vpack.c.bf16 %v352_v7, %v348_v6  ;;  %v3165_v17 = vld [vmem:[%s3123_s16 + $0x98] sm:$0xff]  ;;  %v2361_v18 = vpack.c.bf16 %v351_v13, %v347_v12  ;;  %v3175_v25 = vld [vmem:[%s3123_s16 + $0xa0] sm:$0xff] }
  0x97   : > { %v356_v14 = vld [vmem:[#allocation5 + $0x118] sm:$0xff]  ;;  %v355_v20 = vld [vmem:[#allocation5 + $0x110] sm:$0xff]  ;;  %v3195_v41 = vld [vmem:[%s3123_s16 + $0xb0] sm:$0xff] }
  0x98   : > { %v360_v15 = vld [vmem:[#allocation5 + $0x138] sm:$0xff]  ;;  %v359_v21 = vld [vmem:[#allocation5 + $0x130] sm:$0xff]  ;;  %v3199_v46 = vld [vmem:[%s3123_s16 + $0x30] sm:$0xff] }
  0x99   : > { %2439 = vmatpush1.bf16.msra.mxu1 %v2333_v32  ;;  %2334 = vmatpush1.bf16.msra.mxu0 %v2333_v32  ;;  %v2363_v19 = vpack.c.bf16 %v360_v15, %v356_v14  ;;  %v364_v22 = vld [vmem:[#allocation5 + $0x158] sm:$0xff]  ;;  %v3169_v24 = vld [vmem:[%s3123_s16 + $0x18] sm:$0xff]  ;;  %v2365_v26 = vpack.c.bf16 %v359_v21, %v355_v20  ;;  %v3232_v54 = vld [vmem:[%s3123_s16 + $0xd0] sm:$0xff] }
  0x9a   : > { %2432 = vmatprep.subr.bf16.mxu1 %v2335_v33  ;;  %2336 = vmatprep.subr.bf16.mxu0 %v2335_v33  ;;  %v368_v23 = vld [vmem:[#allocation5 + $0x178] sm:$0xff]  ;;  %v363_v28 = vld [vmem:[#allocation5 + $0x150] sm:$0xff]  ;;  %v298_v55 = vld [vmem:[%s3123_s16 + $0x50] sm:$0xff] }
  0x9b   : > { %v2367_v27 = vpack.c.bf16 %v368_v23, %v364_v22  ;;  %v367_v29 = vld [vmem:[#allocation5 + $0x170] sm:$0xff]  ;;  %v372_v30 = vld [vmem:[#allocation5 + $0x198] sm:$0xff]  ;;  %v1309_v7 = vld [vmem:[#allocation7 + $0x8] sm:$0xff] }
  0x9c   : > { %v376_v31 = vld [vmem:[#allocation5 + $0x1b8] sm:$0xff]  ;;  %v2369_v34 = vpack.c.bf16 %v367_v29, %v363_v28  ;;  %v371_v36 = vld [vmem:[#allocation5 + $0x190] sm:$0xff]  ;;  %v1312_v14 = vld [vmem:[#allocation7 + $0x20] sm:$0xff] }
  0x9d   : > { %2440 = vmatpush1.bf16.msra.mxu1 %v2337_v38  ;;  %2338 = vmatpush1.bf16.msra.mxu0 %v2337_v38  ;;  %v3179_v32 = vld [vmem:[%s3123_s16 + $0x20] sm:$0xff]  ;;  %v3185_v33 = vld [vmem:[%s3123_s16 + $0xa8] sm:$0xff]  ;;  %v2371_v35 = vpack.c.bf16 %v376_v31, %v372_v30  ;;  %v3205_v47 = vld [vmem:[%s3123_s16 + $0xb8] sm:$0xff] }
  0x9e   : > { %2433 = vmatprep.subr.bf16.mxu1 %v2339_v39  ;;  %2340 = vmatprep.subr.bf16.mxu0 %v2339_v39  ;;  %v375_v37 = vld [vmem:[#allocation5 + $0x1b0] sm:$0xff]  ;;  %v380_v38 = vld [vmem:[#allocation5 + $0x1d8] sm:$0xff]  ;;  %v1313_v15 = vld [vmem:[#allocation7 + $0x28] sm:$0xff] }
  0x9f   : > { %v384_v39 = vld [vmem:[#allocation5 + $0x1f8] sm:$0xff]  ;;  %v2373_v42 = vpack.c.bf16 %v375_v37, %v371_v36  ;;  %v3209_v49 = vld [vmem:[%s3123_s16 + $0x38] sm:$0xff]  ;;  %v1316_v21 = vld [vmem:[#allocation7 + $0x40] sm:$0xff] }
  0xa0   : > { %v3189_v40 = vld [vmem:[%s3123_s16 + $0x28] sm:$0xff]  ;;  %v2375_v43 = vpack.c.bf16 %v384_v39, %v380_v38  ;;  %v3246_v59 = vld [vmem:[%s3123_s16 + $0xe0] sm:$0xff]  ;;  %v3273_v4 = vld [vmem:[%s3123_s16 + $0xf8] sm:$0xff] }
  0xa1   : > { %2441 = vmatpush1.bf16.msra.mxu1 %v2341_v44  ;;  %2342 = vmatpush1.bf16.msra.mxu0 %v2341_v44  ;;  %v379_v44 = vld [vmem:[#allocation5 + $0x1d0] sm:$0xff]  ;;  %v3225_v52 = vld [vmem:[%s3123_s16 + $0xc8] sm:$0xff]  ;;  %v1317_v22 = vld [vmem:[#allocation7 + $0x48] sm:$0xff] }
  0xa2   : > { %2434 = vmatprep.subr.bf16.mxu1 %v2343_v45  ;;  %2344 = vmatprep.subr.bf16.mxu0 %v2343_v45  ;;  %v383_v45 = vld [vmem:[#allocation5 + $0x1f0] sm:$0xff]  ;;  %v297_v53 = vld [vmem:[%s3123_s16 + $0x48] sm:$0xff]  ;;  %v2392_v23 = vpack.c.bf16 %v1317_v22, %v1316_v21  ;;  %v1321_v29 = vld [vmem:[#allocation7 + $0x68] sm:$0xff] }
  0xa3   : > { %v2377_v48 = vpack.c.bf16 %v383_v45, %v379_v44  ;;  %v300_v60 = vld [vmem:[%s3123_s16 + $0x60] sm:$0xff]  ;;  %v3253_v61 = vld [vmem:[%s3123_s16 + $0xe8] sm:$0xff]  ;;  %v3277_v5 = vld [vmem:[%s3123_s16 + $0x78] sm:$0xff] }
  0xa4   : > { %v3257_v62 = vld [vmem:[%s3123_s16 + $0x68] sm:$0xff]  ;;  %v3283_v6 = vld [vmem:[%s3123_s16 + $0x100] sm:$0xff]  ;;  %v1325_v36 = vld [vmem:[#allocation7 + $0x88] sm:$0xff] }
  0xa5   : > { %2442 = vmatpush1.bf16.msra.mxu1 %v2345_v50  ;;  %2346 = vmatpush1.bf16.msra.mxu0 %v2345_v50  ;;  %v3215_v50 = vld [vmem:[%s3123_s16 + $0xc0] sm:$0xff]  ;;  %v1320_v28 = vld [vmem:[#allocation7 + $0x60] sm:$0xff]  ;;  %v1333_v45 = vld [vmem:[#allocation7 + $0xc8] sm:$0xff] }
  0xa6   : > { %2348 = vmatprep.subr.bf16.mxu1 %v2347_v51  ;;  %v3219_v51 = vld [vmem:[%s3123_s16 + $0x40] sm:$0xff]  ;;  %v2398_v30 = vpack.c.bf16 %v1321_v29, %v1320_v28  ;;  %v1328_v39 = vld [vmem:[#allocation7 + $0xa0] sm:$0xff] }
  0xa7   : > { %v1311_v12 = vld [vmem:[#allocation7 + $0x18] sm:$0xff]  ;;  %v1322_v31 = vld [vmem:[#allocation7 + $0x70] sm:$0xff]  ;;  %v1332_v44 = vld [vmem:[#allocation7 + $0xc0] sm:$0xff] }
  0xa8   : > { %546 = vmatmul.mubr.f32.vlgmr.msra.gmra.mrb[0].mxu1 %v3136_v56  ;;  %450 = vmatmul.mubr.f32.vlgmr.msra.gmra.mrb[0].mxu0 %v3139_v63  ;;  %v1326_v37 = vld [vmem:[#allocation7 + $0x90] sm:$0xff]  ;;  %v1327_v38 = vld [vmem:[#allocation7 + $0x98] sm:$0xff] }
  0xa9   : > { %2350 = vmatpush1.bf16.msra.mxu1 %v2349_v57  ;;  %551 = vmatprep.mubr.f32.mxu1 %v2911_v0  ;;  %v3239_v57 = vld [vmem:[%s3123_s16 + $0xd8] sm:$0xff] }
  0xaa   : > { %2352 = vmatprep.subr.bf16.mxu1 %v2351_v58  ;;  %455 = vmatprep.mubr.f32.mxu0 %v2911_v0  ;;  %v299_v58 = vld [vmem:[%s3123_s16 + $0x58] sm:$0xff] }
  0xac   : > { %552 = vmatmul.mubr.f32.gmra.mrb[2].mxu1 %v3145_v1  ;;  %456 = vmatmul.mubr.f32.gmra.mrb[2].mxu0 %v3149_v8 }
  0xad   : > { %557 = vmatprep.mubr.f32.mxu1 %v2911_v0  ;;  %2354 = vmatpush1.bf16.msra.mxu1 %v2353_v2  ;;  %v3263_v2 = vld [vmem:[%s3123_s16 + $0xf0] sm:$0xff] }
  0xae   : > { %2356 = vmatprep.subr.bf16.mxu1 %v2355_v3  ;;  %461 = vmatprep.mubr.f32.mxu0 %v2911_v0  ;;  %v3267_v3 = vld [vmem:[%s3123_s16 + $0x70] sm:$0xff] }
  0xb0   : > { %558 = vmatmul.mubr.f32.gmra.mrb[4].mxu1 %v3155_v9  ;;  %462 = vmatmul.mubr.f32.gmra.mrb[4].mxu0 %v3159_v16 }
  0xb1   : > { %563 = vmatprep.mubr.f32.mxu1 %v2911_v0  ;;  %2358 = vmatpush1.bf16.msra.mxu1 %v2357_v10  ;;  %v2912_v10 = vmov 0.0|0.0  }
  0xb2   : > { %2360 = vmatprep.subr.bf16.mxu1 %v2359_v11  ;;  %467 = vmatprep.mubr.f32.mxu0 %v2911_v0  ;;  %v1310_v11 = vld [vmem:[#allocation7 + $0x10] sm:$0xff] }
  0xb3   : > { %2379 = vmatprep.subr.bf16.mxu0 %v2912_v10  ;;  %v2383_v13 = vpack.c.bf16 %v1311_v12, %v1310_v11 }
  0xb4   : > { %564 = vmatmul.mubr.f32.gmra.mrb[6].mxu1 %v3165_v17  ;;  %468 = vmatmul.mubr.f32.gmra.mrb[6].mxu0 %v3169_v24 }
  0xb5   : > { %569 = vmatprep.mubr.f32.mxu1 %v2911_v0  ;;  %2362 = vmatpush1.bf16.msra.mxu1 %v2361_v18  ;;  %v1314_v18 = vld [vmem:[#allocation7 + $0x30] sm:$0xff] }
  0xb6   : > { %2364 = vmatprep.subr.bf16.mxu1 %v2363_v19  ;;  %473 = vmatprep.mubr.f32.mxu0 %v2911_v0  ;;  %v1315_v19 = vld [vmem:[#allocation7 + $0x38] sm:$0xff] }
  0xb7   : > { %v2389_v20 = vpack.c.bf16 %v1315_v19, %v1314_v18 }
  0xb8   : > { %570 = vmatmul.mubr.f32.gmra.mrb[8].mxu1 %v3175_v25  ;;  %474 = vmatmul.mubr.f32.gmra.mrb[8].mxu0 %v3179_v32 }
  0xb9   : > { %575 = vmatprep.mubr.f32.mxu1 %v2911_v0  ;;  %2366 = vmatpush1.bf16.msra.mxu1 %v2365_v26  ;;  %v1319_v26 = vld [vmem:[#allocation7 + $0x58] sm:$0xff] }
  0xba   : > { %2368 = vmatprep.subr.bf16.mxu1 %v2367_v27  ;;  %479 = vmatprep.mubr.f32.mxu0 %v2911_v0 }
  0xbc   : > { %576 = vmatmul.mubr.f32.gmra.mrb[10].mxu1 %v3185_v33  ;;  %480 = vmatmul.mubr.f32.gmra.mrb[10].mxu0 %v3189_v40 }
  0xbd   : > { %581 = vmatprep.mubr.f32.mxu1 %v2911_v0  ;;  %2370 = vmatpush1.bf16.msra.mxu1 %v2369_v34 }
  0xbe   : > { %2372 = vmatprep.subr.bf16.mxu1 %v2371_v35  ;;  %485 = vmatprep.mubr.f32.mxu0 %v2911_v0  ;;  %v1324_v35 = vld [vmem:[#allocation7 + $0x80] sm:$0xff] }
  0xc0   : > { %582 = vmatmul.mubr.f32.gmra.mrb[12].mxu1 %v3195_v41  ;;  %486 = vmatmul.mubr.f32.gmra.mrb[12].mxu0 %v3199_v46 }
  0xc1   : > { %587 = vmatprep.mubr.f32.mxu1 %v2911_v0  ;;  %2374 = vmatpush1.bf16.msra.mxu1 %v2373_v42  ;;  %v1330_v42 = vld [vmem:[#allocation7 + $0xb0] sm:$0xff] }
  0xc2   : > { %2376 = vmatprep.subr.bf16.mxu1 %v2375_v43  ;;  %491 = vmatprep.mubr.f32.mxu0 %v2911_v0  ;;  %v1331_v43 = vld [vmem:[#allocation7 + $0xb8] sm:$0xff] }
  0xc4   : > { %588 = vmatmul.mubr.f32.gmra.mrb[14].mxu1 %v3205_v47  ;;  %492 = vmatmul.mubr.f32.gmra.mrb[14].mxu0 %v3209_v49 }
  0xc5   : > { %593 = vmatprep.mubr.f32.mxu1 %v2911_v0  ;;  %2378 = vmatpush1.bf16.msra.mxu1 %v2377_v48  ;;  %v1335_v48 = vld [vmem:[#allocation7 + $0xd8] sm:$0xff] }
  0xc6   : > { %497 = vmatprep.mubr.f32.mxu0 %v2911_v0 }
  0xc8   : > { %594 = vmatmul.mubr.f32.gmra.mrb[16].mxu1 %v3215_v50  ;;  %498 = vmatmul.mubr.f32.gmra.mrb[16].mxu0 %v3219_v51 }
  0xc9   : > { %599 = vmatprep.mubr.f32.mxu1 %v2911_v0  ;;  %503 = vmatprep.mubr.f32.mxu0 %v2911_v0 }
  0xcc   : > { %600 = vmatmul.mubr.f32.gmra.mrb[18].mxu1 %v3225_v52  ;;  %504 = vmatmul.mubr.f32.gmra.mrb[18].mxu0 %v297_v53 }
  0xcd   : > { %605 = vmatprep.mubr.f32.mxu1 %v2911_v0  ;;  %509 = vmatprep.mubr.f32.mxu0 %v2911_v0 }
  0xd0   : > { %606 = vmatmul.mubr.f32.gmra.mrb[20].mxu1 %v3232_v54  ;;  %510 = vmatmul.mubr.f32.gmra.mrb[20].mxu0 %v298_v55 }
  0xd1   : > { %611 = vmatprep.mubr.f32.mxu1 %v2911_v0  ;;  %515 = vmatprep.mubr.f32.mxu0 %v2911_v0 }
  0xd4   : > { %612 = vmatmul.mubr.f32.gmra.mrb[22].mxu1 %v3239_v57  ;;  %516 = vmatmul.mubr.f32.gmra.mrb[22].mxu0 %v299_v58 }
  0xd5   : > { %617 = vmatprep.mubr.f32.mxu1 %v2911_v0  ;;  %521 = vmatprep.mubr.f32.mxu0 %v2911_v0 }
  0xd8   : > { %618 = vmatmul.mubr.f32.gmra.mrb[24].mxu1 %v3246_v59  ;;  %522 = vmatmul.mubr.f32.gmra.mrb[24].mxu0 %v300_v60 }
  0xd9   : > { %623 = vmatprep.mubr.f32.mxu1 %v2911_v0  ;;  %527 = vmatprep.mubr.f32.mxu0 %v2911_v0 }
  0xdc   : > { %624 = vmatmul.mubr.f32.gmra.mrb[26].mxu1 %v3253_v61  ;;  %528 = vmatmul.mubr.f32.gmra.mrb[26].mxu0 %v3257_v62 }
  0xdd   : > { %629 = vmatprep.mubr.f32.mxu1 %v2911_v0  ;;  %533 = vmatprep.mubr.f32.mxu0 %v2911_v0 }
  0xe0   : > { %630 = vmatmul.mubr.f32.gmra.mrb[28].mxu1 %v3263_v2  ;;  %534 = vmatmul.mubr.f32.gmra.mrb[28].mxu0 %v3267_v3 }
  0xe1   : > { %635 = vmatprep.mubr.f32.mxu1 %v2911_v0  ;;  %539 = vmatprep.mubr.f32.mxu0 %v2911_v0 }
  0xe4   : > { %636 = vmatmul.mubr.f32.gmra.mrb[30].mxu1 %v3273_v4  ;;  %540 = vmatmul.mubr.f32.gmra.mrb[30].mxu0 %v3277_v5 }
  0xe5   : > { %641 = vmatprep.mubr.f32.mxu1 %v2911_v0 }
  0xe8   : > { %642 = vmatmul.mubr.f32.gmra.mrb[32].mxu1 %v3283_v6 }
  0xe9   : > { %712 = vmatprep.mubr.f32.mxu1 %v2911_v0 }
  0xec   : > { %713 = vmatmul.mubr.f32.vlgmr.msra.gmra.mrb[34].mxu1 %v3139_v63  ;;  %v1308_v63 = vld [vmem:[#allocation7] sm:$0xff] }
  0xed   : > { %718 = vmatprep.mubr.f32.mxu1 %v2911_v0 }
  0xf0   : > { %719 = vmatmul.mubr.f32.gmra.mrb[36].mxu1 %v3149_v8  ;;  %v2380_v8 = vpack.c.bf16 %v1309_v7, %v1308_v63 }
  0xf1   : > { %724 = vmatprep.mubr.f32.mxu1 %v2911_v0 }
  0xf2   : > { %2381 = vmatpush1.bf16.msra.mxu0 %v2380_v8 }
  0xf3   : > { %2382 = vmatprep.subr.bf16.mxu0 %v2912_v10 }
  0xf4   : > { %725 = vmatmul.mubr.f32.gmra.mrb[38].mxu1 %v3159_v16  ;;  %v2386_v16 = vpack.c.bf16 %v1313_v15, %v1312_v14 }
  0xf5   : > { %730 = vmatprep.mubr.f32.mxu1 %v2911_v0 }
  0xf6   : > { %2384 = vmatpush1.bf16.msra.mxu0 %v2383_v13 }
  0xf7   : > { %2385 = vmatprep.subr.bf16.mxu0 %v2912_v10 }
  0xf8   : > { %731 = vmatmul.mubr.f32.gmra.mrb[40].mxu1 %v3169_v24  ;;  %v1318_v24 = vld [vmem:[#allocation7 + $0x50] sm:$0xff] }
  0xf9   : > { %736 = vmatprep.mubr.f32.mxu1 %v2911_v0  ;;  %v2395_v27 = vpack.c.bf16 %v1319_v26, %v1318_v24 }
  0xfa   : > { %2387 = vmatpush1.bf16.msra.mxu0 %v2386_v16 }
  0xfb   : > { %2388 = vmatprep.subr.bf16.mxu0 %v2912_v10 }
  0xfc   : > { %737 = vmatmul.mubr.f32.gmra.mrb[42].mxu1 %v3179_v32  ;;  %v1323_v32 = vld [vmem:[#allocation7 + $0x78] sm:$0xff] }
  0xfd   : > { %742 = vmatprep.mubr.f32.mxu1 %v2911_v0  ;;  %v2401_v34 = vpack.c.bf16 %v1323_v32, %v1322_v31 }
  0xfe   : > { %2390 = vmatpush1.bf16.msra.mxu0 %v2389_v20 }
  0xff   : > { %2391 = vmatprep.subr.bf16.mxu0 %v2912_v10 }
 0x100   : > { %743 = vmatmul.mubr.f32.gmra.mrb[44].mxu1 %v3189_v40  ;;  %v1329_v40 = vld [vmem:[#allocation7 + $0xa8] sm:$0xff] }
 0x101   : > { %748 = vmatprep.mubr.f32.mxu1 %v2911_v0 }
 0x102   : > { %2393 = vmatpush1.bf16.msra.mxu0 %v2392_v23 }
 0x103   : > { %2394 = vmatprep.subr.bf16.mxu0 %v2912_v10 }
 0x104   : > { %749 = vmatmul.mubr.f32.gmra.mrb[46].mxu1 %v3199_v46  ;;  %v1334_v46 = vld [vmem:[#allocation7 + $0xd0] sm:$0xff] }
 0x105   : > { %754 = vmatprep.mubr.f32.mxu1 %v2911_v0 }
 0x106   : > { %2396 = vmatpush1.bf16.msra.mxu0 %v2395_v27 }
 0x107   : > { %2397 = vmatprep.subr.bf16.mxu0 %v2912_v10 }
 0x108   : > { %755 = vmatmul.mubr.f32.gmra.mrb[48].mxu1 %v3209_v49  ;;  %v1336_v49 = vld [vmem:[#allocation7 + $0xe0] sm:$0xff] }
 0x109   : > { %760 = vmatprep.mubr.f32.mxu1 %v2911_v0 }
 0x10a   : > { %2399 = vmatpush1.bf16.msra.mxu0 %v2398_v30 }
 0x10b   : > { %2400 = vmatprep.subr.bf16.mxu0 %v2912_v10 }
 0x10c   : > { %761 = vmatmul.mubr.f32.gmra.mrb[50].mxu1 %v3219_v51  ;;  %v1337_v51 = vld [vmem:[#allocation7 + $0xe8] sm:$0xff] }
 0x10d   : > { %766 = vmatprep.mubr.f32.mxu1 %v2911_v0 }
 0x10e   : > { %2402 = vmatpush1.bf16.msra.mxu0 %v2401_v34 }
 0x10f   : > { %2403 = vmatprep.subr.bf16.mxu0 %v2912_v10 }
 0x110   : > { %767 = vmatmul.mubr.f32.gmra.mrb[52].mxu1 %v297_v53  ;;  %v1338_v53 = vld [vmem:[#allocation7 + $0xf0] sm:$0xff] }
 0x111   : > { %772 = vmatprep.mubr.f32.mxu1 %v2911_v0 }
 0x114   : > { %773 = vmatmul.mubr.f32.gmra.mrb[54].mxu1 %v298_v55  ;;  %v1339_v55 = vld [vmem:[#allocation7 + $0xf8] sm:$0xff] }
 0x115   : > { %778 = vmatprep.mubr.f32.mxu1 %v2911_v0 }
 0x118   : > { %779 = vmatmul.mubr.f32.gmra.mrb[56].mxu1 %v299_v58 }
 0x119   : > { %784 = vmatprep.mubr.f32.mxu1 %v2911_v0 }
 0x11c   : > { %785 = vmatmul.mubr.f32.gmra.mrb[58].mxu1 %v300_v60 }
 0x11d   : > { %790 = vmatprep.mubr.f32.mxu1 %v2911_v0 }
 0x120   : > { %791 = vmatmul.mubr.f32.gmra.mrb[60].mxu1 %v3257_v62 }
 0x121   : > { %796 = vmatprep.mubr.f32.mxu1 %v2911_v0 }
 0x124   : > { %797 = vmatmul.mubr.f32.gmra.mrb[62].mxu1 %v3267_v3 }
 0x125   : > { %802 = vmatprep.mubr.f32.mxu1 %v2911_v0 }
 0x128   : > { %803 = vmatmul.mubr.f32.gmra.mrb[64].mxu1 %v3277_v5 }
 0x129   : > { %808 = vmatprep.mubr.f32.mxu1 %v2911_v0 }
 0x12c   : > { %809 = vmatmul.mubr.f32.gmra.mrb[66].mxu1 %v3136_v56  ;;  %v2404_v56 = vpack.c.bf16 %v1325_v36, %v1324_v35 }
 0x12d   : > { %814 = vmatprep.mubr.f32.mxu1 %v2911_v0 }
 0x12e   : > { %2405 = vmatpush1.bf16.msra.mxu0 %v2404_v56 }
 0x12f   : > { %2406 = vmatprep.subr.bf16.mxu0 %v2912_v10 }
 0x130   : > { %815 = vmatmul.mubr.f32.gmra.mrb[68].mxu1 %v3145_v1  ;;  %v2407_v1 = vpack.c.bf16 %v1327_v38, %v1326_v37 }
 0x131   : > { %820 = vmatprep.mubr.f32.mxu1 %v2911_v0 }
 0x132   : > { %2408 = vmatpush1.bf16.msra.mxu0 %v2407_v1 }
 0x133   : > { %2409 = vmatprep.subr.bf16.mxu0 %v2912_v10 }
 0x134   : > { %821 = vmatmul.mubr.f32.gmra.mrb[70].mxu1 %v3155_v9  ;;  %v2410_v9 = vpack.c.bf16 %v1329_v40, %v1328_v39 }
 0x135   : > { %826 = vmatprep.mubr.f32.mxu1 %v2911_v0 }
 0x136   : > { %2411 = vmatpush1.bf16.msra.mxu0 %v2410_v9 }
 0x137   : > { %2412 = vmatprep.subr.bf16.mxu0 %v2912_v10 }
 0x138   : > { %827 = vmatmul.mubr.f32.gmra.mrb[72].mxu1 %v3165_v17  ;;  %v2413_v17 = vpack.c.bf16 %v1331_v43, %v1330_v42 }
 0x139   : > { %832 = vmatprep.mubr.f32.mxu1 %v2911_v0 }
 0x13a   : > { %2414 = vmatpush1.bf16.msra.mxu0 %v2413_v17 }
 0x13b   : > { %2415 = vmatprep.subr.bf16.mxu0 %v2912_v10 }
 0x13c   : > { %833 = vmatmul.mubr.f32.gmra.mrb[74].mxu1 %v3175_v25  ;;  %v2416_v25 = vpack.c.bf16 %v1333_v45, %v1332_v44 }
 0x13d   : > { %838 = vmatprep.mubr.f32.mxu1 %v2911_v0 }
 0x13e   : > { %2417 = vmatpush1.bf16.msra.mxu0 %v2416_v25 }
 0x13f   : > { %2418 = vmatprep.subr.bf16.mxu0 %v2912_v10 }
 0x140   : > { %839 = vmatmul.mubr.f32.gmra.mrb[76].mxu1 %v3185_v33  ;;  %v2419_v33 = vpack.c.bf16 %v1335_v48, %v1334_v46 }
 0x141   : > { %844 = vmatprep.mubr.f32.mxu1 %v2911_v0 }
 0x142   : > { %2420 = vmatpush1.bf16.msra.mxu0 %v2419_v33 }
 0x143   : > { %2421 = vmatprep.subr.bf16.mxu0 %v2912_v10 }
 0x144   : > { %845 = vmatmul.mubr.f32.gmra.mrb[78].mxu1 %v3195_v41  ;;  %v2422_v41 = vpack.c.bf16 %v1337_v51, %v1336_v49 }
 0x145   : > { %850 = vmatprep.mubr.f32.mxu1 %v2911_v0 }
 0x146   : > { %2423 = vmatpush1.bf16.msra.mxu0 %v2422_v41 }
 0x147   : > { %2424 = vmatprep.subr.bf16.mxu0 %v2912_v10 }
 0x148   : > { %851 = vmatmul.mubr.f32.gmra.mrb[80].mxu1 %v3205_v47  ;;  %v2425_v47 = vpack.c.bf16 %v1339_v55, %v1338_v53 }
 0x149   : > { %856 = vmatprep.mubr.f32.mxu1 %v2911_v0 }
 0x14a   : > { %2426 = vmatpush1.bf16.msra.mxu0 %v2425_v47 }
 0x14c   : > { %857 = vmatmul.mubr.f32.gmra.mrb[82].mxu1 %v3215_v50 }
 0x14d   : > { %862 = vmatprep.mubr.f32.mxu1 %v2911_v0 }
 0x150   : > { %863 = vmatmul.mubr.f32.gmra.mrb[84].mxu1 %v3225_v52 }
 0x151   : > { %868 = vmatprep.mubr.f32.mxu1 %v2911_v0 }
 0x154   : > { %869 = vmatmul.mubr.f32.gmra.mrb[86].mxu1 %v3232_v54 }
 0x155   : > { %874 = vmatprep.mubr.f32.mxu1 %v2911_v0 }
 0x158   : > { %875 = vmatmul.mubr.f32.gmra.mrb[88].mxu1 %v3239_v57 }
 0x159   : > { %880 = vmatprep.mubr.f32.mxu1 %v2911_v0 }
 0x15c   : > { %881 = vmatmul.mubr.f32.gmra.mrb[90].mxu1 %v3246_v59 }
 0x15d   : > { %886 = vmatprep.mubr.f32.mxu1 %v2911_v0 }
 0x160   : > { %887 = vmatmul.mubr.f32.gmra.mrb[92].mxu1 %v3253_v61 }
 0x161   : > { %892 = vmatprep.mubr.f32.mxu1 %v2911_v0 }
 0x164   : > { %893 = vmatmul.mubr.f32.gmra.mrb[94].mxu1 %v3263_v2 }
 0x165   : > { %898 = vmatprep.mubr.f32.mxu1 %v2911_v0 }
 0x168   : > { %899 = vmatmul.mubr.f32.gmra.mrb[96].mxu1 %v3273_v4 }
 0x169   : > { %904 = vmatprep.mubr.f32.mxu1 %v2911_v0 }
 0x16c   : > { %905 = vmatmul.mubr.f32.gmra.mrb[98].mxu1 %v3283_v6 }
 0x17b   : > { %v3364_v50 = vpop.f32.mrb[0].mxu1  ;;  %v3366_v52 = vpop.f32.mrb[0].mxu0 }
 0x17c   : > { %v3368_v54 = vpop.f32.mrb[1].mxu1  ;;  %v3370_v57 = vpop.f32.mrb[1].mxu0 }
 0x17f   : > { %v3372_v58 = vpop.f32.mrb[2].mxu1  ;;  %v3374_v59 = vpop.f32.mrb[2].mxu0 }
 0x180   : > { %v3376_v60 = vpop.f32.mrb[3].mxu1  ;;  %v3378_v61 = vpop.f32.mrb[3].mxu0 }
 0x183   : > { %v3380_v62 = vpop.f32.mrb[4].mxu1  ;;  %v3382_v0 = vpop.f32.mrb[4].mxu0 }
 0x184   : > { %4142 = vst [vmem:[#allocation13_spill] sm:$0xff] %v3380_v62  ;;  %v3384_v2 = vpop.f32.mrb[5].mxu1  ;;  %v3386_v3 = vpop.f32.mrb[5].mxu0 }
 0x185   : > { %4143 = vst [vmem:[#allocation14_spill] sm:$0xff] %v3384_v2 }
 0x187   : > { %v3388_v4 = vpop.f32.mrb[6].mxu1  ;;  %v3390_v5 = vpop.f32.mrb[6].mxu0 }
 0x188   : > { %4144 = vst [vmem:[#allocation15_spill] sm:$0xff] %v3388_v4  ;;  %v3392_v6 = vpop.f32.mrb[7].mxu1  ;;  %v3394_v63 = vpop.f32.mrb[7].mxu0 }
 0x189   : > { %4145 = vst [vmem:[#allocation16_spill] sm:$0xff] %v3392_v6 }
 0x18b   : > { %v3396_v7 = vpop.f32.mrb[8].mxu1  ;;  %v3398_v8 = vpop.f32.mrb[8].mxu0 }
 0x18c   : > { %4146 = vst [vmem:[#allocation17_spill] sm:$0xff] %v3396_v7  ;;  %v3400_v10 = vpop.f32.mrb[9].mxu1  ;;  %v3402_v11 = vpop.f32.mrb[9].mxu0 }
 0x18d   : > { %4147 = vst [vmem:[#allocation18_spill] sm:$0xff] %v3400_v10 }
 0x18f   : > { %v3404_v12 = vpop.f32.mrb[10].mxu1  ;;  %v3406_v13 = vpop.f32.mrb[10].mxu0 }
 0x190   : > { %4148 = vst [vmem:[#allocation19_spill] sm:$0xff] %v3404_v12  ;;  %v3408_v14 = vpop.f32.mrb[11].mxu1  ;;  %v3410_v15 = vpop.f32.mrb[11].mxu0 }
 0x191   : > { %4149 = vst [vmem:[#allocation20_spill] sm:$0xff] %v3408_v14 }
 0x193   : > { %v3412_v16 = vpop.f32.mrb[12].mxu1  ;;  %v3414_v18 = vpop.f32.mrb[12].mxu0 }
 0x194   : > { %4150 = vst [vmem:[#allocation21_spill] sm:$0xff] %v3412_v16  ;;  %v3416_v19 = vpop.f32.mrb[13].mxu1  ;;  %v3418_v20 = vpop.f32.mrb[13].mxu0 }
 0x195   : > { %4151 = vst [vmem:[#allocation22_spill] sm:$0xff] %v3416_v19 }
 0x197   : > { %v3420_v21 = vpop.f32.mrb[14].mxu1  ;;  %v3422_v22 = vpop.f32.mrb[14].mxu0 }
 0x198   : > { %4152 = vst [vmem:[#allocation23_spill] sm:$0xff] %v3420_v21  ;;  %v3424_v23 = vpop.f32.mrb[15].mxu1  ;;  %v3426_v24 = vpop.f32.mrb[15].mxu0 }
 0x199   : > { %4153 = vst [vmem:[#allocation24_spill] sm:$0xff] %v3424_v23 }
 0x19b   : > { %v3428_v26 = vpop.f32.mrb[16].mxu1  ;;  %v3430_v27 = vpop.f32.mrb[16].mxu0 }
 0x19c   : > { %4154 = vst [vmem:[#allocation25_spill] sm:$0xff] %v3428_v26  ;;  %v3432_v28 = vpop.f32.mrb[17].mxu1  ;;  %v3434_v29 = vpop.f32.mrb[17].mxu0 }
 0x19d   : > { %4155 = vst [vmem:[#allocation26_spill] sm:$0xff] %v3432_v28 }
 0x19f   : > { %v3436_v30 = vpop.f32.mrb[18].mxu1  ;;  %v3438_v31 = vpop.f32.mrb[18].mxu0 }
 0x1a0   : > { %4156 = vst [vmem:[#allocation27_spill] sm:$0xff] %v3436_v30  ;;  %v3440_v32 = vpop.f32.mrb[19].mxu1  ;;  %v3442_v34 = vpop.f32.mrb[19].mxu0 }
 0x1a1   : > { %4157 = vst [vmem:[#allocation28_spill] sm:$0xff] %v3440_v32 }
 0x1a3   : > { %v3444_v35 = vpop.f32.mrb[20].mxu1  ;;  %v3446_v36 = vpop.f32.mrb[20].mxu0 }
 0x1a4   : > { %4158 = vst [vmem:[#allocation29_spill] sm:$0xff] %v3444_v35  ;;  %v3448_v56 = vpop.f32.mrb[21].mxu1  ;;  %v3450_v37 = vpop.f32.mrb[21].mxu0 }
 0x1a5   : > { %4159 = vst [vmem:[#allocation30_spill] sm:$0xff] %v3448_v56 }
 0x1a7   : > { %v3452_v38 = vpop.f32.mrb[22].mxu1  ;;  %v3454_v1 = vpop.f32.mrb[22].mxu0 }
 0x1a8   : > { %4160 = vst [vmem:[#allocation31_spill] sm:$0xff] %v3452_v38  ;;  %v3456_v39 = vpop.f32.mrb[23].mxu1  ;;  %v3458_v40 = vpop.f32.mrb[23].mxu0 }
 0x1a9   : > { %4161 = vst [vmem:[#allocation32_spill] sm:$0xff] %v3456_v39 }
 0x1ab   : > { %v3460_v9 = vpop.f32.mrb[24].mxu1  ;;  %v3462_v42 = vpop.f32.mrb[24].mxu0 }
 0x1ac   : > { %4162 = vst [vmem:[#allocation33_spill] sm:$0xff] %v3460_v9  ;;  %v3464_v43 = vpop.f32.mrb[25].mxu1  ;;  %v3466_v17 = vpop.f32.mrb[25].mxu0 }
 0x1ad   : > { %4163 = vst [vmem:[#allocation34_spill] sm:$0xff] %v3464_v43 }
 0x1af   : > { %v3468_v44 = vpop.f32.mrb[26].mxu1  ;;  %v3470_v45 = vpop.f32.mrb[26].mxu0 }
 0x1b0   : > { %4164 = vst [vmem:[#allocation35_spill] sm:$0xff] %v3468_v44  ;;  %v3472_v25 = vpop.f32.mrb[27].mxu1  ;;  %v3474_v46 = vpop.f32.mrb[27].mxu0 }
 0x1b1   : > { %4165 = vst [vmem:[#allocation36_spill] sm:$0xff] %v3472_v25 }
 0x1b3   : > { %v3476_v48 = vpop.f32.mrb[28].mxu1  ;;  %v3478_v33 = vpop.f32.mrb[28].mxu0 }
 0x1b4   : > { %4166 = vst [vmem:[#allocation37_spill] sm:$0xff] %v3476_v48  ;;  %v3480_v49 = vpop.f32.mrb[29].mxu1  ;;  %v3482_v51 = vpop.f32.mrb[29].mxu0 }
 0x1b5   : > { %4167 = vst [vmem:[#allocation38_spill] sm:$0xff] %v3480_v49 }
 0x1b7   : > { %v3484_v41 = vpop.f32.mrb[30].mxu1  ;;  %v3486_v53 = vpop.f32.mrb[30].mxu0 }
 0x1b8   : > { %4168 = vst [vmem:[#allocation39_spill] sm:$0xff] %v3484_v41  ;;  %v3488_v55 = vpop.f32.mrb[31].mxu1  ;;  %v3490_v47 = vpop.f32.mrb[31].mxu0 }
 0x1b9   : > { %4169 = vst [vmem:[#allocation40_spill] sm:$0xff] %v3488_v55 }
 0x1bb   : > { %v3492_v44 = vpop.f32.mrb[32].mxu1 }
 0x1bc   : > { %4170 = vst [vmem:[#allocation41_spill] sm:$0xff] %v3492_v44  ;;  %v3494_v25 = vpop.f32.mrb[33].mxu1 }
 0x1bd   : > { %4171 = vst [vmem:[#allocation42_spill] sm:$0xff] %v3494_v25 }
 0x1bf   : > { %v714_v43 = vpop.f32.mrb[34].mxu1 }
 0x1c0   : > { %v978_v48 = vmul.f32 0.70710677, %v714_v43  ;;  %v716_v9 = vpop.f32.mrb[35].mxu1  ;;  %v911_v21 = vmul.f32 0.5, %v714_v43 }
 0x1c1   : > { %v979_v39 = vmul.f32 0.70710677, %v716_v9  ;;  %v912_v19 = vmul.f32 0.5, %v716_v9 }
 0x1c2   : > { %2515 = verf.f32 %v978_v48 }
 0x1c3   : > { %2517 = verf.f32 %v979_v39  ;;  %v720_v49 = vpop.f32.mrb[36].mxu1 }
 0x1c4   : > { %v980_v38 = vmul.f32 0.70710677, %v720_v49  ;;  %v722_v56 = vpop.f32.mrb[37].mxu1 }
 0x1c5   : > { %v981_v41 = vmul.f32 0.70710677, %v722_v56  ;;  %v914_v62 = vmul.f32 0.5, %v722_v56 }
 0x1c6   : > { %2519 = verf.f32 %v980_v38 }
 0x1c7   : > { %2521 = verf.f32 %v981_v41  ;;  %v726_v35 = vpop.f32.mrb[38].mxu1 }
 0x1c8   : > { %v982_v55 = vmul.f32 0.70710677, %v726_v35  ;;  %v728_v32 = vpop.f32.mrb[39].mxu1 }
 0x1c9   : > { %v983_v30 = vmul.f32 0.70710677, %v728_v32  ;;  %v916_v56 = vmul.f32 0.5, %v728_v32 }
 0x1ca   : > { %2523 = verf.f32 %v982_v55 }
 0x1cb   : > { %2525 = verf.f32 %v983_v30  ;;  %v732_v44 = vpop.f32.mrb[40].mxu1  ;;  %v913_v30 = vmul.f32 0.5, %v720_v49 }
 0x1cc   : > { %v2516_v25 = vpop.eup %2515  ;;  %v984_v28 = vmul.f32 0.70710677, %v732_v44  ;;  %v734_v26 = vpop.f32.mrb[41].mxu1 }
 0x1cd   : > { %v2518_v23 = vpop.eup %2517  ;;  %v985_v48 = vmul.f32 0.70710677, %v734_v26  ;;  %v1110_v39 = vadd.f32 1.0, %v2516_v25  ;;  %v918_v32 = vmul.f32 0.5, %v734_v26 }
 0x1ce   : > { %2527 = verf.f32 %v984_v28  ;;  %v1111_v16 = vadd.f32 1.0, %v2518_v23 }
 0x1cf   : > { %2529 = verf.f32 %v985_v48  ;;  %v738_v38 = vpop.f32.mrb[42].mxu1  ;;  %v1176_v41 = vmul.f32 %v1110_v39, %v911_v21 }
 0x1d0   : > { %v2520_v14 = vpop.eup %2519  ;;  %v986_v12 = vmul.f32 0.70710677, %v738_v38  ;;  %v740_v10 = vpop.f32.mrb[43].mxu1  ;;  %v1177_v7 = vmul.f32 %v1111_v16, %v912_v19  ;;  %v915_v19 = vmul.f32 0.5, %v726_v35  ;;  %v917_v35 = vmul.f32 0.5, %v732_v44 }
 0x1d1   : > { %v2522_v55 = vpop.eup %2521  ;;  %v1242_v6 = vmul.f32 %v1176_v41, %v3366_v52  ;;  %v987_v4 = vmul.f32 0.70710677, %v740_v10  ;;  %v1112_v2 = vadd.f32 1.0, %v2520_v14  ;;  %v919_v44 = vmul.f32 0.5, %v738_v38 }
 0x1d2   : > { %2531 = verf.f32 %v986_v12  ;;  %v1243_v43 = vmul.f32 %v1177_v7, %v3370_v57  ;;  %v1113_v9 = vadd.f32 1.0, %v2522_v55  ;;  %v920_v26 = vmul.f32 0.5, %v740_v10 }
 0x1d3   : > { %2533 = verf.f32 %v987_v4  ;;  %v744_v23 = vpop.f32.mrb[44].mxu1  ;;  %v1178_v28 = vmul.f32 %v1112_v2, %v913_v30 }
 0x1d4   : > { %v2524_v25 = vpop.eup %2523  ;;  %v988_v21 = vmul.f32 0.70710677, %v744_v23  ;;  %v746_v48 = vpop.f32.mrb[45].mxu1  ;;  %1404 = vmatprep.mubr.f32.mxu0 %v1243_v43  ;;  %v1179_v39 = vmul.f32 %v1113_v9, %v914_v62  ;;  %v921_v38 = vmul.f32 0.5, %v744_v23 }
 0x1d5   : > { %v2526_v16 = vpop.eup %2525  ;;  %v1244_v49 = vmul.f32 %v1178_v28, %v3374_v59  ;;  %v989_v52 = vmul.f32 0.70710677, %v746_v48  ;;  %1405 = vmatmul.mubr.f32.vlgmr.msra.gmra.mrb[32].mxu0 %v1242_v6  ;;  %v1114_v14 = vadd.f32 1.0, %v2524_v25  ;;  %v922_v10 = vmul.f32 0.5, %v746_v48 }
 0x1d6   : > { %2535 = verf.f32 %v988_v21  ;;  %v1245_v57 = vmul.f32 %v1179_v39, %v3378_v61  ;;  %v1115_v7 = vadd.f32 1.0, %v2526_v16 }
 0x1d7   : > { %2537 = verf.f32 %v989_v52  ;;  %v750_v4 = vpop.f32.mrb[46].mxu1  ;;  %v1180_v2 = vmul.f32 %v1114_v14, %v915_v19 }
 0x1d8   : > { %v2528_v12 = vpop.eup %2527  ;;  %v990_v41 = vmul.f32 0.70710677, %v750_v4  ;;  %v752_v55 = vpop.f32.mrb[47].mxu1  ;;  %1409 = vmatprep.mubr.f32.mxu0 %v1245_v57  ;;  %v1181_v62 = vmul.f32 %v1115_v7, %v916_v56  ;;  %v923_v23 = vmul.f32 0.5, %v750_v4 }
 0x1d9   : > { %v2530_v30 = vpop.eup %2529  ;;  %v1246_v59 = vmul.f32 %v1180_v2, %v3382_v0  ;;  %v991_v43 = vmul.f32 0.70710677, %v752_v55  ;;  %1410 = vmatmul.mubr.f32.gmra.mrb[34].mxu0 %v1244_v49  ;;  %v1116_v6 = vadd.f32 1.0, %v2528_v12  ;;  %v924_v48 = vmul.f32 0.5, %v752_v55 }
 0x1da   : > { %2539 = verf.f32 %v990_v41  ;;  %v1247_v61 = vmul.f32 %v1181_v62, %v3386_v3  ;;  %v1117_v9 = vadd.f32 1.0, %v2530_v30 }
 0x1db   : > { %2541 = verf.f32 %v991_v43  ;;  %v756_v28 = vpop.f32.mrb[48].mxu1  ;;  %v1182_v25 = vmul.f32 %v1116_v6, %v917_v35 }
 0x1dc   : > { %v2532_v21 = vpop.eup %2531  ;;  %v992_v39 = vmul.f32 0.70710677, %v756_v28  ;;  %v758_v16 = vpop.f32.mrb[49].mxu1  ;;  %1414 = vmatprep.mubr.f32.mxu0 %v1247_v61  ;;  %v1183_v19 = vmul.f32 %v1117_v9, %v918_v32  ;;  %v925_v4 = vmul.f32 0.5, %v756_v28 }
 0x1dd   : > { %v2534_v52 = vpop.eup %2533  ;;  %v1248_v0 = vmul.f32 %v1182_v25, %v3390_v5  ;;  %v993_v14 = vmul.f32 0.70710677, %v758_v16  ;;  %1415 = vmatmul.mubr.f32.gmra.mrb[36].mxu0 %v1246_v59  ;;  %v1118_v49 = vadd.f32 1.0, %v2532_v21  ;;  %v926_v55 = vmul.f32 0.5, %v758_v16 }
 0x1de   : > { %2543 = verf.f32 %v992_v39  ;;  %v1249_v3 = vmul.f32 %v1183_v19, %v3394_v63  ;;  %v1119_v56 = vadd.f32 1.0, %v2534_v52 }
 0x1df   : > { %2545 = verf.f32 %v993_v14  ;;  %v762_v57 = vpop.f32.mrb[50].mxu1  ;;  %v1184_v7 = vmul.f32 %v1118_v49, %v919_v44 }
 0x1e0   : > { %v2536_v2 = vpop.eup %2535  ;;  %v994_v12 = vmul.f32 0.70710677, %v762_v57  ;;  %v764_v41 = vpop.f32.mrb[51].mxu1  ;;  %1419 = vmatprep.mubr.f32.mxu0 %v1249_v3  ;;  %v1185_v62 = vmul.f32 %v1119_v56, %v920_v26  ;;  %v927_v28 = vmul.f32 0.5, %v762_v57 }
 0x1e1   : > { %v2538_v30 = vpop.eup %2537  ;;  %v1250_v5 = vmul.f32 %v1184_v7, %v3398_v8  ;;  %v995_v35 = vmul.f32 0.70710677, %v764_v41  ;;  %1420 = vmatmul.mubr.f32.gmra.mrb[38].mxu0 %v1248_v0  ;;  %v1120_v59 = vadd.f32 1.0, %v2536_v2  ;;  %v928_v16 = vmul.f32 0.5, %v764_v41 }
 0x1e2   : > { %2547 = verf.f32 %v994_v12  ;;  %v1251_v63 = vmul.f32 %v1185_v62, %v3402_v11  ;;  %v1121_v43 = vadd.f32 1.0, %v2538_v30 }
 0x1e3   : > { %2549 = verf.f32 %v995_v35  ;;  %v768_v6 = vpop.f32.mrb[52].mxu1  ;;  %v1186_v32 = vmul.f32 %v1120_v59, %v921_v38 }
 0x1e4   : > { %v2540_v61 = vpop.eup %2539  ;;  %v996_v9 = vmul.f32 0.70710677, %v768_v6  ;;  %v770_v25 = vpop.f32.mrb[53].mxu1  ;;  %1424 = vmatprep.mubr.f32.mxu0 %v1251_v63  ;;  %v1187_v21 = vmul.f32 %v1121_v43, %v922_v10  ;;  %v929_v57 = vmul.f32 0.5, %v768_v6 }
 0x1e5   : > { %v2542_v39 = vpop.eup %2541  ;;  %v1252_v8 = vmul.f32 %v1186_v32, %v3406_v13  ;;  %v997_v19 = vmul.f32 0.70710677, %v770_v25  ;;  %1425 = vmatmul.mubr.f32.gmra.mrb[40].mxu0 %v1250_v5  ;;  %v1122_v52 = vadd.f32 1.0, %v2540_v61  ;;  %v930_v41 = vmul.f32 0.5, %v770_v25 }
 0x1e6   : > { %2551 = verf.f32 %v996_v9  ;;  %v1253_v11 = vmul.f32 %v1187_v21, %v3410_v15  ;;  %v1123_v44 = vadd.f32 1.0, %v2542_v39 }
 0x1e7   : > { %2553 = verf.f32 %v997_v19  ;;  %v774_v0 = vpop.f32.mrb[54].mxu1  ;;  %v1188_v14 = vmul.f32 %v1122_v52, %v923_v23 }
 0x1e8   : > { %v2544_v49 = vpop.eup %2543  ;;  %v998_v26 = vmul.f32 0.70710677, %v774_v0  ;;  %v776_v3 = vpop.f32.mrb[55].mxu1  ;;  %1429 = vmatprep.mubr.f32.mxu0 %v1253_v11  ;;  %v1189_v56 = vmul.f32 %v1123_v44, %v924_v48  ;;  %v931_v6 = vmul.f32 0.5, %v774_v0 }
 0x1e9   : > { %v2546_v7 = vpop.eup %2545  ;;  %v1254_v13 = vmul.f32 %v1188_v14, %v3414_v18  ;;  %v999_v2 = vmul.f32 0.70710677, %v776_v3  ;;  %1430 = vmatmul.mubr.f32.gmra.mrb[42].mxu0 %v1252_v8  ;;  %v1124_v12 = vadd.f32 1.0, %v2544_v49  ;;  %v932_v25 = vmul.f32 0.5, %v776_v3 }
 0x1ea   : > { %2555 = verf.f32 %v998_v26  ;;  %v1255_v15 = vmul.f32 %v1189_v56, %v3418_v20  ;;  %v1125_v62 = vadd.f32 1.0, %v2546_v7 }
 0x1eb   : > { %2557 = verf.f32 %v999_v2  ;;  %v780_v30 = vpop.f32.mrb[56].mxu1  ;;  %v1190_v38 = vmul.f32 %v1124_v12, %v925_v4 }
 0x1ec   : > { %v2548_v5 = vpop.eup %2547  ;;  %v1000_v35 = vmul.f32 0.70710677, %v780_v30  ;;  %v782_v59 = vpop.f32.mrb[57].mxu1  ;;  %1434 = vmatprep.mubr.f32.mxu0 %v1255_v15  ;;  %v1191_v10 = vmul.f32 %v1125_v62, %v926_v55  ;;  %v933_v0 = vmul.f32 0.5, %v780_v30 }
 0x1ed   : > { %v2550_v63 = vpop.eup %2549  ;;  %v1256_v18 = vmul.f32 %v1190_v38, %v3422_v22  ;;  %v1001_v43 = vmul.f32 0.70710677, %v782_v59  ;;  %1435 = vmatmul.mubr.f32.gmra.mrb[44].mxu0 %v1254_v13  ;;  %v1126_v32 = vadd.f32 1.0, %v2548_v5  ;;  %v934_v3 = vmul.f32 0.5, %v782_v59 }
 0x1ee   : > { %2559 = verf.f32 %v1000_v35  ;;  %v1257_v20 = vmul.f32 %v1191_v10, %v3426_v24  ;;  %v1127_v61 = vadd.f32 1.0, %v2550_v63 }
 0x1ef   : > { %2561 = verf.f32 %v1001_v43  ;;  %v786_v9 = vpop.f32.mrb[58].mxu1  ;;  %v1192_v21 = vmul.f32 %v1126_v32, %v927_v28 }
 0x1f0   : > { %v2552_v39 = vpop.eup %2551  ;;  %v1002_v23 = vmul.f32 0.70710677, %v786_v9  ;;  %v788_v8 = vpop.f32.mrb[59].mxu1  ;;  %1439 = vmatprep.mubr.f32.mxu0 %v1257_v20  ;;  %v1193_v19 = vmul.f32 %v1127_v61, %v928_v16  ;;  %v935_v30 = vmul.f32 0.5, %v786_v9 }
 0x1f1   : > { %v2554_v52 = vpop.eup %2553  ;;  %v1258_v22 = vmul.f32 %v1192_v21, %v3430_v27  ;;  %v1003_v48 = vmul.f32 0.70710677, %v788_v8  ;;  %1440 = vmatmul.mubr.f32.gmra.mrb[46].mxu0 %v1256_v18  ;;  %v1128_v11 = vadd.f32 1.0, %v2552_v39  ;;  %v936_v59 = vmul.f32 0.5, %v788_v8 }
 0x1f2   : > { %2563 = verf.f32 %v1002_v23  ;;  %v1259_v24 = vmul.f32 %v1193_v19, %v3434_v29  ;;  %v1129_v44 = vadd.f32 1.0, %v2554_v52 }
 0x1f3   : > { %2565 = verf.f32 %v1003_v48  ;;  %v792_v14 = vpop.f32.mrb[60].mxu1  ;;  %v1194_v49 = vmul.f32 %v1128_v11, %v929_v57 }
 0x1f4   : > { %v2556_v26 = vpop.eup %2555  ;;  %v1004_v56 = vmul.f32 0.70710677, %v792_v14  ;;  %v794_v7 = vpop.f32.mrb[61].mxu1  ;;  %1444 = vmatprep.mubr.f32.mxu0 %v1259_v24  ;;  %v1195_v4 = vmul.f32 %v1129_v44, %v930_v41  ;;  %v937_v9 = vmul.f32 0.5, %v792_v14 }
 0x1f5   : > { %v2558_v13 = vpop.eup %2557  ;;  %v1260_v27 = vmul.f32 %v1194_v49, %v3438_v31  ;;  %v1005_v2 = vmul.f32 0.70710677, %v794_v7  ;;  %1445 = vmatmul.mubr.f32.gmra.mrb[48].mxu0 %v1258_v22  ;;  %v1130_v12 = vadd.f32 1.0, %v2556_v26  ;;  %v938_v8 = vmul.f32 0.5, %v794_v7 }
 0x1f6   : > { %2567 = verf.f32 %v1004_v56  ;;  %v1261_v29 = vmul.f32 %v1195_v4, %v3442_v34  ;;  %v1131_v55 = vadd.f32 1.0, %v2558_v13 }
 0x1f7   : > { %2569 = verf.f32 %v1005_v2  ;;  %v798_v15 = vpop.f32.mrb[62].mxu1  ;;  %v1196_v62 = vmul.f32 %v1130_v12, %v931_v6 }
 0x1f8   : > { %v2560_v38 = vpop.eup %2559  ;;  %v1006_v5 = vmul.f32 0.70710677, %v798_v15  ;;  %v800_v35 = vpop.f32.mrb[63].mxu1  ;;  %1449 = vmatprep.mubr.f32.mxu0 %v1261_v29  ;;  %v1197_v10 = vmul.f32 %v1131_v55, %v932_v25  ;;  %v939_v29 = vmul.f32 0.5, %v798_v15 }
 0x1f9   : > { %v2562_v63 = vpop.eup %2561  ;;  %v1262_v31 = vmul.f32 %v1196_v62, %v3446_v36  ;;  %v1007_v28 = vmul.f32 0.70710677, %v800_v35  ;;  %1450 = vmatmul.mubr.f32.gmra.mrb[50].mxu0 %v1260_v27  ;;  %v1132_v18 = vadd.f32 1.0, %v2560_v38  ;;  %v940_v62 = vmul.f32 0.5, %v800_v35 }
 0x1fa   : > { %2571 = verf.f32 %v1006_v5  ;;  %v1263_v34 = vmul.f32 %v1197_v10, %v3450_v37  ;;  %v1133_v43 = vadd.f32 1.0, %v2562_v63 }
 0x1fb   : > { %2573 = verf.f32 %v1007_v28  ;;  %v804_v32 = vpop.f32.mrb[64].mxu1  ;;  %v1198_v16 = vmul.f32 %v1132_v18, %v933_v0 }
 0x1fc   : > { %v2564_v20 = vpop.eup %2563  ;;  %v1008_v61 = vmul.f32 0.70710677, %v804_v32  ;;  %v806_v21 = vpop.f32.mrb[65].mxu1  ;;  %1454 = vmatprep.mubr.f32.mxu0 %v1263_v34  ;;  %v1199_v39 = vmul.f32 %v1133_v43, %v934_v3 }
 0x1fd   : > { %v2566_v23 = vpop.eup %2565  ;;  %v1264_v36 = vmul.f32 %v1198_v16, %v3454_v1  ;;  %v1009_v19 = vmul.f32 0.70710677, %v806_v21  ;;  %1455 = vmatmul.mubr.f32.gmra.mrb[52].mxu0 %v1262_v31  ;;  %v1134_v52 = vadd.f32 1.0, %v2564_v20  ;;  %v942_v34 = vmul.f32 0.5, %v806_v21 }
 0x1fe   : > { %2575 = verf.f32 %v1008_v61  ;;  %v1265_v37 = vmul.f32 %v1199_v39, %v3458_v40  ;;  %v1135_v57 = vadd.f32 1.0, %v2566_v23 }
 0x1ff   : > { %2577 = verf.f32 %v1009_v19  ;;  %v810_v22 = vpop.f32.mrb[66].mxu1  ;;  %v1200_v48 = vmul.f32 %v1134_v52, %v935_v30 }
 0x200   : > { %v2568_v11 = vpop.eup %2567  ;;  %v1010_v41 = vmul.f32 0.70710677, %v810_v22  ;;  %v812_v24 = vpop.f32.mrb[67].mxu1  ;;  %1459 = vmatprep.mubr.f32.mxu0 %v1265_v37  ;;  %v1201_v44 = vmul.f32 %v1135_v57, %v936_v59 }
 0x201   : > { %v2570_v49 = vpop.eup %2569  ;;  %v1266_v1 = vmul.f32 %v1200_v48, %v3462_v42  ;;  %v1011_v26 = vmul.f32 0.70710677, %v812_v24  ;;  %1460 = vmatmul.mubr.f32.gmra.mrb[54].mxu0 %v1264_v36  ;;  %v1136_v56 = vadd.f32 1.0, %v2568_v11  ;;  %v944_v52 = vmul.f32 0.5, %v812_v24 }
 0x202   : > { %2579 = verf.f32 %v1010_v41  ;;  %v1267_v40 = vmul.f32 %v1201_v44, %v3466_v17  ;;  %v1137_v4 = vadd.f32 1.0, %v2570_v49 }
 0x203   : > { %2581 = verf.f32 %v1011_v26  ;;  %v816_v13 = vpop.f32.mrb[68].mxu1  ;;  %v1202_v6 = vmul.f32 %v1136_v56, %v937_v9 }
 0x204   : > { %v2572_v27 = vpop.eup %2571  ;;  %v1012_v2 = vmul.f32 0.70710677, %v816_v13  ;;  %v3522_v12 = vpop.f32.mrb[69].mxu1  ;;  %1464 = vmatprep.mubr.f32.mxu0 %v1267_v40  ;;  %v1203_v25 = vmul.f32 %v1137_v4, %v938_v8  ;;  %v945_v49 = vmul.f32 0.5, %v816_v13 }
 0x205   : > { %v2574_v14 = vpop.eup %2573  ;;  %v1268_v42 = vmul.f32 %v1202_v6, %v3470_v45  ;;  %v1013_v55 = vmul.f32 0.70710677, %v3522_v12  ;;  %1465 = vmatmul.mubr.f32.gmra.mrb[56].mxu0 %v1266_v1  ;;  %v1138_v7 = vadd.f32 1.0, %v2572_v27  ;;  %v941_v45 = vmul.f32 0.5, %v804_v32 }
 0x206   : > { %2583 = verf.f32 %v1012_v2  ;;  %v1269_v17 = vmul.f32 %v1203_v25, %v3474_v46  ;;  %v1139_v38 = vadd.f32 1.0, %v2574_v14  ;;  %v946_v24 = vmul.f32 0.5, %v3522_v12 }
 0x207   : > { %2585 = verf.f32 %v1013_v55  ;;  %v822_v5 = vpop.f32.mrb[70].mxu1  ;;  %v1204_v10 = vmul.f32 %v1138_v7, %v939_v29 }
 0x208   : > { %v2576_v63 = vpop.eup %2575  ;;  %v1014_v0 = vmul.f32 0.70710677, %v822_v5  ;;  %v3527_v31 = vpop.f32.mrb[71].mxu1  ;;  %1469 = vmatprep.mubr.f32.mxu0 %v1269_v17  ;;  %v1205_v15 = vmul.f32 %v1139_v38, %v940_v62  ;;  %v947_v2 = vmul.f32 0.5, %v822_v5 }
 0x209   : > { %v2578_v28 = vpop.eup %2577  ;;  %v1270_v18 = vmul.f32 %v1204_v10, %v3478_v33  ;;  %v1015_v3 = vmul.f32 0.70710677, %v3527_v31  ;;  %1470 = vmatmul.mubr.f32.gmra.mrb[58].mxu0 %v1268_v42  ;;  %v1140_v35 = vadd.f32 1.0, %v2576_v63  ;;  %v943_v33 = vmul.f32 0.5, %v810_v22 }
 0x20a   : > { %2587 = verf.f32 %v1014_v0  ;;  %v1271_v46 = vmul.f32 %v1205_v15, %v3482_v51  ;;  %v1141_v43 = vadd.f32 1.0, %v2578_v28  ;;  %v948_v12 = vmul.f32 0.5, %v3527_v31 }
 0x20b   : > { %2589 = verf.f32 %v1015_v3  ;;  %v828_v16 = vpop.f32.mrb[72].mxu1  ;;  %v1206_v20 = vmul.f32 %v1140_v35, %v941_v45 }
 0x20c   : > { %v2580_v61 = vpop.eup %2579  ;;  %v1016_v39 = vmul.f32 0.70710677, %v828_v16  ;;  %v3532_v23 = vpop.f32.mrb[73].mxu1  ;;  %1474 = vmatprep.mubr.f32.mxu0 %v1271_v46  ;;  %v1207_v32 = vmul.f32 %v1141_v43, %v942_v34  ;;  %v949_v10 = vmul.f32 0.5, %v828_v16 }
 0x20d   : > { %v2582_v30 = vpop.eup %2581  ;;  %v1142_v36 = vadd.f32 1.0, %v2580_v61  ;;  %v1272_v19 = vmul.f32 %v1206_v20, %v3486_v53  ;;  %v1017_v21 = vmul.f32 0.70710677, %v3532_v23  ;;  %1475 = vmatmul.mubr.f32.gmra.mrb[60].mxu0 %v1270_v18  ;;  %v950_v31 = vmul.f32 0.5, %v3532_v23 }
 0x20e   : > { %v1143_v51 = vadd.f32 1.0, %v2582_v30  ;;  %2591 = verf.f32 %v1016_v39  ;;  %v1273_v59 = vmul.f32 %v1207_v32, %v3490_v47  ;;  %v4174_v32 = vld [vmem:[#allocation15_spill] sm:$0xff] }
 0x20f   : > { %v1208_v37 = vmul.f32 %v1142_v36, %v943_v33  ;;  %2593 = verf.f32 %v1017_v21  ;;  %v834_v57 = vpop.f32.mrb[74].mxu1  ;;  %v4175_v36 = vld [vmem:[#allocation16_spill] sm:$0xff] }
 0x210   : > { %v2584_v48 = vpop.eup %2583  ;;  %v1209_v11 = vmul.f32 %v1143_v51, %v944_v52  ;;  %v1018_v41 = vmul.f32 0.70710677, %v834_v57  ;;  %v836_v44 = vpop.f32.mrb[75].mxu1  ;;  %1479 = vmatprep.mubr.f32.mxu0 %v1273_v59  ;;  %v951_v20 = vmul.f32 0.5, %v834_v57 }
 0x211   : > { %v2586_v22 = vpop.eup %2585  ;;  %v1144_v9 = vadd.f32 1.0, %v2584_v48  ;;  %v1019_v53 = vmul.f32 0.70710677, %v836_v44  ;;  %1480 = vmatmul.mubr.f32.gmra.mrb[62].mxu0 %v1272_v19  ;;  %v1274_v1 = vmul.f32 %v1208_v37, %v3364_v50  ;;  %v952_v23 = vmul.f32 0.5, %v836_v44 }
 0x212   : > { %v1145_v26 = vadd.f32 1.0, %v2586_v22  ;;  %2595 = verf.f32 %v1018_v41  ;;  %v1275_v47 = vmul.f32 %v1209_v11, %v3368_v54 }
 0x213   : > { %v1210_v56 = vmul.f32 %v1144_v9, %v945_v49  ;;  %2597 = verf.f32 %v1019_v53  ;;  %v840_v8 = vpop.f32.mrb[76].mxu1  ;;  %v4176_v49 = vld [vmem:[#allocation17_spill] sm:$0xff] }
 0x214   : > { %v2588_v40 = vpop.eup %2587  ;;  %v1211_v4 = vmul.f32 %v1145_v26, %v946_v24  ;;  %v1020_v6 = vmul.f32 0.70710677, %v840_v8  ;;  %v842_v27 = vpop.f32.mrb[77].mxu1  ;;  %1484 = vmatprep.mubr.f32.mxu0 %v1275_v47  ;;  %v953_v57 = vmul.f32 0.5, %v840_v8 }
 0x215   : > { %v2590_v13 = vpop.eup %2589  ;;  %v1146_v25 = vadd.f32 1.0, %v2588_v40  ;;  %v1021_v14 = vmul.f32 0.70710677, %v842_v27  ;;  %1485 = vmatmul.mubr.f32.gmra.mrb[64].mxu0 %v1274_v1  ;;  %v1276_v50 = vmul.f32 %v1210_v56, %v3372_v58  ;;  %v4172_v58 = vld [vmem:[#allocation13_spill] sm:$0xff]  ;;  %v954_v44 = vmul.f32 0.5, %v842_v27  ;;  %v4177_v1 = vld [vmem:[#allocation18_spill] sm:$0xff] }
 0x216   : > { %v1147_v29 = vadd.f32 1.0, %v2590_v13  ;;  %2599 = verf.f32 %v1020_v6  ;;  %v1277_v54 = vmul.f32 %v1211_v4, %v3376_v60  ;;  %v4173_v60 = vld [vmem:[#allocation14_spill] sm:$0xff] }
 0x217   : > { %v1212_v42 = vmul.f32 %v1146_v25, %v947_v2  ;;  %2601 = verf.f32 %v1021_v14  ;;  %v846_v55 = vpop.f32.mrb[78].mxu1  ;;  %v4178_v14 = vld [vmem:[#allocation19_spill] sm:$0xff] }
 0x218   : > { %v2592_v7 = vpop.eup %2591  ;;  %v1213_v62 = vmul.f32 %v1147_v29, %v948_v12  ;;  %v1022_v17 = vmul.f32 0.70710677, %v846_v55  ;;  %v848_v38 = vpop.f32.mrb[79].mxu1  ;;  %1489 = vmatprep.mubr.f32.mxu0 %v1277_v54  ;;  %v955_v8 = vmul.f32 0.5, %v846_v55  ;;  %v4179_v29 = vld [vmem:[#allocation20_spill] sm:$0xff] }
 0x219   : > { %v2594_v5 = vpop.eup %2593  ;;  %v1148_v63 = vadd.f32 1.0, %v2592_v7  ;;  %v1023_v0 = vmul.f32 0.70710677, %v848_v38  ;;  %1490 = vmatmul.mubr.f32.gmra.mrb[66].mxu0 %v1276_v50  ;;  %v1278_v15 = vmul.f32 %v1212_v42, %v4172_v58  ;;  %v956_v27 = vmul.f32 0.5, %v848_v38 }
 0x21a   : > { %v1149_v28 = vadd.f32 1.0, %v2594_v5  ;;  %2603 = verf.f32 %v1022_v17  ;;  %v1279_v45 = vmul.f32 %v1213_v62, %v4173_v60  ;;  %v4181_v60 = vld [vmem:[#allocation22_spill] sm:$0xff] }
 0x21b   : > { %v1214_v18 = vmul.f32 %v1148_v63, %v949_v10  ;;  %2605 = verf.f32 %v1023_v0  ;;  %v852_v3 = vpop.f32.mrb[80].mxu1 }
 0x21c   : > { %v2596_v35 = vpop.eup %2595  ;;  %v1215_v34 = vmul.f32 %v1149_v28, %v950_v31  ;;  %v1024_v46 = vmul.f32 0.70710677, %v852_v3  ;;  %v854_v43 = vpop.f32.mrb[81].mxu1  ;;  %1494 = vmatprep.mubr.f32.mxu0 %v1279_v45  ;;  %v957_v55 = vmul.f32 0.5, %v852_v3 }
 0x21d   : > { %v2598_v16 = vpop.eup %2597  ;;  %v1150_v61 = vadd.f32 1.0, %v2596_v35  ;;  %v1025_v39 = vmul.f32 0.70710677, %v854_v43  ;;  %1495 = vmatmul.mubr.f32.gmra.mrb[68].mxu0 %v1278_v15  ;;  %v1280_v30 = vmul.f32 %v1214_v18, %v4174_v32  ;;  %v4180_v15 = vld [vmem:[#allocation21_spill] sm:$0xff]  ;;  %v958_v38 = vmul.f32 0.5, %v854_v43 }
 0x21e   : > { %v1151_v33 = vadd.f32 1.0, %v2598_v16  ;;  %2607 = verf.f32 %v1024_v46  ;;  %v1281_v19 = vmul.f32 %v1215_v34, %v4175_v36  ;;  %v4183_v36 = vld [vmem:[#allocation24_spill] sm:$0xff] }
 0x21f   : > { %v1216_v21 = vmul.f32 %v1150_v61, %v951_v20  ;;  %2609 = verf.f32 %v1025_v39  ;;  %v858_v52 = vpop.f32.mrb[82].mxu1 }
 0x220   : > { %v2600_v51 = vpop.eup %2599  ;;  %v1217_v59 = vmul.f32 %v1151_v33, %v952_v23  ;;  %v1026_v37 = vmul.f32 0.70710677, %v858_v52  ;;  %v860_v48 = vpop.f32.mrb[83].mxu1  ;;  %1499 = vmatprep.mubr.f32.mxu0 %v1281_v19  ;;  %v959_v3 = vmul.f32 0.5, %v858_v52 }
 0x221   : > { %v2602_v11 = vpop.eup %2601  ;;  %v1152_v41 = vadd.f32 1.0, %v2600_v51  ;;  %v1027_v22 = vmul.f32 0.70710677, %v860_v48  ;;  %1500 = vmatmul.mubr.f32.gmra.mrb[70].mxu0 %v1280_v30  ;;  %v1282_v9 = vmul.f32 %v1216_v21, %v4176_v49  ;;  %v4182_v30 = vld [vmem:[#allocation23_spill] sm:$0xff]  ;;  %v960_v43 = vmul.f32 0.5, %v860_v48 }
 0x222   : > { %v1153_v53 = vadd.f32 1.0, %v2602_v11  ;;  %2611 = verf.f32 %v1026_v37  ;;  %v1283_v24 = vmul.f32 %v1217_v59, %v4177_v1  ;;  %v4185_v1 = vld [vmem:[#allocation26_spill] sm:$0xff] }
 0x223   : > { %v1218_v26 = vmul.f32 %v1152_v41, %v953_v57  ;;  %2613 = verf.f32 %v1027_v22  ;;  %v864_v47 = vpop.f32.mrb[84].mxu1 }
 0x224   : > { %v2604_v56 = vpop.eup %2603  ;;  %v1219_v40 = vmul.f32 %v1153_v53, %v954_v44  ;;  %v1028_v4 = vmul.f32 0.70710677, %v864_v47  ;;  %v866_v6 = vpop.f32.mrb[85].mxu1  ;;  %1504 = vmatprep.mubr.f32.mxu0 %v1283_v24  ;;  %v961_v52 = vmul.f32 0.5, %v864_v47 }
 0x225   : > { %v2606_v13 = vpop.eup %2605  ;;  %v1154_v2 = vadd.f32 1.0, %v2604_v56  ;;  %v1029_v25 = vmul.f32 0.70710677, %v866_v6  ;;  %1505 = vmatmul.mubr.f32.gmra.mrb[72].mxu0 %v1282_v9  ;;  %v1284_v50 = vmul.f32 %v1218_v26, %v4178_v14  ;;  %v4184_v9 = vld [vmem:[#allocation25_spill] sm:$0xff]  ;;  %v962_v48 = vmul.f32 0.5, %v866_v6 }
 0x226   : > { %v1155_v12 = vadd.f32 1.0, %v2606_v13  ;;  %2615 = verf.f32 %v1028_v4  ;;  %v1285_v54 = vmul.f32 %v1219_v40, %v4179_v29  ;;  %v4187_v29 = vld [vmem:[#allocation28_spill] sm:$0xff] }
 0x227   : > { %v1220_v42 = vmul.f32 %v1154_v2, %v955_v8  ;;  %2617 = verf.f32 %v1029_v25  ;;  %v870_v7 = vpop.f32.mrb[86].mxu1 }
 0x228   : > { %v2608_v62 = vpop.eup %2607  ;;  %v1221_v17 = vmul.f32 %v1155_v12, %v956_v27  ;;  %v1030_v5 = vmul.f32 0.70710677, %v870_v7  ;;  %v872_v10 = vpop.f32.mrb[87].mxu1  ;;  %1509 = vmatprep.mubr.f32.mxu0 %v1285_v54  ;;  %v963_v47 = vmul.f32 0.5, %v870_v7 }
 0x229   : > { %v2610_v63 = vpop.eup %2609  ;;  %v1156_v0 = vadd.f32 1.0, %v2608_v62  ;;  %v1031_v58 = vmul.f32 0.70710677, %v872_v10  ;;  %1510 = vmatmul.mubr.f32.gmra.mrb[74].mxu0 %v1284_v50  ;;  %v1286_v31 = vmul.f32 %v1220_v42, %v4180_v15  ;;  %v4186_v50 = vld [vmem:[#allocation27_spill] sm:$0xff]  ;;  %v964_v6 = vmul.f32 0.5, %v872_v10 }
 0x22a   : > { %v1157_v28 = vadd.f32 1.0, %v2610_v63  ;;  %2619 = verf.f32 %v1030_v5  ;;  %v1287_v45 = vmul.f32 %v1221_v17, %v4181_v60  ;;  %v4189_v60 = vld [vmem:[#allocation30_spill] sm:$0xff] }
 0x22b   : > { %v1222_v18 = vmul.f32 %v1156_v0, %v957_v55  ;;  %2621 = verf.f32 %v1031_v58  ;;  %v876_v35 = vpop.f32.mrb[88].mxu1 }
 0x22c   : > { %v2612_v34 = vpop.eup %2611  ;;  %v1223_v46 = vmul.f32 %v1157_v28, %v958_v38  ;;  %v1032_v16 = vmul.f32 0.70710677, %v876_v35  ;;  %v878_v20 = vpop.f32.mrb[89].mxu1  ;;  %1514 = vmatprep.mubr.f32.mxu0 %v1287_v45  ;;  %v965_v7 = vmul.f32 0.5, %v876_v35 }
 0x22d   : > { %v2614_v61 = vpop.eup %2613  ;;  %v1158_v39 = vadd.f32 1.0, %v2612_v34  ;;  %v1033_v32 = vmul.f32 0.70710677, %v878_v20  ;;  %1515 = vmatmul.mubr.f32.gmra.mrb[76].mxu0 %v1286_v31  ;;  %v1288_v23 = vmul.f32 %v1222_v18, %v4182_v30  ;;  %v4188_v31 = vld [vmem:[#allocation29_spill] sm:$0xff]  ;;  %v966_v10 = vmul.f32 0.5, %v878_v20 }
 0x22e   : > { %v1159_v33 = vadd.f32 1.0, %v2614_v61  ;;  %2623 = verf.f32 %v1032_v16  ;;  %v1289_v19 = vmul.f32 %v1223_v46, %v4183_v36  ;;  %v4191_v36 = vld [vmem:[#allocation32_spill] sm:$0xff] }
 0x22f   : > { %v1224_v21 = vmul.f32 %v1158_v39, %v959_v3  ;;  %2625 = verf.f32 %v1033_v32  ;;  %v882_v51 = vpop.f32.mrb[90].mxu1 }
 0x230   : > { %v2616_v59 = vpop.eup %2615  ;;  %v1225_v37 = vmul.f32 %v1159_v33, %v960_v43  ;;  %v1034_v11 = vmul.f32 0.70710677, %v882_v51  ;;  %v884_v57 = vpop.f32.mrb[91].mxu1  ;;  %1519 = vmatprep.mubr.f32.mxu0 %v1289_v19  ;;  %v967_v35 = vmul.f32 0.5, %v882_v51 }
 0x231   : > { %v2618_v41 = vpop.eup %2617  ;;  %v1160_v22 = vadd.f32 1.0, %v2616_v59  ;;  %v1035_v49 = vmul.f32 0.70710677, %v884_v57  ;;  %1520 = vmatmul.mubr.f32.gmra.mrb[78].mxu0 %v1288_v23  ;;  %v1290_v44 = vmul.f32 %v1224_v21, %v4184_v9  ;;  %v4190_v23 = vld [vmem:[#allocation31_spill] sm:$0xff]  ;;  %v968_v20 = vmul.f32 0.5, %v884_v57 }
 0x232   : > { %v1161_v53 = vadd.f32 1.0, %v2618_v41  ;;  %2627 = verf.f32 %v1034_v11  ;;  %v1291_v24 = vmul.f32 %v1225_v37, %v4185_v1  ;;  %v4193_v1 = vld [vmem:[#allocation34_spill] sm:$0xff] }
 0x233   : > { %v1226_v26 = vmul.f32 %v1160_v22, %v961_v52  ;;  %2629 = verf.f32 %v1035_v49  ;;  %v888_v56 = vpop.f32.mrb[92].mxu1 }
 0x234   : > { %v2620_v40 = vpop.eup %2619  ;;  %v1227_v4 = vmul.f32 %v1161_v53, %v962_v48  ;;  %v1036_v13 = vmul.f32 0.70710677, %v888_v56  ;;  %v890_v8 = vpop.f32.mrb[93].mxu1  ;;  %1524 = vmatprep.mubr.f32.mxu0 %v1291_v24  ;;  %v969_v51 = vmul.f32 0.5, %v888_v56  ;;  %v4194_v56 = vld [vmem:[#allocation35_spill] sm:$0xff] }
 0x235   : > { %v2622_v2 = vpop.eup %2621  ;;  %v1162_v25 = vadd.f32 1.0, %v2620_v40  ;;  %v1037_v14 = vmul.f32 0.70710677, %v890_v8  ;;  %1525 = vmatmul.mubr.f32.gmra.mrb[80].mxu0 %v1290_v44  ;;  %v1292_v27 = vmul.f32 %v1226_v26, %v4186_v50  ;;  %v4192_v44 = vld [vmem:[#allocation33_spill] sm:$0xff]  ;;  %v970_v57 = vmul.f32 0.5, %v890_v8 }
 0x236   : > { %v1163_v12 = vadd.f32 1.0, %v2622_v2  ;;  %2631 = verf.f32 %v1036_v13  ;;  %v1293_v54 = vmul.f32 %v1227_v4, %v4187_v29 }
 0x237   : > { %v1228_v42 = vmul.f32 %v1162_v25, %v963_v47  ;;  %2633 = verf.f32 %v1037_v14  ;;  %v894_v62 = vpop.f32.mrb[94].mxu1 }
 0x238   : > { %v2624_v17 = vpop.eup %2623  ;;  %v1229_v5 = vmul.f32 %v1163_v12, %v964_v6  ;;  %v1038_v63 = vmul.f32 0.70710677, %v894_v62  ;;  %v896_v55 = vpop.f32.mrb[95].mxu1  ;;  %1529 = vmatprep.mubr.f32.mxu0 %v1293_v54  ;;  %v971_v2 = vmul.f32 0.5, %v894_v62 }
 0x239   : > { %v2626_v0 = vpop.eup %2625  ;;  %v1164_v58 = vadd.f32 1.0, %v2624_v17  ;;  %v1039_v15 = vmul.f32 0.70710677, %v896_v55  ;;  %1530 = vmatmul.mubr.f32.gmra.mrb[82].mxu0 %v1292_v27  ;;  %v1294_v38 = vmul.f32 %v1228_v42, %v4188_v31  ;;  %v972_v14 = vmul.f32 0.5, %v896_v55  ;;  %v4195_v27 = vld [vmem:[#allocation36_spill] sm:$0xff] }
 0x23a   : > { %v1165_v28 = vadd.f32 1.0, %v2626_v0  ;;  %2635 = verf.f32 %v1038_v63  ;;  %v1295_v45 = vmul.f32 %v1229_v5, %v4189_v60  ;;  %v4196_v5 = vld [vmem:[#allocation37_spill] sm:$0xff]  ;;  %v4198_v60 = vld [vmem:[#allocation39_spill] sm:$0xff] }
 0x23b   : > { %v1230_v18 = vmul.f32 %v1164_v58, %v965_v7  ;;  %2637 = verf.f32 %v1039_v15  ;;  %v900_v34 = vpop.f32.mrb[96].mxu1  ;;  %v4197_v7 = vld [vmem:[#allocation38_spill] sm:$0xff] }
 0x23c   : > { %v2628_v46 = vpop.eup %2627  ;;  %v1231_v16 = vmul.f32 %v1165_v28, %v966_v10  ;;  %v1040_v61 = vmul.f32 0.70710677, %v900_v34  ;;  %v902_v3 = vpop.f32.mrb[97].mxu1  ;;  %1534 = vmatprep.mubr.f32.mxu0 %v1295_v45  ;;  %v973_v42 = vmul.f32 0.5, %v900_v34 }
 0x23d   : > { %v2630_v39 = vpop.eup %2629  ;;  %v1166_v32 = vadd.f32 1.0, %v2628_v46  ;;  %v1041_v30 = vmul.f32 0.70710677, %v902_v3  ;;  %1535 = vmatmul.mubr.f32.gmra.mrb[84].mxu0 %v1294_v38  ;;  %v1296_v43 = vmul.f32 %v1230_v18, %v4190_v23  ;;  %v974_v0 = vmul.f32 0.5, %v902_v3  ;;  %v4199_v46 = vld [vmem:[#allocation40_spill] sm:$0xff] }
 0x23e   : > { %v1167_v33 = vadd.f32 1.0, %v2630_v39  ;;  %2639 = verf.f32 %v1040_v61  ;;  %v1297_v19 = vmul.f32 %v1231_v16, %v4191_v36  ;;  %v4200_v39 = vld [vmem:[#allocation41_spill] sm:$0xff] }
 0x23f   : > { %v1232_v21 = vmul.f32 %v1166_v32, %v967_v35  ;;  %2641 = verf.f32 %v1041_v30  ;;  %v906_v59 = vpop.f32.mrb[98].mxu1  ;;  %v4201_v32 = vld [vmem:[#allocation42_spill] sm:$0xff] }
 0x240   : > { %v2632_v37 = vpop.eup %2631  ;;  %v1233_v11 = vmul.f32 %v1167_v33, %v968_v20  ;;  %v1042_v41 = vmul.f32 0.70710677, %v906_v59  ;;  %v908_v52 = vpop.f32.mrb[99].mxu1  ;;  %1539 = vmatprep.mubr.f32.mxu0 %v1297_v19  ;;  %v975_v10 = vmul.f32 0.5, %v906_v59 }
 0x241   : > { %v2634_v22 = vpop.eup %2633  ;;  %v1168_v49 = vadd.f32 1.0, %v2632_v37  ;;  %v1043_v9 = vmul.f32 0.70710677, %v908_v52  ;;  %1540 = vmatmul.mubr.f32.gmra.mrb[86].mxu0 %v1296_v43  ;;  %v1298_v48 = vmul.f32 %v1232_v21, %v4192_v44  ;;  %v976_v18 = vmul.f32 0.5, %v908_v52  ;;  %v2713_v43 = vld [vmem:[%s3123_s16] sm:$0xff]  ;;  %v2714_v21 = vld [vmem:[%s3123_s16 + $0x8] sm:$0xff] }
 0x242   : > { %v1169_v53 = vadd.f32 1.0, %v2634_v22  ;;  %2643 = verf.f32 %v1042_v41  ;;  %v1299_v24 = vmul.f32 %v1233_v11, %v4193_v1  ;;  %v2715_v41 = vld [vmem:[%s3123_s16 + $0x10] sm:$0xff] }
 0x243   : > { %v1234_v26 = vmul.f32 %v1168_v49, %v969_v51  ;;  %2645 = verf.f32 %v1043_v9  ;;  %v2716_v9 = vld [vmem:[%s3123_s16 + $0x18] sm:$0xff] }
 0x244   : > { %v2636_v40 = vpop.eup %2635  ;;  %v1235_v4 = vmul.f32 %v1169_v53, %v970_v57  ;;  %1544 = vmatprep.mubr.f32.mxu0 %v1299_v24  ;;  %v2717_v24 = vld [vmem:[%s3123_s16 + $0x20] sm:$0xff] }
 0x245   : > { %v2638_v13 = vpop.eup %2637  ;;  %v1170_v47 = vadd.f32 1.0, %v2636_v40  ;;  %1545 = vmatmul.mubr.f32.gmra.mrb[88].mxu0 %v1298_v48  ;;  %v1300_v25 = vmul.f32 %v1234_v26, %v4194_v56 }
 0x246   : > { %v1171_v50 = vadd.f32 1.0, %v2638_v13  ;;  %v1301_v6 = vmul.f32 %v1235_v4, %v4195_v27  ;;  %v2718_v13 = vld [vmem:[%s3123_s16 + $0x28] sm:$0xff] }
 0x247   : > { %v1236_v8 = vmul.f32 %v1170_v47, %v971_v2 }
 0x248   : > { %v2640_v12 = vpop.eup %2639  ;;  %v1237_v29 = vmul.f32 %v1171_v50, %v972_v14  ;;  %1549 = vmatprep.mubr.f32.mxu0 %v1301_v6  ;;  %v2719_v50 = vld [vmem:[%s3123_s16 + $0x30] sm:$0xff] }
 0x249   : > { %v2642_v54 = vpop.eup %2641  ;;  %v1172_v17 = vadd.f32 1.0, %v2640_v12  ;;  %1550 = vmatmul.mubr.f32.gmra.mrb[90].mxu0 %v1300_v25  ;;  %v1302_v63 = vmul.f32 %v1236_v8, %v4196_v5  ;;  %v2720_v12 = vld [vmem:[%s3123_s16 + $0x38] sm:$0xff] }
 0x24a   : > { %v1173_v62 = vadd.f32 1.0, %v2642_v54  ;;  %v1303_v58 = vmul.f32 %v1237_v29, %v4197_v7 }
 0x24b   : > { %v1238_v15 = vmul.f32 %v1172_v17, %v973_v42 }
 0x24c   : > { %v2644_v31 = vpop.eup %2643  ;;  %v1239_v55 = vmul.f32 %v1173_v62, %v974_v0  ;;  %1554 = vmatprep.mubr.f32.mxu0 %v1303_v58  ;;  %v2722_v58 = vld [vmem:[%s3123_s16 + $0x48] sm:$0xff] }
 0x24d   : > { %v2646_v38 = vpop.eup %2645  ;;  %v1174_v28 = vadd.f32 1.0, %v2644_v31  ;;  %1555 = vmatmul.mubr.f32.gmra.mrb[92].mxu0 %v1302_v63  ;;  %v1304_v45 = vmul.f32 %v1238_v15, %v4198_v60  ;;  %v2721_v63 = vld [vmem:[%s3123_s16 + $0x40] sm:$0xff] }
 0x24e   : > { %v1175_v34 = vadd.f32 1.0, %v2646_v38  ;;  %v1305_v16 = vmul.f32 %v1239_v55, %v4199_v46 }
 0x24f   : > { %v1240_v61 = vmul.f32 %v1174_v28, %v975_v10  ;;  %v2723_v28 = vld [vmem:[%s3123_s16 + $0x50] sm:$0xff] }
 0x250   : > { %v1241_v3 = vmul.f32 %v1175_v34, %v976_v18  ;;  %1559 = vmatprep.mubr.f32.mxu0 %v1305_v16  ;;  %v2724_v34 = vld [vmem:[%s3123_s16 + $0x58] sm:$0xff] }
 0x251   : > { %1560 = vmatmul.mubr.f32.gmra.mrb[94].mxu0 %v1304_v45  ;;  %v1306_v35 = vmul.f32 %v1240_v61, %v4200_v39 }
 0x252   : > { %v1307_v30 = vmul.f32 %v1241_v3, %v4201_v32 }
 0x254   : > { %1564 = vmatprep.mubr.f32.mxu0 %v1307_v30 }
 0x255   : > { %1565 = vmatmul.mubr.f32.gmra.mrb[96].mxu0 %v1306_v35  ;;  %v2725_v35 = vld [vmem:[%s3123_s16 + $0x60] sm:$0xff] }
 0x2a8   : > { %v1406_v23 = vpop.f32.mrb[32].mxu0 }
 0x2a9   : > { %v3575_v20 = vadd.f32 %v2713_v43, %v1406_v23  ;;  %v1408_v33 = vpop.f32.mrb[33].mxu0  ;;  %v2726_v43 = vld [vmem:[%s3123_s16 + $0x68] sm:$0xff] }
 0x2ab   : > { %1605 = vadd.xlane.f32.xlu0 %v3575_v20  ;;  %v1705_v36 = vmul.f32 %v3575_v20, %v3575_v20 }
 0x2ac   : > { %v1411_v19 = vpop.f32.mrb[34].mxu0 }
 0x2ad   : > { %v3581_v59 = vadd.f32 %v2714_v21, %v1411_v19  ;;  %1738 = vadd.xlane.f32.xlu1 %v1705_v36  ;;  %v1413_v37 = vpop.f32.mrb[35].mxu0 }
 0x2af   : > { %1607 = vadd.xlane.f32.xlu0 %v3581_v59  ;;  %v1706_v51 = vmul.f32 %v3581_v59, %v3581_v59 }
 0x2b0   : > { %v1416_v11 = vpop.f32.mrb[36].mxu0 }
 0x2b1   : > { %v3585_v52 = vadd.f32 %v2715_v41, %v1416_v11  ;;  %v1418_v22 = vpop.f32.mrb[37].mxu0  ;;  %v2727_v11 = vld [vmem:[%s3123_s16 + $0x70] sm:$0xff] }
 0x2b3   : > { %1740 = vadd.xlane.f32.xlu0 %v1706_v51  ;;  %1609 = vadd.xlane.f32.xlu1 %v3585_v52  ;;  %v1707_v57 = vmul.f32 %v3585_v52, %v3585_v52 }
 0x2b4   : > { %v1421_v49 = vpop.f32.mrb[38].mxu0 }
 0x2b5   : > { %v3591_v44 = vadd.f32 %v2716_v9, %v1421_v49  ;;  %v1423_v48 = vpop.f32.mrb[39].mxu0  ;;  %v2728_v49 = vld [vmem:[%s3123_s16 + $0x78] sm:$0xff] }
 0x2b7   : > { %1742 = vadd.xlane.f32.xlu1 %v1707_v57  ;;  %v1708_v53 = vmul.f32 %v3591_v44, %v3591_v44 }
 0x2b8   : > { %v1426_v1 = vpop.f32.mrb[40].mxu0 }
 0x2b9   : > { %v3598_v26 = vadd.f32 %v2717_v24, %v1426_v1  ;;  %1744 = vadd.xlane.f32.xlu0 %v1708_v53  ;;  %v1428_v40 = vpop.f32.mrb[41].mxu0  ;;  %v2729_v24 = vld [vmem:[%s3123_s16 + $0x80] sm:$0xff] }
 0x2bb   : > { %1611 = vadd.xlane.f32.xlu1 %v3591_v44  ;;  %v1709_v56 = vmul.f32 %v3598_v26, %v3598_v26 }
 0x2bc   : > { %v1431_v4 = vpop.f32.mrb[42].mxu0 }
 0x2bd   : > { %v3602_v2 = vadd.f32 %v2718_v13, %v1431_v4  ;;  %1613 = vadd.xlane.f32.xlu0 %v3598_v26  ;;  %v1433_v47 = vpop.f32.mrb[43].mxu0 }
 0x2be   : > { %v2730_v47 = vld [vmem:[%s3123_s16 + $0x88] sm:$0xff] }
 0x2bf   : > { %1746 = vadd.xlane.f32.xlu1 %v1709_v56  ;;  %v1710_v25 = vmul.f32 %v3602_v2, %v3602_v2 }
 0x2c0   : > { %v1436_v14 = vpop.f32.mrb[44].mxu0 }
 0x2c1   : > { %v3610_v27 = vadd.f32 %v2719_v50, %v1436_v14  ;;  %1748 = vadd.xlane.f32.xlu0 %v1710_v25  ;;  %v1438_v6 = vpop.f32.mrb[45].mxu0 }
 0x2c3   : > { %1615 = vadd.xlane.f32.xlu1 %v3602_v2  ;;  %v1711_v42 = vmul.f32 %v3610_v27, %v3610_v27 }
 0x2c4   : > { %v1441_v8 = vpop.f32.mrb[46].mxu0 }
 0x2c5   : > { %v3614_v29 = vadd.f32 %v2720_v12, %v1441_v8  ;;  %1617 = vadd.xlane.f32.xlu0 %v3610_v27  ;;  %v1443_v54 = vpop.f32.mrb[47].mxu0  ;;  %v2731_v8 = vld [vmem:[%s3123_s16 + $0x90] sm:$0xff] }
 0x2c7   : > { %1750 = vadd.xlane.f32.xlu1 %v1711_v42  ;;  %v1712_v17 = vmul.f32 %v3614_v29, %v3614_v29 }
 0x2c8   : > { %v1446_v5 = vpop.f32.mrb[48].mxu0 }
 0x2c9   : > { %v3622_v0 = vadd.f32 %v2721_v63, %v1446_v5  ;;  %1752 = vadd.xlane.f32.xlu0 %v1712_v17  ;;  %v1448_v62 = vpop.f32.mrb[49].mxu0  ;;  %v2732_v17 = vld [vmem:[%s3123_s16 + $0x98] sm:$0xff] }
 0x2cb   : > { %1619 = vadd.xlane.f32.xlu1 %v3614_v29  ;;  %v1713_v55 = vmul.f32 %v3622_v0, %v3622_v0 }
 0x2cc   : > { %v1451_v7 = vpop.f32.mrb[50].mxu0 }
 0x2cd   : > { %v3626_v15 = vadd.f32 %v2722_v58, %v1451_v7  ;;  %1621 = vadd.xlane.f32.xlu0 %v3622_v0  ;;  %v1453_v31 = vpop.f32.mrb[51].mxu0 }
 0x2ce   : > { %v2733_v31 = vld [vmem:[%s3123_s16 + $0xa0] sm:$0xff] }
 0x2cf   : > { %1754 = vadd.xlane.f32.xlu1 %v1713_v55  ;;  %v1714_v38 = vmul.f32 %v3626_v15, %v3626_v15 }
 0x2d0   : > { %v1456_v10 = vpop.f32.mrb[52].mxu0 }
 0x2d1   : > { %v3634_v60 = vadd.f32 %v2723_v28, %v1456_v10  ;;  %1756 = vadd.xlane.f32.xlu0 %v1714_v38  ;;  %v1458_v45 = vpop.f32.mrb[53].mxu0  ;;  %v2734_v28 = vld [vmem:[%s3123_s16 + $0xa8] sm:$0xff] }
 0x2d3   : > { %1623 = vadd.xlane.f32.xlu1 %v3626_v15  ;;  %v1715_v61 = vmul.f32 %v3634_v60, %v3634_v60 }
 0x2d4   : > { %v1461_v18 = vpop.f32.mrb[54].mxu0 }
 0x2d5   : > { %v3638_v46 = vadd.f32 %v2724_v34, %v1461_v18  ;;  %1625 = vadd.xlane.f32.xlu0 %v3634_v60  ;;  %v1463_v16 = vpop.f32.mrb[55].mxu0 }
 0x2d7   : > { %1758 = vadd.xlane.f32.xlu1 %v1715_v61  ;;  %v1716_v3 = vmul.f32 %v3638_v46, %v3638_v46 }
 0x2d8   : > { %v1466_v39 = vpop.f32.mrb[56].mxu0 }
 0x2d9   : > { %v3646_v32 = vadd.f32 %v2725_v35, %v1466_v39  ;;  %1760 = vadd.xlane.f32.xlu0 %v1716_v3  ;;  %v1468_v30 = vpop.f32.mrb[57].mxu0  ;;  %v2735_v3 = vld [vmem:[%s3123_s16 + $0xb0] sm:$0xff] }
 0x2db   : > { %1627 = vadd.xlane.f32.xlu1 %v3638_v46  ;;  %v1717_v19 = vmul.f32 %v3646_v32, %v3646_v32 }
 0x2dc   : > { %v1471_v23 = vpop.f32.mrb[58].mxu0 }
 0x2dd   : > { %v3650_v33 = vadd.f32 %v2726_v43, %v1471_v23  ;;  %1629 = vadd.xlane.f32.xlu0 %v3646_v32  ;;  %v1473_v36 = vpop.f32.mrb[59].mxu0  ;;  %v2736_v23 = vld [vmem:[%s3123_s16 + $0xb8] sm:$0xff] }
 0x2df   : > { %1762 = vadd.xlane.f32.xlu1 %v1717_v19  ;;  %v1718_v21 = vmul.f32 %v3650_v33, %v3650_v33 }
 0x2e0   : > { %v1476_v37 = vpop.f32.mrb[60].mxu0 }
 0x2e1   : > { %v3658_v41 = vadd.f32 %v2727_v11, %v1476_v37  ;;  %1764 = vadd.xlane.f32.xlu0 %v1718_v21  ;;  %v1478_v22 = vpop.f32.mrb[61].mxu0  ;;  %v2737_v11 = vld [vmem:[%s3123_s16 + $0xc0] sm:$0xff] }
 0x2e3   : > { %1631 = vadd.xlane.f32.xlu1 %v3650_v33  ;;  %v1719_v57 = vmul.f32 %v3658_v41, %v3658_v41 }
 0x2e4   : > { %v1481_v51 = vpop.f32.mrb[62].mxu0 }
 0x2e5   : > { %v3662_v9 = vadd.f32 %v2728_v49, %v1481_v51  ;;  %1633 = vadd.xlane.f32.xlu0 %v3658_v41  ;;  %v1483_v48 = vpop.f32.mrb[63].mxu0 }
 0x2e6   : > { %v2738_v48 = vld [vmem:[%s3123_s16 + $0xc8] sm:$0xff] }
 0x2e7   : > { %1766 = vadd.xlane.f32.xlu1 %v1719_v57  ;;  %v1720_v53 = vmul.f32 %v3662_v9, %v3662_v9 }
 0x2e8   : > { %v1486_v1 = vpop.f32.mrb[64].mxu0 }
 0x2e9   : > { %v3670_v40 = vadd.f32 %v2729_v24, %v1486_v1  ;;  %1768 = vadd.xlane.f32.xlu0 %v1720_v53  ;;  %v1488_v4 = vpop.f32.mrb[65].mxu0 }
 0x2eb   : > { %1635 = vadd.xlane.f32.xlu1 %v3662_v9  ;;  %v1721_v14 = vmul.f32 %v3670_v40, %v3670_v40 }
 0x2ec   : > { %v1491_v13 = vpop.f32.mrb[66].mxu0 }
 0x2ed   : > { %v3674_v56 = vadd.f32 %v2730_v47, %v1491_v13  ;;  %1637 = vadd.xlane.f32.xlu0 %v3670_v40  ;;  %v1493_v25 = vpop.f32.mrb[67].mxu0  ;;  %v2739_v13 = vld [vmem:[%s3123_s16 + $0xd0] sm:$0xff] }
 0x2ef   : > { %1770 = vadd.xlane.f32.xlu1 %v1721_v14  ;;  %v1722_v50 = vmul.f32 %v3674_v56, %v3674_v56 }
 0x2f0   : > { %v1496_v6 = vpop.f32.mrb[68].mxu0 }
 0x2f1   : > { %v3682_v12 = vadd.f32 %v2731_v8, %v1496_v6  ;;  %1772 = vadd.xlane.f32.xlu0 %v1722_v50  ;;  %v1498_v54 = vpop.f32.mrb[69].mxu0  ;;  %v2740_v50 = vld [vmem:[%s3123_s16 + $0xd8] sm:$0xff] }
 0x2f3   : > { %1639 = vadd.xlane.f32.xlu1 %v3674_v56  ;;  %v1723_v62 = vmul.f32 %v3682_v12, %v3682_v12 }
 0x2f4   : > { %v1501_v42 = vpop.f32.mrb[70].mxu0 }
 0x2f5   : > { %v3686_v5 = vadd.f32 %v2732_v17, %v1501_v42  ;;  %1641 = vadd.xlane.f32.xlu0 %v3682_v12  ;;  %v1503_v63 = vpop.f32.mrb[71].mxu0 }
 0x2f6   : > { %v2741_v63 = vld [vmem:[%s3123_s16 + $0xe0] sm:$0xff] }
 0x2f7   : > { %1774 = vadd.xlane.f32.xlu1 %v1723_v62  ;;  %v1724_v7 = vmul.f32 %v3686_v5, %v3686_v5 }
 0x2f8   : > { %v1506_v58 = vpop.f32.mrb[72].mxu0 }
 0x2f9   : > { %v3694_v55 = vadd.f32 %v2733_v31, %v1506_v58  ;;  %1776 = vadd.xlane.f32.xlu0 %v1724_v7  ;;  %v1508_v38 = vpop.f32.mrb[73].mxu0  ;;  %v2742_v31 = vld [vmem:[%s3123_s16 + $0xe8] sm:$0xff] }
 0x2fb   : > { %1643 = vadd.xlane.f32.xlu1 %v3686_v5  ;;  %v1725_v34 = vmul.f32 %v3694_v55, %v3694_v55 }
 0x2fc   : > { %v1511_v10 = vpop.f32.mrb[74].mxu0 }
 0x2fd   : > { %v3698_v45 = vadd.f32 %v2734_v28, %v1511_v10  ;;  %1645 = vadd.xlane.f32.xlu0 %v3694_v55  ;;  %v1513_v18 = vpop.f32.mrb[75].mxu0 }
 0x2ff   : > { %1778 = vadd.xlane.f32.xlu1 %v1725_v34  ;;  %v1726_v16 = vmul.f32 %v3698_v45, %v3698_v45 }
 0x300   : > { %v1516_v61 = vpop.f32.mrb[76].mxu0 }
 0x301   : > { %v3706_v39 = vadd.f32 %v2735_v3, %v1516_v61  ;;  %1780 = vadd.xlane.f32.xlu0 %v1726_v16  ;;  %v1518_v35 = vpop.f32.mrb[77].mxu0  ;;  %v2743_v16 = vld [vmem:[%s3123_s16 + $0xf0] sm:$0xff] }
 0x303   : > { %1647 = vadd.xlane.f32.xlu1 %v3698_v45  ;;  %v1727_v19 = vmul.f32 %v3706_v39, %v3706_v39 }
 0x304   : > { %v1521_v30 = vpop.f32.mrb[78].mxu0 }
 0x305   : > { %v3710_v43 = vadd.f32 %v2736_v23, %v1521_v30  ;;  %1649 = vadd.xlane.f32.xlu0 %v3706_v39  ;;  %v1523_v36 = vpop.f32.mrb[79].mxu0 }
 0x307   : > { %1782 = vadd.xlane.f32.xlu1 %v1727_v19  ;;  %v1728_v21 = vmul.f32 %v3710_v43, %v3710_v43  ;;  %v2744_v19 = vld [vmem:[%s3123_s16 + $0xf8] sm:$0xff] }
 0x308   : > { %v1526_v37 = vpop.f32.mrb[80].mxu0 }
 0x309   : > { %v3718_v22 = vadd.f32 %v2737_v11, %v1526_v37  ;;  %1784 = vadd.xlane.f32.xlu0 %v1728_v21  ;;  %v1528_v51 = vpop.f32.mrb[81].mxu0  ;;  %v2745_v37 = vld [vmem:[%s3123_s16 + $0x100] sm:$0xff] }
 0x30b   : > { %1651 = vadd.xlane.f32.xlu1 %v3710_v43  ;;  %v1729_v1 = vmul.f32 %v3718_v22, %v3718_v22 }
 0x30c   : > { %v1531_v49 = vpop.f32.mrb[82].mxu0 }
 0x30d   : > { %v3722_v57 = vadd.f32 %v2738_v48, %v1531_v49  ;;  %1653 = vadd.xlane.f32.xlu0 %v3718_v22  ;;  %v1533_v53 = vpop.f32.mrb[83].mxu0 }
 0x30f   : > { %1786 = vadd.xlane.f32.xlu1 %v1729_v1  ;;  %v1730_v24 = vmul.f32 %v3722_v57, %v3722_v57 }
 0x310   : > { %v1536_v4 = vpop.f32.mrb[84].mxu0 }
 0x311   : > { %v3730_v47 = vadd.f32 %v2739_v13, %v1536_v4  ;;  %1788 = vadd.xlane.f32.xlu0 %v1730_v24  ;;  %v1538_v25 = vpop.f32.mrb[85].mxu0 }
 0x313   : > { %1655 = vadd.xlane.f32.xlu1 %v3722_v57  ;;  %v1731_v54 = vmul.f32 %v3730_v47, %v3730_v47 }
 0x314   : > { %v1541_v14 = vpop.f32.mrb[86].mxu0 }
 0x315   : > { %v3734_v6 = vadd.f32 %v2740_v50, %v1541_v14  ;;  %1657 = vadd.xlane.f32.xlu0 %v3730_v47  ;;  %v1543_v8 = vpop.f32.mrb[87].mxu0 }
 0x317   : > { %1790 = vadd.xlane.f32.xlu1 %v1731_v54  ;;  %v1732_v42 = vmul.f32 %v3734_v6, %v3734_v6 }
 0x318   : > { %v1546_v17 = vpop.f32.mrb[88].mxu0 }
 0x319   : > { %v3742_v62 = vadd.f32 %v2741_v63, %v1546_v17  ;;  %1792 = vadd.xlane.f32.xlu0 %v1732_v42  ;;  %v1548_v7 = vpop.f32.mrb[89].mxu0 }
 0x31b   : > { %1659 = vadd.xlane.f32.xlu1 %v3734_v6  ;;  %v1733_v28 = vmul.f32 %v3742_v62, %v3742_v62 }
 0x31c   : > { %v1551_v58 = vpop.f32.mrb[90].mxu0 }
 0x31d   : > { %v3746_v38 = vadd.f32 %v2742_v31, %v1551_v58  ;;  %1661 = vadd.xlane.f32.xlu0 %v3742_v62  ;;  %v1553_v10 = vpop.f32.mrb[91].mxu0 }
 0x31f   : > { %1794 = vadd.xlane.f32.xlu1 %v1733_v28  ;;  %v1734_v18 = vmul.f32 %v3746_v38, %v3746_v38 }
 0x320   : > { %v1556_v34 = vpop.f32.mrb[92].mxu0 }
 0x321   : > { %v3754_v61 = vadd.f32 %v2743_v16, %v1556_v34  ;;  %1796 = vadd.xlane.f32.xlu0 %v1734_v18  ;;  %v1558_v3 = vpop.f32.mrb[93].mxu0 }
 0x323   : > { %1663 = vadd.xlane.f32.xlu1 %v3746_v38  ;;  %v1735_v23 = vmul.f32 %v3754_v61, %v3754_v61 }
 0x324   : > { %v1561_v35 = vpop.f32.mrb[94].mxu0 }
 0x325   : > { %1665 = vadd.xlane.f32.xlu0 %v3754_v61  ;;  %v1563_v30 = vpop.f32.mrb[95].mxu0  ;;  %v3761_v21 = vadd.f32 %v2744_v19, %v1561_v35 }
 0x327   : > { %1798 = vadd.xlane.f32.xlu1 %v1735_v23  ;;  %v1736_v49 = vmul.f32 %v3761_v21, %v3761_v21 }
 0x328   : > { %v1566_v36 = vpop.f32.mrb[96].mxu0 }
 0x329   : > { %v3764_v11 = vadd.f32 %v2745_v37, %v1566_v36  ;;  %v1568_v51 = vpop.f32.mrb[97].mxu0 }
 0x32b   : > { %1667 = vadd.xlane.f32.xlu1 %v3761_v21  ;;  %1669 = vadd.xlane.f32.xlu0 %v3764_v11  ;;  %v1737_v48 = vmul.f32 %v3764_v11, %v3764_v11 }
 0x32f   : > { %1800 = vadd.xlane.f32.xlu0 %v1736_v49  ;;  %1802 = vadd.xlane.f32.xlu1 %v1737_v48 }
 0x338   : > { %v1606_v53 = vpop.xlane.xlu0 %1605 }
 0x339   : > { %v1672_v1 = vmul.f32 0.0078125, %v1606_v53 }
 0x33a   : > { %v1739_v24 = vpop.xlane.xlu1 %1738 }
 0x33b   : > { %v1837_v4 = vmul.f32 %v1672_v1, %v1672_v1  ;;  %v1804_v13 = vmul.f32 0.0078125, %v1739_v24  ;;  %v1936_v53 = vsub.f32 %v3575_v20, %v1672_v1 }
 0x33c   : > { %v1608_v25 = vpop.xlane.xlu0 %1607 }
 0x33d   : > { %v1870_v14 = vsub.f32 %v1804_v13, %v1837_v4  ;;  %v1673_v50 = vmul.f32 0.0078125, %v1608_v25  ;;  %v3782_v13 = vld [vmem:[%s4124_s3] ss:$0 sm:$0xff] }
 0x33f   : > { %v1903_v8 = vmax.f32 %v1870_v14, 0.0  ;;  %v1838_v63 = vmul.f32 %v1673_v50, %v1673_v50 }
 0x340   : > { %v1741_v54 = vpop.xlane.xlu0 %1740  ;;  %v1610_v42 = vpop.xlane.xlu1 %1609 }
 0x341   : > { %v1969_v17 = vadd.f32 1e-05, %v1903_v8  ;;  %v1805_v7 = vmul.f32 0.0078125, %v1741_v54  ;;  %v1674_v58 = vmul.f32 0.0078125, %v1610_v42 }
 0x343   : > { %2647 = vrsqrt.f32 %v1969_v17  ;;  %v1871_v31 = vsub.f32 %v1805_v7, %v1838_v63  ;;  %v1839_v18 = vmul.f32 %v1674_v58, %v1674_v58  ;;  %v3789_v17 = vld [vmem:[%s4125_s4] ss:$0 sm:$0xff] }
 0x344   : > { %v1743_v10 = vpop.xlane.xlu1 %1742 }
 0x345   : > { %v1904_v28 = vmax.f32 %v1871_v31, 0.0  ;;  %v1806_v34 = vmul.f32 0.0078125, %v1743_v10 }
 0x346   : > { %v1745_v16 = vpop.xlane.xlu0 %1744 }
 0x347   : > { %v1970_v3 = vadd.f32 1e-05, %v1904_v28  ;;  %v1872_v35 = vsub.f32 %v1806_v34, %v1839_v18  ;;  %v1807_v51 = vmul.f32 0.0078125, %v1745_v16  ;;  %v1937_v18 = vsub.f32 %v3581_v59, %v1673_v50 }
 0x348   : > { %v1612_v30 = vpop.xlane.xlu1 %1611 }
 0x349   : > { %2649 = vrsqrt.f32 %v1970_v3  ;;  %v1905_v23 = vmax.f32 %v1872_v35, 0.0  ;;  %v3772_v36 = vmul.f32 0.0078125, %v1612_v30 }
 0x34a   : > { %v1614_v19 = vpop.xlane.xlu0 %1613 }
 0x34b   : > { %v1971_v37 = vadd.f32 1e-05, %v1905_v23  ;;  %v1840_v49 = vmul.f32 %v3772_v36, %v3772_v36  ;;  %v3776_v48 = vmul.f32 0.0078125, %v1614_v19 }
 0x34c   : > { %v1747_v24 = vpop.xlane.xlu1 %1746 }
 0x34d   : > { %v2648_v4 = vpop.eup %2647  ;;  %2651 = vrsqrt.f32 %v1971_v37  ;;  %v1873_v25 = vsub.f32 %v1807_v51, %v1840_v49  ;;  %v1841_v14 = vmul.f32 %v3776_v48, %v3776_v48  ;;  %v1808_v54 = vmul.f32 0.0078125, %v1747_v24 }
 0x34e   : > { %v2035_v8 = vmul.f32 %v2648_v4, %v1936_v53  ;;  %v1749_v42 = vpop.xlane.xlu0 %1748  ;;  %v1938_v24 = vsub.f32 %v3585_v52, %v1674_v58 }
 0x34f   : > { %v1906_v20 = vmax.f32 %v1873_v25, 0.0  ;;  %v1874_v63 = vsub.f32 %v1808_v54, %v1841_v14  ;;  %v1809_v35 = vmul.f32 0.0078125, %v1749_v42 }
 0x350   : > { %v2074_v1 = vmul.f32 %v3782_v13, %v2035_v8  ;;  %v1616_v7 = vpop.xlane.xlu1 %1615 }
 0x351   : > { %v1972_v31 = vadd.f32 1e-05, %v1906_v20  ;;  %v3792_v10 = vmul.f32 0.0078125, %v1616_v7  ;;  %v1907_v34 = vmax.f32 %v1874_v63, 0.0 }
 0x352   : > { %v2113_v28 = vadd.f32 %v3789_v17, %v2074_v1  ;;  %v1618_v16 = vpop.xlane.xlu0 %1617 }
 0x353   : > { %v2650_v3 = vpop.eup %2649  ;;  %2653 = vrsqrt.f32 %v1972_v31  ;;  %v1842_v30 = vmul.f32 %v3792_v10, %v3792_v10  ;;  %v3798_v23 = vmul.f32 0.0078125, %v1618_v16  ;;  %v1973_v37 = vadd.f32 1e-05, %v1907_v34 }
 0x354   : > { %2146 = vst [vmem:[%s3802_s26] sm:$0xff] %v2113_v28  ;;  %v2036_v19 = vmul.f32 %v2650_v3, %v1937_v18  ;;  %v1751_v51 = vpop.xlane.xlu1 %1750  ;;  %v1939_v16 = vsub.f32 %v3591_v44, %v3772_v36 }
 0x355   : > { %v1875_v49 = vsub.f32 %v1809_v35, %v1842_v30  ;;  %v1843_v59 = vmul.f32 %v3798_v23, %v3798_v23  ;;  %v1810_v50 = vmul.f32 0.0078125, %v1751_v51  ;;  %2655 = vrsqrt.f32 %v1973_v37 }
 0x356   : > { %v2075_v53 = vmul.f32 %v3782_v13, %v2036_v19  ;;  %v1753_v4 = vpop.xlane.xlu0 %1752 }
 0x357   : > { %v2652_v25 = vpop.eup %2651  ;;  %v1908_v14 = vmax.f32 %v1875_v49, 0.0  ;;  %v1876_v8 = vsub.f32 %v1810_v50, %v1843_v59  ;;  %v1811_v58 = vmul.f32 0.0078125, %v1753_v4  ;;  %v1940_v50 = vsub.f32 %v3598_v26, %v3776_v48 }
 0x358   : > { %v2114_v54 = vadd.f32 %v3789_v17, %v2075_v53  ;;  %v2037_v42 = vmul.f32 %v2652_v25, %v1938_v24  ;;  %v1620_v20 = vpop.xlane.xlu1 %1619  ;;  %v1941_v48 = vsub.f32 %v3602_v2, %v3792_v10 }
 0x359   : > { %v1974_v1 = vadd.f32 1e-05, %v1908_v14  ;;  %v1909_v63 = vmax.f32 %v1876_v8, 0.0  ;;  %v3810_v7 = vmul.f32 0.0078125, %v1620_v20 }
 0x35a   : > { %2147 = vst [vmem:[%s3802_s26 + $0x8] sm:$0xff] %v2114_v54  ;;  %v2076_v31 = vmul.f32 %v3782_v13, %v2037_v42  ;;  %v1622_v28 = vpop.xlane.xlu0 %1621 }
 0x35b   : > { %2657 = vrsqrt.f32 %v1974_v1  ;;  %v1975_v52 = vadd.f32 1e-05, %v1909_v63  ;;  %v1844_v18 = vmul.f32 %v3810_v7, %v3810_v7  ;;  %v3819_v3 = vmul.f32 0.0078125, %v1622_v28 }
 0x35c   : > { %v2115_v34 = vadd.f32 %v3789_v17, %v2076_v31  ;;  %v1755_v35 = vpop.xlane.xlu1 %1754 }
 0x35d   : > { %v2654_v30 = vpop.eup %2653  ;;  %2659 = vrsqrt.f32 %v1975_v52  ;;  %v1877_v19 = vsub.f32 %v1811_v58, %v1844_v18  ;;  %v1812_v37 = vmul.f32 0.0078125, %v1755_v35  ;;  %v1845_v49 = vmul.f32 %v3819_v3, %v3819_v3 }
 0x35e   : > { %2148 = vst [vmem:[%s3802_s26 + $0x10] sm:$0xff] %v2115_v34  ;;  %v2038_v51 = vmul.f32 %v2654_v30, %v1939_v16  ;;  %v1757_v59 = vpop.xlane.xlu0 %1756  ;;  %v1942_v30 = vsub.f32 %v3610_v27, %v3798_v23 }
 0x35f   : > { %v1910_v53 = vmax.f32 %v1877_v19, 0.0  ;;  %v2656_v24 = vpop.eup %2655  ;;  %v1878_v36 = vsub.f32 %v1812_v37, %v1845_v49  ;;  %v1813_v63 = vmul.f32 0.0078125, %v1757_v59 }
 0x360   : > { %v2077_v44 = vmul.f32 %v3782_v13, %v2038_v51  ;;  %v1624_v4 = vpop.xlane.xlu1 %1623  ;;  %v2039_v25 = vmul.f32 %v2656_v24, %v1940_v50 }
 0x361   : > { %v1976_v14 = vadd.f32 1e-05, %v1910_v53  ;;  %v3827_v8 = vmul.f32 0.0078125, %v1624_v4  ;;  %v1911_v42 = vmax.f32 %v1878_v36, 0.0 }
 0x362   : > { %v2116_v54 = vadd.f32 %v3789_v17, %v2077_v44  ;;  %v1626_v20 = vpop.xlane.xlu0 %1625  ;;  %v2078_v1 = vmul.f32 %v3782_v13, %v2039_v25 }
 0x363   : > { %2661 = vrsqrt.f32 %v1976_v14  ;;  %v1846_v26 = vmul.f32 %v3827_v8, %v3827_v8  ;;  %v1977_v31 = vadd.f32 1e-05, %v1911_v42  ;;  %v3836_v28 = vmul.f32 0.0078125, %v1626_v20 }
 0x364   : > { %2149 = vst [vmem:[%s3802_s26 + $0x18] sm:$0xff] %v2116_v54  ;;  %v1759_v52 = vpop.xlane.xlu1 %1758  ;;  %v2117_v18 = vadd.f32 %v3789_v17, %v2078_v1  ;;  %v1943_v42 = vsub.f32 %v3614_v29, %v3810_v7 }
 0x365   : > { %v2658_v58 = vpop.eup %2657  ;;  %v1879_v34 = vsub.f32 %v1813_v63, %v1846_v26  ;;  %v1814_v16 = vmul.f32 0.0078125, %v1759_v52  ;;  %2663 = vrsqrt.f32 %v1977_v31  ;;  %v1847_v19 = vmul.f32 %v3836_v28, %v3836_v28 }
 0x366   : > { %v2040_v35 = vmul.f32 %v2658_v58, %v1941_v48  ;;  %v1761_v37 = vpop.xlane.xlu0 %1760  ;;  %2150 = vst [vmem:[%s3802_s26 + $0x20] sm:$0xff] %v2117_v18  ;;  %v1944_v18 = vsub.f32 %v3622_v0, %v3819_v3 }
 0x367   : > { %v2660_v51 = vpop.eup %2659  ;;  %v1912_v2 = vmax.f32 %v1879_v34, 0.0  ;;  %v1880_v59 = vsub.f32 %v1814_v16, %v1847_v19  ;;  %v1815_v4 = vmul.f32 0.0078125, %v1761_v37 }
 0x368   : > { %v2079_v10 = vmul.f32 %v3782_v13, %v2040_v35  ;;  %v2041_v49 = vmul.f32 %v2660_v51, %v1942_v30  ;;  %v1628_v50 = vpop.xlane.xlu1 %1627 }
 0x369   : > { %v1978_v53 = vadd.f32 1e-05, %v1912_v2  ;;  %v3845_v24 = vmul.f32 0.0078125, %v1628_v50  ;;  %v1913_v23 = vmax.f32 %v1880_v59, 0.0  ;;  %v1945_v50 = vsub.f32 %v3626_v15, %v3827_v8 }
 0x36a   : > { %v2118_v44 = vadd.f32 %v3789_v17, %v2079_v10  ;;  %v2080_v27 = vmul.f32 %v3782_v13, %v2041_v49  ;;  %v1630_v36 = vpop.xlane.xlu0 %1629 }
 0x36b   : > { %2665 = vrsqrt.f32 %v1978_v53  ;;  %v1848_v25 = vmul.f32 %v3845_v24, %v3845_v24  ;;  %v3851_v14 = vmul.f32 0.0078125, %v1630_v36  ;;  %v1979_v20 = vadd.f32 1e-05, %v1913_v23 }
 0x36c   : > { %2151 = vst [vmem:[%s3802_s26 + $0x28] sm:$0xff] %v2118_v44  ;;  %v2119_v54 = vadd.f32 %v3789_v17, %v2080_v27  ;;  %v1763_v1 = vpop.xlane.xlu1 %1762 }
 0x36d   : > { %v2662_v63 = vpop.eup %2661  ;;  %v1881_v26 = vsub.f32 %v1815_v4, %v1848_v25  ;;  %v1849_v48 = vmul.f32 %v3851_v14, %v3851_v14  ;;  %v1816_v31 = vmul.f32 0.0078125, %v1763_v1  ;;  %2667 = vrsqrt.f32 %v1979_v20 }
 0x36e   : > { %2152 = vst [vmem:[%s3802_s26 + $0x30] sm:$0xff] %v2119_v54  ;;  %v2042_v52 = vmul.f32 %v2662_v63, %v1943_v42  ;;  %v1765_v58 = vpop.xlane.xlu0 %1764  ;;  %v1946_v20 = vsub.f32 %v3634_v60, %v3836_v28  ;;  %v1947_v28 = vsub.f32 %v3638_v46, %v3845_v24 }
 0x36f   : > { %v1914_v34 = vmax.f32 %v1881_v26, 0.0  ;;  %v1882_v16 = vsub.f32 %v1816_v31, %v1849_v48  ;;  %v2664_v35 = vpop.eup %2663  ;;  %v1817_v10 = vmul.f32 0.0078125, %v1765_v58 }
 0x370   : > { %v2081_v29 = vmul.f32 %v3782_v13, %v2042_v52  ;;  %v1632_v7 = vpop.xlane.xlu1 %1631  ;;  %v2043_v30 = vmul.f32 %v2664_v35, %v1944_v18 }
 0x371   : > { %v1980_v19 = vadd.f32 1e-05, %v1914_v34  ;;  %v1915_v37 = vmax.f32 %v1882_v16, 0.0  ;;  %v3863_v51 = vmul.f32 0.0078125, %v1632_v7 }
 0x372   : > { %v2120_v2 = vadd.f32 %v3789_v17, %v2081_v29  ;;  %v1634_v49 = vpop.xlane.xlu0 %1633  ;;  %v2082_v59 = vmul.f32 %v3782_v13, %v2043_v30 }
 0x373   : > { %2669 = vrsqrt.f32 %v1980_v19  ;;  %v1981_v0 = vadd.f32 1e-05, %v1915_v37  ;;  %v1850_v3 = vmul.f32 %v3863_v51, %v3863_v51  ;;  %v3872_v53 = vmul.f32 0.0078125, %v1634_v49 }
 0x374   : > { %2153 = vst [vmem:[%s3802_s26 + $0x38] sm:$0xff] %v2120_v2  ;;  %v1767_v44 = vpop.xlane.xlu1 %1766  ;;  %v2121_v23 = vadd.f32 %v3789_v17, %v2082_v59  ;;  %v1948_v59 = vsub.f32 %v3646_v32, %v3851_v14 }
 0x375   : > { %v2666_v27 = vpop.eup %2665  ;;  %2671 = vrsqrt.f32 %v1981_v0  ;;  %v1883_v36 = vsub.f32 %v1817_v10, %v1850_v3  ;;  %v1818_v4 = vmul.f32 0.0078125, %v1767_v44  ;;  %v1851_v54 = vmul.f32 %v3872_v53, %v3872_v53 }
 0x376   : > { %v2044_v25 = vmul.f32 %v2666_v27, %v1945_v50  ;;  %v1769_v42 = vpop.xlane.xlu0 %1768  ;;  %2154 = vst [vmem:[%s3802_s26 + $0x40] sm:$0xff] %v2121_v23 }
 0x377   : > { %v1916_v15 = vmax.f32 %v1883_v36, 0.0  ;;  %v2668_v8 = vpop.eup %2667  ;;  %v1884_v63 = vsub.f32 %v1818_v4, %v1851_v54  ;;  %v1819_v35 = vmul.f32 0.0078125, %v1769_v42 }
 0x378   : > { %v2083_v1 = vmul.f32 %v3782_v13, %v2044_v25  ;;  %v1636_v26 = vpop.xlane.xlu1 %1635  ;;  %v2045_v48 = vmul.f32 %v2668_v8, %v1946_v20 }
 0x379   : > { %v1982_v31 = vadd.f32 1e-05, %v1916_v15  ;;  %v3881_v52 = vmul.f32 0.0078125, %v1636_v26  ;;  %v1917_v18 = vmax.f32 %v1884_v63, 0.0 }
 0x37a   : > { %v2122_v58 = vadd.f32 %v3789_v17, %v2083_v1  ;;  %v1638_v34 = vpop.xlane.xlu0 %1637  ;;  %v2084_v16 = vmul.f32 %v3782_v13, %v2045_v48  ;;  %v1949_v1 = vsub.f32 %v3650_v33, %v3863_v51 }
 0x37b   : > { %2673 = vrsqrt.f32 %v1982_v31  ;;  %v1852_v60 = vmul.f32 %v3881_v52, %v3881_v52  ;;  %v1983_v29 = vadd.f32 1e-05, %v1917_v18  ;;  %v3890_v7 = vmul.f32 0.0078125, %v1638_v34 }
 0x37c   : > { %2155 = vst [vmem:[%s3802_s26 + $0x48] sm:$0xff] %v2122_v58  ;;  %v1771_v30 = vpop.xlane.xlu1 %1770  ;;  %v2123_v37 = vadd.f32 %v3789_v17, %v2084_v16 }
 0x37d   : > { %v2670_v19 = vpop.eup %2669  ;;  %v1885_v2 = vsub.f32 %v1819_v35, %v1852_v60  ;;  %v1820_v10 = vmul.f32 0.0078125, %v1771_v30  ;;  %2675 = vrsqrt.f32 %v1983_v29  ;;  %v1853_v0 = vmul.f32 %v3890_v7, %v3890_v7 }
 0x37e   : > { %v2046_v49 = vmul.f32 %v2670_v19, %v1947_v28  ;;  %v1773_v3 = vpop.xlane.xlu0 %1772  ;;  %2156 = vst [vmem:[%s3802_s26 + $0x50] sm:$0xff] %v2123_v37  ;;  %v1950_v35 = vsub.f32 %v3658_v41, %v3872_v53 }
 0x37f   : > { %v2672_v50 = vpop.eup %2671  ;;  %v1918_v46 = vmax.f32 %v1885_v2, 0.0  ;;  %v1886_v27 = vsub.f32 %v1820_v10, %v1853_v0  ;;  %v1821_v42 = vmul.f32 0.0078125, %v1773_v3  ;;  %v1951_v3 = vsub.f32 %v3662_v9, %v3881_v52 }
 0x380   : > { %v2085_v24 = vmul.f32 %v3782_v13, %v2046_v49  ;;  %v2047_v44 = vmul.f32 %v2672_v50, %v1948_v59  ;;  %v1640_v23 = vpop.xlane.xlu1 %1639 }
 0x381   : > { %v1984_v36 = vadd.f32 1e-05, %v1918_v46  ;;  %v3899_v4 = vmul.f32 0.0078125, %v1640_v23  ;;  %v1919_v14 = vmax.f32 %v1886_v27, 0.0 }
 0x382   : > { %v2124_v25 = vadd.f32 %v3789_v17, %v2085_v24  ;;  %v2086_v32 = vmul.f32 %v3782_v13, %v2047_v44  ;;  %v1642_v54 = vpop.xlane.xlu0 %1641 }
 0x383   : > { %2677 = vrsqrt.f32 %v1984_v36  ;;  %v1854_v20 = vmul.f32 %v3899_v4, %v3899_v4  ;;  %v3905_v15 = vmul.f32 0.0078125, %v1642_v54  ;;  %v1985_v63 = vadd.f32 1e-05, %v1919_v14 }
 0x384   : > { %2157 = vst [vmem:[%s3802_s26 + $0x58] sm:$0xff] %v2124_v25  ;;  %v2125_v8 = vadd.f32 %v3789_v17, %v2086_v32  ;;  %v1775_v26 = vpop.xlane.xlu1 %1774  ;;  %v1952_v14 = vsub.f32 %v3670_v40, %v3890_v7  ;;  %v1953_v7 = vsub.f32 %v3674_v56, %v3899_v4 }
 0x385   : > { %v2674_v48 = vpop.eup %2673  ;;  %v1887_v31 = vsub.f32 %v1821_v42, %v1854_v20  ;;  %v1855_v58 = vmul.f32 %v3905_v15, %v3905_v15  ;;  %v1822_v18 = vmul.f32 0.0078125, %v1775_v26  ;;  %2679 = vrsqrt.f32 %v1985_v63 }
 0x386   : > { %2158 = vst [vmem:[%s3802_s26 + $0x60] sm:$0xff] %v2125_v8  ;;  %v2048_v34 = vmul.f32 %v2674_v48, %v1949_v1  ;;  %v1777_v16 = vpop.xlane.xlu0 %1776 }
 0x387   : > { %v1920_v60 = vmax.f32 %v1887_v31, 0.0  ;;  %v1888_v28 = vsub.f32 %v1822_v18, %v1855_v58  ;;  %v2676_v29 = vpop.eup %2675  ;;  %v1823_v49 = vmul.f32 0.0078125, %v1777_v16 }
 0x388   : > { %v2087_v33 = vmul.f32 %v3782_v13, %v2048_v34  ;;  %v1644_v51 = vpop.xlane.xlu1 %1643  ;;  %v2049_v30 = vmul.f32 %v2676_v29, %v1950_v35 }
 0x389   : > { %v1986_v19 = vadd.f32 1e-05, %v1920_v60  ;;  %v1921_v37 = vmax.f32 %v1888_v28, 0.0  ;;  %v3917_v2 = vmul.f32 0.0078125, %v1644_v51 }
 0x38a   : > { %v2126_v10 = vadd.f32 %v3789_v17, %v2087_v33  ;;  %v1646_v59 = vpop.xlane.xlu0 %1645  ;;  %v2088_v0 = vmul.f32 %v3782_v13, %v2049_v30  ;;  %v1954_v30 = vsub.f32 %v3682_v12, %v3905_v15 }
 0x38b   : > { %2681 = vrsqrt.f32 %v1986_v19  ;;  %v1987_v41 = vadd.f32 1e-05, %v1921_v37  ;;  %v1856_v53 = vmul.f32 %v3917_v2, %v3917_v2  ;;  %v3926_v50 = vmul.f32 0.0078125, %v1646_v59 }
 0x38c   : > { %2159 = vst [vmem:[%s3802_s26 + $0x68] sm:$0xff] %v2126_v10  ;;  %v1779_v46 = vpop.xlane.xlu1 %1778  ;;  %v2127_v44 = vadd.f32 %v3789_v17, %v2088_v0 }
 0x38d   : > { %v2678_v24 = vpop.eup %2677  ;;  %2683 = vrsqrt.f32 %v1987_v41  ;;  %v1889_v27 = vsub.f32 %v1823_v49, %v1856_v53  ;;  %v1824_v23 = vmul.f32 0.0078125, %v1779_v46  ;;  %v1857_v25 = vmul.f32 %v3926_v50, %v3926_v50 }
 0x38e   : > { %v2050_v36 = vmul.f32 %v2678_v24, %v1951_v3  ;;  %v1781_v32 = vpop.xlane.xlu0 %1780  ;;  %2160 = vst [vmem:[%s3802_s26 + $0x70] sm:$0xff] %v2127_v44 }
 0x38f   : > { %v1922_v9 = vmax.f32 %v1889_v27, 0.0  ;;  %v2680_v52 = vpop.eup %2679  ;;  %v1890_v42 = vsub.f32 %v1824_v23, %v1857_v25  ;;  %v1825_v18 = vmul.f32 0.0078125, %v1781_v32 }
 0x390   : > { %v2089_v54 = vmul.f32 %v3782_v13, %v2050_v36  ;;  %v1648_v20 = vpop.xlane.xlu1 %1647  ;;  %v2051_v8 = vmul.f32 %v2680_v52, %v1952_v14  ;;  %v1955_v36 = vsub.f32 %v3686_v5, %v3917_v2 }
 0x391   : > { %v1988_v1 = vadd.f32 1e-05, %v1922_v9  ;;  %v3935_v63 = vmul.f32 0.0078125, %v1648_v20  ;;  %v1923_v48 = vmax.f32 %v1890_v42, 0.0 }
 0x392   : > { %v2128_v26 = vadd.f32 %v3789_v17, %v2089_v54  ;;  %v1650_v31 = vpop.xlane.xlu0 %1649  ;;  %v2090_v58 = vmul.f32 %v3782_v13, %v2051_v8  ;;  %v1956_v8 = vsub.f32 %v3694_v55, %v3926_v50 }
 0x393   : > { %2685 = vrsqrt.f32 %v1988_v1  ;;  %v1858_v40 = vmul.f32 %v3935_v63, %v3935_v63  ;;  %v1989_v34 = vadd.f32 1e-05, %v1923_v48  ;;  %v3944_v16 = vmul.f32 0.0078125, %v1650_v31 }
 0x394   : > { %2161 = vst [vmem:[%s3802_s26 + $0x78] sm:$0xff] %v2128_v26  ;;  %v1783_v35 = vpop.xlane.xlu1 %1782  ;;  %v2129_v28 = vadd.f32 %v3789_v17, %v2090_v58 }
 0x395   : > { %v2682_v60 = vpop.eup %2681  ;;  %v1891_v29 = vsub.f32 %v1825_v18, %v1858_v40  ;;  %v1826_v33 = vmul.f32 0.0078125, %v1783_v35  ;;  %2687 = vrsqrt.f32 %v1989_v34  ;;  %v1859_v19 = vmul.f32 %v3944_v16, %v3944_v16 }
 0x396   : > { %v2052_v51 = vmul.f32 %v2682_v60, %v1953_v7  ;;  %v1785_v37 = vpop.xlane.xlu0 %1784  ;;  %2162 = vst [vmem:[%s3802_s26 + $0x80] sm:$0xff] %v2129_v28  ;;  %v1957_v28 = vsub.f32 %v3698_v45, %v3935_v63 }
 0x397   : > { %v2684_v10 = vpop.eup %2683  ;;  %v1924_v56 = vmax.f32 %v1891_v29, 0.0  ;;  %v1892_v59 = vsub.f32 %v1826_v33, %v1859_v19  ;;  %v1827_v24 = vmul.f32 0.0078125, %v1785_v37 }
 0x398   : > { %v2091_v4 = vmul.f32 %v3782_v13, %v2052_v51  ;;  %v2053_v49 = vmul.f32 %v2684_v10, %v1954_v30  ;;  %v1652_v0 = vpop.xlane.xlu1 %1651 }
 0x399   : > { %v1990_v41 = vadd.f32 1e-05, %v1924_v56  ;;  %v3953_v53 = vmul.f32 0.0078125, %v1652_v0  ;;  %v1925_v15 = vmax.f32 %v1892_v59, 0.0 }
 0x39a   : > { %v2130_v3 = vadd.f32 %v3789_v17, %v2091_v4  ;;  %v2092_v12 = vmul.f32 %v3782_v13, %v2053_v49  ;;  %v1654_v46 = vpop.xlane.xlu0 %1653  ;;  %v1958_v49 = vsub.f32 %v3706_v39, %v3944_v16 }
 0x39b   : > { %2689 = vrsqrt.f32 %v1990_v41  ;;  %v1860_v44 = vmul.f32 %v3953_v53, %v3953_v53  ;;  %v3959_v27 = vmul.f32 0.0078125, %v1654_v46  ;;  %v1991_v25 = vadd.f32 1e-05, %v1925_v15 }
 0x39c   : > { %2163 = vst [vmem:[%s3802_s26 + $0x88] sm:$0xff] %v2130_v3  ;;  %v2131_v23 = vadd.f32 %v3789_v17, %v2092_v12  ;;  %v1787_v32 = vpop.xlane.xlu1 %1786  ;;  %v1959_v16 = vsub.f32 %v3710_v43, %v3953_v53 }
 0x39d   : > { %v2686_v14 = vpop.eup %2685  ;;  %v1893_v9 = vsub.f32 %v1827_v24, %v1860_v44  ;;  %v1861_v52 = vmul.f32 %v3959_v27, %v3959_v27  ;;  %v1828_v54 = vmul.f32 0.0078125, %v1787_v32  ;;  %2691 = vrsqrt.f32 %v1991_v25 }
 0x39e   : > { %2164 = vst [vmem:[%s3802_s26 + $0x90] sm:$0xff] %v2131_v23  ;;  %v2054_v42 = vmul.f32 %v2686_v14, %v1955_v36  ;;  %v1789_v20 = vpop.xlane.xlu0 %1788 }
 0x39f   : > { %v1926_v1 = vmax.f32 %v1893_v9, 0.0  ;;  %v1894_v26 = vsub.f32 %v1828_v54, %v1861_v52  ;;  %v2688_v48 = vpop.eup %2687  ;;  %v1829_v34 = vmul.f32 0.0078125, %v1789_v20 }
 0x3a0   : > { %v2093_v5 = vmul.f32 %v3782_v13, %v2054_v42  ;;  %v1656_v2 = vpop.xlane.xlu1 %1655  ;;  %v2055_v31 = vmul.f32 %v2688_v48, %v1956_v8  ;;  %v1960_v8 = vsub.f32 %v3718_v22, %v3959_v27 }
 0x3a1   : > { %v1992_v58 = vadd.f32 1e-05, %v1926_v1  ;;  %v1927_v18 = vmax.f32 %v1894_v26, 0.0  ;;  %v3971_v40 = vmul.f32 0.0078125, %v1656_v2 }
 0x3a2   : > { %v2132_v7 = vadd.f32 %v3789_v17, %v2093_v5  ;;  %v1658_v35 = vpop.xlane.xlu0 %1657  ;;  %v2094_v60 = vmul.f32 %v3782_v13, %v2055_v31 }
 0x3a3   : > { %2693 = vrsqrt.f32 %v1992_v58  ;;  %v1993_v55 = vadd.f32 1e-05, %v1927_v18  ;;  %v1862_v50 = vmul.f32 %v3971_v40, %v3971_v40  ;;  %v3980_v29 = vmul.f32 0.0078125, %v1658_v35 }
 0x3a4   : > { %2165 = vst [vmem:[%s3802_s26 + $0x98] sm:$0xff] %v2132_v7  ;;  %v1791_v33 = vpop.xlane.xlu1 %1790  ;;  %v2133_v30 = vadd.f32 %v3789_v17, %v2094_v60 }
 0x3a5   : > { %v2690_v51 = vpop.eup %2689  ;;  %2695 = vrsqrt.f32 %v1993_v55  ;;  %v1895_v19 = vsub.f32 %v1829_v34, %v1862_v50  ;;  %v1830_v37 = vmul.f32 0.0078125, %v1791_v33  ;;  %v1863_v56 = vmul.f32 %v3980_v29, %v3980_v29 }
 0x3a6   : > { %v2056_v10 = vmul.f32 %v2690_v51, %v1957_v28  ;;  %v1793_v4 = vpop.xlane.xlu0 %1792  ;;  %2166 = vst [vmem:[%s3802_s26 + $0xa0] sm:$0xff] %v2133_v30  ;;  %v1961_v28 = vsub.f32 %v3722_v57, %v3971_v40 }
 0x3a7   : > { %v1928_v45 = vmax.f32 %v1895_v19, 0.0  ;;  %v2692_v63 = vpop.eup %2691  ;;  %v1896_v0 = vsub.f32 %v1830_v37, %v1863_v56  ;;  %v1831_v36 = vmul.f32 0.0078125, %v1793_v4  ;;  %v1962_v4 = vsub.f32 %v3730_v47, %v3980_v29 }
 0x3a8   : > { %v2095_v59 = vmul.f32 %v3782_v13, %v2056_v10  ;;  %v1660_v41 = vpop.xlane.xlu1 %1659  ;;  %v2057_v3 = vmul.f32 %v2692_v63, %v1958_v49 }
 0x3a9   : > { %v1994_v12 = vadd.f32 1e-05, %v1928_v45  ;;  %v3989_v15 = vmul.f32 0.0078125, %v1660_v41  ;;  %v1929_v24 = vmax.f32 %v1896_v0, 0.0 }
 0x3aa   : > { %v2134_v46 = vadd.f32 %v3789_v17, %v2095_v59  ;;  %v1662_v44 = vpop.xlane.xlu0 %1661  ;;  %v2096_v23 = vmul.f32 %v3782_v13, %v2057_v3 }
 0x3ab   : > { %2697 = vrsqrt.f32 %v1994_v12  ;;  %v1864_v39 = vmul.f32 %v3989_v15, %v3989_v15  ;;  %v1995_v25 = vadd.f32 1e-05, %v1929_v24  ;;  %v3998_v32 = vmul.f32 0.0078125, %v1662_v44 }
 0x3ac   : > { %2167 = vst [vmem:[%s3802_s26 + $0xa8] sm:$0xff] %v2134_v46  ;;  %v1795_v14 = vpop.xlane.xlu1 %1794  ;;  %v2135_v52 = vadd.f32 %v3789_v17, %v2096_v23  ;;  %v1963_v29 = vsub.f32 %v3734_v6, %v3989_v15 }
 0x3ad   : > { %v2694_v9 = vpop.eup %2693  ;;  %v1897_v54 = vsub.f32 %v1831_v36, %v1864_v39  ;;  %v1832_v42 = vmul.f32 0.0078125, %v1795_v14  ;;  %2699 = vrsqrt.f32 %v1995_v25  ;;  %v1865_v1 = vmul.f32 %v3998_v32, %v3998_v32 }
 0x3ae   : > { %v2058_v20 = vmul.f32 %v2694_v9, %v1959_v16  ;;  %v1797_v26 = vpop.xlane.xlu0 %1796  ;;  %2168 = vst [vmem:[%s3802_s26 + $0xb0] sm:$0xff] %v2135_v52 }
 0x3af   : > { %v2696_v48 = vpop.eup %2695  ;;  %v1930_v43 = vmax.f32 %v1897_v54, 0.0  ;;  %v1898_v2 = vsub.f32 %v1832_v42, %v1865_v1  ;;  %v1833_v35 = vmul.f32 0.0078125, %v1797_v26  ;;  %v1964_v42 = vsub.f32 %v3742_v62, %v3998_v32 }
 0x3b0   : > { %v2097_v53 = vmul.f32 %v3782_v13, %v2058_v20  ;;  %v2059_v5 = vmul.f32 %v2696_v48, %v1960_v8  ;;  %v1664_v31 = vpop.xlane.xlu1 %1663 }
 0x3b1   : > { %v1996_v58 = vadd.f32 1e-05, %v1930_v43  ;;  %v4007_v18 = vmul.f32 0.0078125, %v1664_v31  ;;  %v1931_v27 = vmax.f32 %v1898_v2, 0.0 }
 0x3b2   : > { %v2136_v7 = vadd.f32 %v3789_v17, %v2097_v53  ;;  %v2098_v22 = vmul.f32 %v3782_v13, %v2059_v5  ;;  %v1666_v34 = vpop.xlane.xlu0 %1665 }
 0x3b3   : > { %2701 = vrsqrt.f32 %v1996_v58  ;;  %v1866_v60 = vmul.f32 %v4007_v18, %v4007_v18  ;;  %v4013_v55 = vmul.f32 0.0078125, %v1666_v34  ;;  %v1997_v33 = vadd.f32 1e-05, %v1931_v27 }
 0x3b4   : > { %2169 = vst [vmem:[%s3802_s26 + $0xb8] sm:$0xff] %v2136_v7  ;;  %v2137_v50 = vadd.f32 %v3789_v17, %v2098_v22  ;;  %v1799_v51 = vpop.xlane.xlu1 %1798  ;;  %v1965_v62 = vsub.f32 %v3746_v38, %v4007_v18 }
 0x3b5   : > { %v2698_v30 = vpop.eup %2697  ;;  %v1899_v19 = vsub.f32 %v1833_v35, %v1866_v60  ;;  %v1867_v37 = vmul.f32 %v4013_v55, %v4013_v55  ;;  %v1834_v10 = vmul.f32 0.0078125, %v1799_v51  ;;  %2703 = vrsqrt.f32 %v1997_v33 }
 0x3b6   : > { %2170 = vst [vmem:[%s3802_s26 + $0xc0] sm:$0xff] %v2137_v50  ;;  %v2060_v56 = vmul.f32 %v2698_v30, %v1961_v28  ;;  %v1966_v7 = vsub.f32 %v3754_v61, %v4013_v55 }
 0x3b7   : > { %v1932_v49 = vmax.f32 %v1899_v19, 0.0  ;;  %v1900_v45 = vsub.f32 %v1834_v10, %v1867_v37  ;;  %v2700_v63 = vpop.eup %2699 }
 0x3b8   : > { %v2099_v57 = vmul.f32 %v3782_v13, %v2060_v56  ;;  %v1668_v40 = vpop.xlane.xlu1 %1667  ;;  %v1670_v59 = vpop.xlane.xlu0 %1669  ;;  %v2061_v0 = vmul.f32 %v2700_v63, %v1962_v4 }
 0x3b9   : > { %v1998_v41 = vadd.f32 1e-05, %v1932_v49  ;;  %v1933_v3 = vmax.f32 %v1900_v45, 0.0  ;;  %v1703_v12 = vmul.f32 0.0078125, %v1668_v40  ;;  %v1704_v24 = vmul.f32 0.0078125, %v1670_v59 }
 0x3ba   : > { %v2138_v46 = vadd.f32 %v3789_v17, %v2099_v57  ;;  %v2100_v44 = vmul.f32 %v3782_v13, %v2061_v0 }
 0x3bb   : > { %2705 = vrsqrt.f32 %v1998_v41  ;;  %v1999_v47 = vadd.f32 1e-05, %v1933_v3  ;;  %v1868_v23 = vmul.f32 %v1703_v12, %v1703_v12  ;;  %v1869_v36 = vmul.f32 %v1704_v24, %v1704_v24 }
 0x3bc   : > { %2171 = vst [vmem:[%s3802_s26 + $0xc8] sm:$0xff] %v2138_v46  ;;  %v1801_v39 = vpop.xlane.xlu0 %1800  ;;  %v1803_v16 = vpop.xlane.xlu1 %1802  ;;  %v2139_v14 = vadd.f32 %v3789_v17, %v2100_v44  ;;  %v1967_v60 = vsub.f32 %v3761_v21, %v1703_v12  ;;  %v1968_v55 = vsub.f32 %v3764_v11, %v1704_v24 }
 0x3bd   : > { %v2702_v25 = vpop.eup %2701  ;;  %2707 = vrsqrt.f32 %v1999_v47  ;;  %v1835_v9 = vmul.f32 0.0078125, %v1801_v39  ;;  %v1836_v52 = vmul.f32 0.0078125, %v1803_v16 }
 0x3be   : > { %v2062_v54 = vmul.f32 %v2702_v25, %v1963_v29  ;;  %2172 = vst [vmem:[%s3802_s26 + $0xd0] sm:$0xff] %v2139_v14 }
 0x3bf   : > { %v1901_v20 = vsub.f32 %v1835_v9, %v1868_v23  ;;  %v1902_v8 = vsub.f32 %v1836_v52, %v1869_v36  ;;  %v2704_v1 = vpop.eup %2703 }
 0x3c0   : > { %v2101_v6 = vmul.f32 %v3782_v13, %v2062_v54  ;;  %v2063_v15 = vmul.f32 %v2704_v1, %v1964_v42 }
 0x3c1   : > { %v1934_v26 = vmax.f32 %v1901_v20, 0.0  ;;  %v1935_v48 = vmax.f32 %v1902_v8, 0.0 }
 0x3c2   : > { %v2140_v43 = vadd.f32 %v3789_v17, %v2101_v6  ;;  %v2102_v53 = vmul.f32 %v3782_v13, %v2063_v15 }
 0x3c3   : > { %v2000_v5 = vadd.f32 1e-05, %v1934_v26  ;;  %v2001_v2 = vadd.f32 1e-05, %v1935_v48 }
 0x3c4   : > { %2173 = vst [vmem:[%s3802_s26 + $0xd8] sm:$0xff] %v2140_v43  ;;  %v2141_v31 = vadd.f32 %v3789_v17, %v2102_v53 }
 0x3c5   : > { %v2706_v32 = vpop.eup %2705  ;;  %2709 = vrsqrt.f32 %v2000_v5 }
 0x3c6   : > { %v2064_v58 = vmul.f32 %v2706_v32, %v1965_v62  ;;  %2711 = vrsqrt.f32 %v2001_v2  ;;  %2174 = vst [vmem:[%s3802_s26 + $0xe0] sm:$0xff] %v2141_v31 }
 0x3c7   : > { %v2708_v22 = vpop.eup %2707 }
 0x3c8   : > { %v2103_v27 = vmul.f32 %v3782_v13, %v2064_v58  ;;  %v2065_v34 = vmul.f32 %v2708_v22, %v1966_v7 }
 0x3ca   : > { %v2142_v35 = vadd.f32 %v3789_v17, %v2103_v27  ;;  %v2104_v38 = vmul.f32 %v3782_v13, %v2065_v34 }
 0x3cc   : > { %2175 = vst [vmem:[%s3802_s26 + $0xe8] sm:$0xff] %v2142_v35  ;;  %v2143_v18 = vadd.f32 %v3789_v17, %v2104_v38 }
 0x3ce   : > { %2176 = vst [vmem:[%s3802_s26 + $0xf0] sm:$0xff] %v2143_v18 }
 0x3cf   : > { %v2710_v61 = vpop.eup %2709 }
 0x3d0   : > { %v2712_v50 = vpop.eup %2711  ;;  %v2066_v28 = vmul.f32 %v2710_v61, %v1967_v60 }
 0x3d1   : > { %v2067_v33 = vmul.f32 %v2712_v50, %v1968_v55  ;;  %2186 = sbr.rel (!%p4202_p9) target bundleno = 1012 (0x3f4), region = 56 }
 0x3d2   : > { %v2105_v51 = vmul.f32 %v3782_v13, %v2066_v28 }
 0x3d3   : > { %v2106_v30 = vmul.f32 %v3782_v13, %v2067_v33 }
 0x3d4   : > { %v2144_v19 = vadd.f32 %v3789_v17, %v2105_v51 }
 0x3d5   : > { %v2145_v37 = vadd.f32 %v3789_v17, %v2106_v30 }
 0x3d6   : > { %2177 = vst [vmem:[%s3802_s26 + $0xf8] sm:$0xff] %v2144_v19 }
 0x3d7   : > { %2178 = vst [vmem:[%s3802_s26 + $0x100] sm:$0xff] %v2145_v37 }
 0x3d8   : > { %s4212_s12 = smov (!%p2189_p10, %s2188_s12), 33 }
 0x3d9   : > { %s4062_s25 = sshll.u32 %s4212_s12, 7 }
 0x3da   : > { %s2193_s28 = ssub.s32 4224, %s4062_s25 }
 0x3db   : > { %2194 = vsyncadd %s2180_s8, %s2193_s28  ;;  %p2307_p1 = scmp.ne.s32.totalorder %s4062_s25, 0  ;;  %s2314_s30 = smul.u32 4224, %s2967_s22 }
 0x3dc   : > { %s2199_s9 = sshll.u32 %s3802_s26, 4  ;;  %s2913_s16 = smov [#allocation8]   ;;  %s4075_s9 = int_to_ptr.vmem [resolvable:$true] %s2199_s9 }
 0x3dd   : > { %s4073_s14 = scalar_lea.hbm %s4126_s5, %s2314_s30  ;;  %s2830_s15 = scalar_lea.vmem %s4075_s9, %s4062_s25 }
 0x3de   : > { %p2831_p3 = scmp.ne.s32.totalorder %s4075_s9, %s2830_s15  ;;  %s2834_s29 = sshll.u32 %s2913_s16, 4  ;;  %s2835_s29 = int_to_ptr.vmem [resolvable:$false] %s2834_s29 }
 0x3df   : > { %s2836_s22 = scalar_lea.vmem %s2835_s29, 8448  ;;  %p2837_p11 = scmp.lt.s32.totalorder %s4075_s9, %s2835_s29 }
 0x3e0   : > { %p2832_p5 = pnand %p2831_p3, %p2307_p1  ;;  %p2838_p13 = scmp.lt.s32.totalorder %s2836_s22, %s2830_s15 }
 0x3e2   : > { %p2833_p6 = pneg %p2832_p5  ;;  %p2839_p0 = por %p2838_p13, %p2837_p11 }
 0x3e4   : > { %p2840_p12 = pnand %p2839_p0, %p2833_p6 }
 0x3e6   : > { %2843 = shalt.err (!%p2840_p12)
}
 0x3e7   : > { %s2844_s7 = scalar_lea.hbm %s4073_s14, %s4062_s25  ;;  %s2848_s26 = scalar_lea.hbm %s4126_s5, 8320 }
 0x3e8   : > { %p2845_p7 = scmp.ne.s32.totalorder %s4073_s14, %s2844_s7  ;;  %p2849_p9 = scmp.lt.u32.totalorder %s4073_s14, %s4126_s5 }
 0x3e9   : > { %p2850_p10 = scmp.lt.u32.totalorder %s2848_s26, %s2844_s7  ;;  %p2852_p5 = scmp.lt.u32.totalorder %s2844_s7, %s4073_s14 }
 0x3ea   : > { %p2846_p2 = pnand %p2845_p7, %p2307_p1 }
 0x3eb   : > { %p2851_p3 = por %p2850_p10, %p2849_p9 }
 0x3ec   : > { %p2847_p8 = pneg %p2846_p2 }
 0x3ed   : > { %p2853_p6 = por %p2852_p5, %p2851_p3 }
 0x3ef   : > { %p2854_p11 = pnand %p2853_p6, %p2847_p8 }
 0x3f1   : > { %2857 = shalt.err (!%p2854_p11)
}
 0x3f2   : > { %s2914_s28 = smov 128   ;;  %s2915_s30 = smov 8  }
 0x3f3   : > { %2205 = dma.vmem_to_hbm [thread:$0]  (%p2307_p1), %s4075_s9, %s4062_s25, %s4073_s14, %s2180_s8, %s2914_s28, %s2914_s28, %s2915_s30  }
 0x3f4 PF: > { %s2214_s27 = sand.u32 1, %s2888_s18   ;;  %p4203_p13 = scmp.ne.s32.totalorder %s4134_s6, 0 }
 0x3f5   : > { %s2215_s11 = scalar_lea.sflag [#allocation4], %s2214_s27 }
 0x3f6   : > { %p2463_p0 = pnand %p2295_p4, %p4203_p13 }
 0x3f8   : > { %2883 = dma.done.wait (!%p2463_p0), %s2215_s11, 4224  }
 0x3f9   : > { %2885 = vsyncadd (!%p2463_p0), %s2215_s11, 4294963072  ;;  %s4204_s15 = sld [smem:[#allocation12_spill]]  ;;  %p19_p12 = scmp.ge.s32.totalorder %s2971_s24, 4  }
 0x3fa   : > { %s4205_s18 = smov %s2892_s19  ;;  %s4206_s19 = smov %s2896_s20 }
 0x3fb   : > { %s4208_s21 = smov %s2971_s24  ;;  %21 = sbr.rel (!%p19_p12) target bundleno = 6 (0x6), region = 93 }
 0x3ff   : > { %s4207_s20 = smov %s4204_s15 }
 0x402   :  { %2220 = vsyncpa [#allocation3], 1 }
 0x403   :  { %2222 = vsyncpa [#allocation3 + $0x1], 1 }
 0x404   :  { %2223 = vsyncpa [#allocation6], 1 }
 0x405   :  { %2224 = vsyncpa [#allocation4], 1 }
 0x406   :  { %2226 = vsyncpa [#allocation4 + $0x1], 1 }

</bundles_post_ra>
